<compile_context>
chip_gen: v5e
topology: v5e:2x2
jax: 0.10.0
libtpu: 0.0.40
codegen_flags: <defaults>
</compile_context>

<pallas_src>
import functools

import jax
import jax.numpy as jnp
from jax.experimental import pallas as pl
from jax.experimental.pallas import tpu as pltpu


NEG_SLOPE = 0.01  # nn.LeakyReLU default


def _round_up(v, m):
    return ((v + m - 1) // m) * m


# ----------------------------- Pallas kernel ---------------------------------

def _gemm_fused_kernel(*refs, apply_leaky, negative_slope, has_residual):
    """One (tm, tn) output tile of A @ B + bias with optional fused LeakyReLU
    and residual add.  K-axis reduction accumulates into a f32 VMEM scratch."""
    if has_residual:
        a_ref, b_ref, bias_ref, res_ref, o_ref, acc_ref = refs
    else:
        a_ref, b_ref, bias_ref, o_ref, acc_ref = refs
        res_ref = None

    k = pl.program_id(2)

    @pl.when(k == 0)
    def _init():
        acc_ref[...] = jnp.zeros_like(acc_ref)

    acc_ref[...] += jnp.dot(a_ref[...], b_ref[...],
                            preferred_element_type=jnp.float32)

    @pl.when(k == pl.num_programs(2) - 1)
    def _finalize():
        y = acc_ref[...] + bias_ref[...]          # f32 epilogue (VPU, free slots)
        if apply_leaky:
            y = jnp.where(y >= 0, y, negative_slope * y)
        if has_residual:
            y = y + res_ref[...]
        o_ref[...] = y.astype(o_ref.dtype)


def _pallas_gemm_fused(a, b, bias, residual=None, *, apply_leaky=False,
                       negative_slope=NEG_SLOPE,
                       tm=512, tn=256, tk=512,
                       compute_dtype=jnp.bfloat16, out_dtype=jnp.float32):
    """out = act(a @ b + bias[None, :]) (+ residual), via a tiled Pallas GEMM.

    a: [M, K] im2col patches, b: [K, N] flattened weights, bias: [N],
    residual: optional [M, N] (added in f32 after the activation).
    """
    M, K = a.shape
    K2, N = b.shape
    assert K == K2 and bias.shape == (N,)

    # M: one full block when small (amortizes ~0.35us/grid-step); else tile by tm.
    if M <= tm:
        tm_eff, Mp = M, M
    else:
        tm_eff, Mp = tm, _round_up(M, tm)
    # K: keep the true K as a single un-padded block when it fits (avoids a padded
    #    HBM copy of the large im2col matrix); only tile + pad for very large K.
    if K <= tk:
        tk_eff, Kp = K, K
    else:
        tk_eff, Kp = tk, _round_up(K, tk)
    # N (output channels): tile for large channel counts.
    if N <= tn:
        tn_eff, Np = N, N
    else:
        tn_eff, Np = tn, _round_up(N, tn)

    a_c = a.astype(compute_dtype)
    b_c = b.astype(compute_dtype)
    if (Mp, Kp) != (M, K):
        a_c = jnp.zeros((Mp, Kp), compute_dtype).at[:M, :K].set(a_c)
    if (Kp, Np) != (K, N):
        b_c = jnp.zeros((Kp, Np), compute_dtype).at[:K, :N].set(b_c)
    bias_row = bias.astype(jnp.float32).reshape(1, N)
    if Np != N:
        bias_row = jnp.zeros((1, Np), jnp.float32).at[:, :N].set(bias_row)

    has_res = residual is not None
    operands = [a_c, b_c, bias_row]
    in_specs = [
        pl.BlockSpec((tm_eff, tk_eff), lambda i, j, k: (i, k)),
        pl.BlockSpec((tk_eff, tn_eff), lambda i, j, k: (k, j)),
        pl.BlockSpec((1, tn_eff), lambda i, j, k: (0, j)),
    ]
    if has_res:
        res = residual.astype(jnp.float32)
        if (Mp, Np) != (M, N):
            res = jnp.zeros((Mp, Np), jnp.float32).at[:M, :N].set(res)
        operands.append(res)
        in_specs.append(pl.BlockSpec((tm_eff, tn_eff), lambda i, j, k: (i, j)))

    grid = (Mp // tm_eff, Np // tn_eff, Kp // tk_eff)

    # Explicit VMEM budget: double-buffered inputs + f32 acc + output, with
    # headroom, clamped well under v7x's 64 MiB physical VMEM.
    cd = jnp.dtype(compute_dtype).itemsize
    od = jnp.dtype(out_dtype).itemsize
    vmem_est = (2 * tm_eff * tk_eff * cd + 2 * tk_eff * tn_eff * cd
                + 2 * tn_eff * 4 + tm_eff * tn_eff * 4
                + 2 * tm_eff * tn_eff * od
                + (2 * tm_eff * tn_eff * 4 if has_res else 0))
    vmem_limit = int(min(max(2 * vmem_est, 16 * 1024 * 1024), 48 * 1024 * 1024))

    kernel = functools.partial(_gemm_fused_kernel,
                               apply_leaky=apply_leaky,
                               negative_slope=negative_slope,
                               has_residual=has_res)

    out = pl.pallas_call(
        kernel,
        out_shape=jax.ShapeDtypeStruct((Mp, Np), out_dtype),
        grid_spec=pltpu.PrefetchScalarGridSpec(
            num_scalar_prefetch=0,
            grid=grid,
            in_specs=in_specs,
            out_specs=pl.BlockSpec((tm_eff, tn_eff), lambda i, j, k: (i, j)),
            scratch_shapes=[pltpu.VMEM((tm_eff, tn_eff), jnp.float32)],
        ),
        compiler_params=pltpu.CompilerParams(
            dimension_semantics=("parallel", "parallel", "arbitrary"),
            vmem_limit_bytes=vmem_limit),
    )(*operands)

    if (Mp, Np) != (M, N):
        out = out[:M, :N]
    return out


# ----------------------------- conv helpers (NHWC) -----------------------------

def _im2col_nhwc(x_nhwc, kh, kw, stride, padding):
    """[N,H,W,C] -> ([N*OH*OW, KH*KW*C] patches, OH, OW); K order = (kh, kw, c)."""
    n, h, w, c = x_nhwc.shape
    oh = (h + 2 * padding - kh) // stride + 1
    ow = (w + 2 * padding - kw) // stride + 1
    if padding:
        x_nhwc = jnp.pad(
            x_nhwc, ((0, 0), (padding, padding), (padding, padding), (0, 0)))
    cols = []
    for i in range(kh):
        for j in range(kw):
            cols.append(jax.lax.slice(
                x_nhwc,
                (0, i, j, 0),
                (n, i + stride * (oh - 1) + 1, j + stride * (ow - 1) + 1, c),
                (1, stride, stride, 1)))              # [N, OH, OW, C]
    patches = jnp.concatenate(cols, axis=-1)           # [N, OH, OW, KH*KW*C]
    return patches.reshape(n * oh * ow, kh * kw * c), oh, ow


def _flatten_weight(w):
    # [O, C, KH, KW] -> [KH*KW*C, O], matching the (kh, kw, c) im2col ordering.
    o, c, kh, kw = w.shape
    return jnp.transpose(w, (2, 3, 1, 0)).reshape(kh * kw * c, o)


# --------------------------- ResidualBlockM forward ----------------------------

@functools.partial(jax.jit, static_argnames=("negative_slope",))
def residual_block_forward(x, mask, w1, b1, w2, b2, w_skip, b_skip,
                           *, negative_slope=NEG_SLOPE):
    """ResidualBlockM.forward(x, mask).

    `mask` is accepted for API parity but unused: every mask-related statement in
    CustomConv2DPyMV3.forward is dead (commented-out) code, so the active path is
    a plain Conv2d for each sub-module.
    """
    del mask
    n, c, h, w = x.shape

    # Single layout change up front; all convs run NHWC internally.
    x_nhwc = jnp.transpose(x, (0, 2, 3, 1))
    x_bf16 = x_nhwc.astype(jnp.bfloat16)          # bf16 patches -> half the HBM traffic

    # conv1 (3x3, pad 1, stride 1) with fused LeakyReLU epilogue.
    a1, oh, ow = _im2col_nhwc(x_bf16, 3, 3, 1, 1)
    out1 = _pallas_gemm_fused(a1, _flatten_weight(w1), b1, apply_leaky=True,
                              negative_slope=negative_slope)
    oc1 = w1.shape[0]
    out1_nhwc = out1.reshape(n, oh, ow, oc1)

    # Skip path: 1x1 conv when channel counts differ, else identity.
    if w_skip is not None:
        a_skip = x_bf16.reshape(n * h * w, c)
        identity = _pallas_gemm_fused(a_skip, _flatten_weight(w_skip), b_skip)
    else:
        identity = x_nhwc.reshape(n * h * w, c)

    # conv2 (3x3, pad 1) with fused LeakyReLU + residual-add epilogue.
    a2, _, _ = _im2col_nhwc(out1_nhwc.astype(jnp.bfloat16), 3, 3, 1, 1)
    oc2 = w2.shape[0]
    out2 = _pallas_gemm_fused(a2, _flatten_weight(w2), b2,
                              residual=identity, apply_leaky=True,
                              negative_slope=negative_slope)

    y_nhwc = out2.reshape(n, oh, ow, oc2)
    return jnp.transpose(y_nhwc, (0, 3, 1, 2))    # back to NCHW (module semantics)


# ----------------------------- Demo / check -----------------------------------

if __name__ == "__main__":
    in_ch, out_ch = 4, 8
    N, H, W = 2, 16, 16

    key = jax.random.PRNGKey(0)
    kx, km, k1w, k1b, k2w, k2b, ksw, ksb = jax.random.split(key, 8)

    def conv_init(kw_key, kb_key, o, c, ksz):
        # PyTorch Conv2d default-style init: U(-1/sqrt(fan_in), 1/sqrt(fan_in)).
        fan_in = c * ksz * ksz
        bound = 1.0 / (fan_in ** 0.5)
        wgt = jax.random.uniform(kw_key, (o, c, ksz, ksz), jnp.float32,
                                 minval=-bound, maxval=bound)
        bs = jax.random.uniform(kb_key, (o,), jnp.float32,
                                minval=-bound, maxval=bound)
        return wgt, bs

    w1, b1 = conv_init(k1w, k1b, out_ch, in_ch, 3)
    w2, b2 = conv_init(k2w, k2b, out_ch, out_ch, 3)
    w_s, b_s = conv_init(ksw, ksb, out_ch, in_ch, 1)   # in_ch != out_ch -> 1x1 skip

    x = jax.random.normal(kx, (N, in_ch, H, W), jnp.float32)
    mask = jnp.ones((N, 1, H, W), jnp.float32)         # unused in the active path

    y = residual_block_forward(x, mask, w1, b1, w2, b2, w_s, b_s)
    y = jax.block_until_ready(y)

    # f32 XLA reference for the same residual block.
    def ref_conv(xx, ww, bb, stride, padding):
        return jax.lax.conv_general_dilated(
            xx, ww, (stride, stride),
            ((padding, padding), (padding, padding)),
            dimension_numbers=("NCHW", "OIHW", "NCHW")) + bb[None, :, None, None]

    def leaky(v):
        return jnp.where(v >= 0, v, NEG_SLOPE * v)

    out_ref = leaky(ref_conv(x, w1, b1, 1, 1))
    out_ref = leaky(ref_conv(out_ref, w2, b2, 1, 1))
    y_ref = out_ref + ref_conv(x, w_s, b_s, 1, 0)

    assert y.shape == y_ref.shape == (N, out_ch, H, W)
    max_err = float(jnp.max(jnp.abs(y - y_ref)))
    # bf16 operands with f32 accumulation vs the pure-f32 reference.
    assert max_err < 5e-2, f"max abs error {max_err}"

    print("KERNEL_OK")
</pallas_src>

<mosaic_0001>
module attributes {stable_mosaic.version = 11 : i64} {
  func.func @_gemm_fused_kernel(%arg0: i32, %arg1: i32, %arg2: i32, %arg3: memref<512x36xbf16, #tpu.memory_space<vmem>>, %arg4: memref<36x8xbf16, #tpu.memory_space<vmem>>, %arg5: memref<1x8xf32, #tpu.memory_space<vmem>>, %arg6: memref<512x8xf32, #tpu.memory_space<vmem>>, %arg7: memref<512x8xf32, #tpu.memory_space<vmem>>) attributes {dimension_semantics = [#tpu.dimension_semantics<parallel>, #tpu.dimension_semantics<parallel>, #tpu.dimension_semantics<arbitrary>], iteration_bounds = array<i64: 1, 1, 1>, scalar_prefetch = 0 : i64, scratch_operands = 1 : i64, tpu.core_type = #tpu.core_type<tc>, window_params = [{transform_indices = @transform_0, window_bounds = array<i64: 512, 36>}, {transform_indices = @transform_1, window_bounds = array<i64: 36, 8>}, {transform_indices = @transform_2, window_bounds = array<i64: 1, 8>}, {transform_indices = @transform_3, window_bounds = array<i64: 512, 8>}]} {
    %c0_i32 = arith.constant 0 : i32
    %0 = arith.cmpi eq, %arg2, %c0_i32 : i32
    %1 = arith.extui %0 : i1 to i32
    %c0_i32_0 = arith.constant 0 : i32
    %2 = arith.cmpi ne, %1, %c0_i32_0 : i32
    scf.if %2 {
      %cst_10 = arith.constant 0.000000e+00 : f32
      %12 = vector.broadcast %cst_10 : f32 to vector<512x8xf32>
      %c0_11 = arith.constant 0 : index
      %c0_12 = arith.constant 0 : index
      %13 = vector.load %arg7[%c0_11, %c0_12] : memref<512x8xf32, #tpu.memory_space<vmem>>, vector<512x8xf32>
      tpu.vector_store %arg7[%c0_11, %c0_12], %12 {strides = array<i32>} : memref<512x8xf32, #tpu.memory_space<vmem>>, vector<512x8xf32>,
    } else {
    }
    %c0 = arith.constant 0 : index
    %c0_1 = arith.constant 0 : index
    %3 = vector.load %arg7[%c0, %c0_1] : memref<512x8xf32, #tpu.memory_space<vmem>>, vector<512x8xf32>
    %c0_2 = arith.constant 0 : index
    %c0_3 = arith.constant 0 : index
    %4 = vector.load %arg3[%c0_2, %c0_3] : memref<512x36xbf16, #tpu.memory_space<vmem>>, vector<512x36xbf16>
    %c0_4 = arith.constant 0 : index
    %c0_5 = arith.constant 0 : index
    %5 = vector.load %arg4[%c0_4, %c0_5] : memref<36x8xbf16, #tpu.memory_space<vmem>>, vector<36x8xbf16>
    %cst = arith.constant dense<0.000000e+00> : vector<512x8xf32>
    %6 = tpu.matmul %4, %5, %cst {dimension_numbers = #tpu.dot_dimension_numbers<[1], [0], [0], [1], [0, 0, 1, 1], [], []>} : vector<512x36xbf16>, vector<36x8xbf16>, vector<512x8xf32> -> vector<512x8xf32>
    %7 = arith.addf %3, %6 : vector<512x8xf32>
    %c0_6 = arith.constant 0 : index
    %c0_7 = arith.constant 0 : index
    %8 = vector.load %arg7[%c0_6, %c0_7] : memref<512x8xf32, #tpu.memory_space<vmem>>, vector<512x8xf32>
    tpu.vector_store %arg7[%c0_6, %c0_7], %7 {strides = array<i32>} : memref<512x8xf32, #tpu.memory_space<vmem>>, vector<512x8xf32>,
    %c0_i32_8 = arith.constant 0 : i32
    %9 = arith.cmpi eq, %arg2, %c0_i32_8 : i32
    %10 = arith.extui %9 : i1 to i32
    %c0_i32_9 = arith.constant 0 : i32
    %11 = arith.cmpi ne, %10, %c0_i32_9 : i32
    scf.if %11 {
      %c0_10 = arith.constant 0 : index
      %c0_11 = arith.constant 0 : index
      %12 = vector.load %arg7[%c0_10, %c0_11] : memref<512x8xf32, #tpu.memory_space<vmem>>, vector<512x8xf32>
      %c0_12 = arith.constant 0 : index
      %c0_13 = arith.constant 0 : index
      %13 = vector.load %arg5[%c0_12, %c0_13] : memref<1x8xf32, #tpu.memory_space<vmem>>, vector<1x8xf32>
      %14 = vector.broadcast %13 : vector<1x8xf32> to vector<512x8xf32>
      %15 = arith.addf %12, %14 : vector<512x8xf32>
      %cst_14 = arith.constant 0.000000e+00 : f32
      %16 = vector.broadcast %cst_14 : f32 to vector<512x8xf32>
      %17 = arith.cmpf oge, %15, %16 : vector<512x8xf32>
      %cst_15 = arith.constant 0.00999999977 : f32
      %18 = vector.broadcast %cst_15 : f32 to vector<512x8xf32>
      %19 = arith.mulf %18, %15 : vector<512x8xf32>
      %20 = arith.select %17, %15, %19 : vector<512x8xi1>, vector<512x8xf32>
      %c0_16 = arith.constant 0 : index
      %c0_17 = arith.constant 0 : index
      %21 = vector.load %arg6[%c0_16, %c0_17] : memref<512x8xf32, #tpu.memory_space<vmem>>, vector<512x8xf32>
      tpu.vector_store %arg6[%c0_16, %c0_17], %20 {strides = array<i32>} : memref<512x8xf32, #tpu.memory_space<vmem>>, vector<512x8xf32>,
    } else {
    }
    return
  }
  func.func @transform_0(%arg0: i32, %arg1: i32, %arg2: i32) -> (i32, i32) {
    %c0_i32 = arith.constant 0 : i32
    return %arg0, %arg2 : i32, i32
  }
  func.func @transform_1(%arg0: i32, %arg1: i32, %arg2: i32) -> (i32, i32) {
    %c0_i32 = arith.constant 0 : i32
    return %arg2, %arg1 : i32, i32
  }
  func.func @transform_2(%arg0: i32, %arg1: i32, %arg2: i32) -> (i32, i32) {
    %c0_i32 = arith.constant 0 : i32
    %c0_i32_0 = arith.constant 0 : i32
    return %c0_i32, %arg1 : i32, i32
  }
  func.func @transform_3(%arg0: i32, %arg1: i32, %arg2: i32) -> (i32, i32) {
    %c0_i32 = arith.constant 0 : i32
    return %arg0, %arg1 : i32, i32
  }
}

module attributes {stable_mosaic.version = 11 : i64} {
  func.func @_gemm_fused_kernel(%arg0: i32, %arg1: i32, %arg2: i32, %arg3: memref<512x4xbf16, #tpu.memory_space<vmem>>, %arg4: memref<4x8xbf16, #tpu.memory_space<vmem>>, %arg5: memref<1x8xf32, #tpu.memory_space<vmem>>, %arg6: memref<512x8xf32, #tpu.memory_space<vmem>>, %arg7: memref<512x8xf32, #tpu.memory_space<vmem>>) attributes {dimension_semantics = [#tpu.dimension_semantics<parallel>, #tpu.dimension_semantics<parallel>, #tpu.dimension_semantics<arbitrary>], iteration_bounds = array<i64: 1, 1, 1>, scalar_prefetch = 0 : i64, scratch_operands = 1 : i64, tpu.core_type = #tpu.core_type<tc>, window_params = [{transform_indices = @transform_0, window_bounds = array<i64: 512, 4>}, {transform_indices = @transform_1, window_bounds = array<i64: 4, 8>}, {transform_indices = @transform_2, window_bounds = array<i64: 1, 8>}, {transform_indices = @transform_3, window_bounds = array<i64: 512, 8>}]} {
    %c0_i32 = arith.constant 0 : i32
    %0 = arith.cmpi eq, %arg2, %c0_i32 : i32
    %1 = arith.extui %0 : i1 to i32
    %c0_i32_0 = arith.constant 0 : i32
    %2 = arith.cmpi ne, %1, %c0_i32_0 : i32
    scf.if %2 {
      %cst_10 = arith.constant 0.000000e+00 : f32
      %12 = vector.broadcast %cst_10 : f32 to vector<512x8xf32>
      %c0_11 = arith.constant 0 : index
      %c0_12 = arith.constant 0 : index
      %13 = vector.load %arg7[%c0_11, %c0_12] : memref<512x8xf32, #tpu.memory_space<vmem>>, vector<512x8xf32>
      tpu.vector_store %arg7[%c0_11, %c0_12], %12 {strides = array<i32>} : memref<512x8xf32, #tpu.memory_space<vmem>>, vector<512x8xf32>,
    } else {
    }
    %c0 = arith.constant 0 : index
    %c0_1 = arith.constant 0 : index
    %3 = vector.load %arg7[%c0, %c0_1] : memref<512x8xf32, #tpu.memory_space<vmem>>, vector<512x8xf32>
    %c0_2 = arith.constant 0 : index
    %c0_3 = arith.constant 0 : index
    %4 = vector.load %arg3[%c0_2, %c0_3] : memref<512x4xbf16, #tpu.memory_space<vmem>>, vector<512x4xbf16>
    %c0_4 = arith.constant 0 : index
    %c0_5 = arith.constant 0 : index
    %5 = vector.load %arg4[%c0_4, %c0_5] : memref<4x8xbf16, #tpu.memory_space<vmem>>, vector<4x8xbf16>
    %cst = arith.constant dense<0.000000e+00> : vector<512x8xf32>
    %6 = tpu.matmul %4, %5, %cst {dimension_numbers = #tpu.dot_dimension_numbers<[1], [0], [0], [1], [0, 0, 1, 1], [], []>} : vector<512x4xbf16>, vector<4x8xbf16>, vector<512x8xf32> -> vector<512x8xf32>
    %7 = arith.addf %3, %6 : vector<512x8xf32>
    %c0_6 = arith.constant 0 : index
    %c0_7 = arith.constant 0 : index
    %8 = vector.load %arg7[%c0_6, %c0_7] : memref<512x8xf32, #tpu.memory_space<vmem>>, vector<512x8xf32>
    tpu.vector_store %arg7[%c0_6, %c0_7], %7 {strides = array<i32>} : memref<512x8xf32, #tpu.memory_space<vmem>>, vector<512x8xf32>,
    %c0_i32_8 = arith.constant 0 : i32
    %9 = arith.cmpi eq, %arg2, %c0_i32_8 : i32
    %10 = arith.extui %9 : i1 to i32
    %c0_i32_9 = arith.constant 0 : i32
    %11 = arith.cmpi ne, %10, %c0_i32_9 : i32
    scf.if %11 {
      %c0_10 = arith.constant 0 : index
      %c0_11 = arith.constant 0 : index
      %12 = vector.load %arg7[%c0_10, %c0_11] : memref<512x8xf32, #tpu.memory_space<vmem>>, vector<512x8xf32>
      %c0_12 = arith.constant 0 : index
      %c0_13 = arith.constant 0 : index
      %13 = vector.load %arg5[%c0_12, %c0_13] : memref<1x8xf32, #tpu.memory_space<vmem>>, vector<1x8xf32>
      %14 = vector.broadcast %13 : vector<1x8xf32> to vector<512x8xf32>
      %15 = arith.addf %12, %14 : vector<512x8xf32>
      %c0_14 = arith.constant 0 : index
      %c0_15 = arith.constant 0 : index
      %16 = vector.load %arg6[%c0_14, %c0_15] : memref<512x8xf32, #tpu.memory_space<vmem>>, vector<512x8xf32>
      tpu.vector_store %arg6[%c0_14, %c0_15], %15 {strides = array<i32>} : memref<512x8xf32, #tpu.memory_space<vmem>>, vector<512x8xf32>,
    } else {
    }
    return
  }
  func.func @transform_0(%arg0: i32, %arg1: i32, %arg2: i32) -> (i32, i32) {
    %c0_i32 = arith.constant 0 : i32
    return %arg0, %arg2 : i32, i32
  }
  func.func @transform_1(%arg0: i32, %arg1: i32, %arg2: i32) -> (i32, i32) {
    %c0_i32 = arith.constant 0 : i32
    return %arg2, %arg1 : i32, i32
  }
  func.func @transform_2(%arg0: i32, %arg1: i32, %arg2: i32) -> (i32, i32) {
    %c0_i32 = arith.constant 0 : i32
    %c0_i32_0 = arith.constant 0 : i32
    return %c0_i32, %arg1 : i32, i32
  }
  func.func @transform_3(%arg0: i32, %arg1: i32, %arg2: i32) -> (i32, i32) {
    %c0_i32 = arith.constant 0 : i32
    return %arg0, %arg1 : i32, i32
  }
}

module attributes {stable_mosaic.version = 11 : i64} {
  func.func @_gemm_fused_kernel(%arg0: i32, %arg1: i32, %arg2: i32, %arg3: memref<512x72xbf16, #tpu.memory_space<vmem>>, %arg4: memref<72x8xbf16, #tpu.memory_space<vmem>>, %arg5: memref<1x8xf32, #tpu.memory_space<vmem>>, %arg6: memref<512x8xf32, #tpu.memory_space<vmem>>, %arg7: memref<512x8xf32, #tpu.memory_space<vmem>>, %arg8: memref<512x8xf32, #tpu.memory_space<vmem>>) attributes {dimension_semantics = [#tpu.dimension_semantics<parallel>, #tpu.dimension_semantics<parallel>, #tpu.dimension_semantics<arbitrary>], iteration_bounds = array<i64: 1, 1, 1>, scalar_prefetch = 0 : i64, scratch_operands = 1 : i64, tpu.core_type = #tpu.core_type<tc>, window_params = [{transform_indices = @transform_0, window_bounds = array<i64: 512, 72>}, {transform_indices = @transform_1, window_bounds = array<i64: 72, 8>}, {transform_indices = @transform_2, window_bounds = array<i64: 1, 8>}, {transform_indices = @transform_3, window_bounds = array<i64: 512, 8>}, {transform_indices = @transform_4, window_bounds = array<i64: 512, 8>}]} {
    %c0_i32 = arith.constant 0 : i32
    %0 = arith.cmpi eq, %arg2, %c0_i32 : i32
    %1 = arith.extui %0 : i1 to i32
    %c0_i32_0 = arith.constant 0 : i32
    %2 = arith.cmpi ne, %1, %c0_i32_0 : i32
    scf.if %2 {
      %cst_10 = arith.constant 0.000000e+00 : f32
      %12 = vector.broadcast %cst_10 : f32 to vector<512x8xf32>
      %c0_11 = arith.constant 0 : index
      %c0_12 = arith.constant 0 : index
      %13 = vector.load %arg8[%c0_11, %c0_12] : memref<512x8xf32, #tpu.memory_space<vmem>>, vector<512x8xf32>
      tpu.vector_store %arg8[%c0_11, %c0_12], %12 {strides = array<i32>} : memref<512x8xf32, #tpu.memory_space<vmem>>, vector<512x8xf32>,
    } else {
    }
    %c0 = arith.constant 0 : index
    %c0_1 = arith.constant 0 : index
    %3 = vector.load %arg8[%c0, %c0_1] : memref<512x8xf32, #tpu.memory_space<vmem>>, vector<512x8xf32>
    %c0_2 = arith.constant 0 : index
    %c0_3 = arith.constant 0 : index
    %4 = vector.load %arg3[%c0_2, %c0_3] : memref<512x72xbf16, #tpu.memory_space<vmem>>, vector<512x72xbf16>
    %c0_4 = arith.constant 0 : index
    %c0_5 = arith.constant 0 : index
    %5 = vector.load %arg4[%c0_4, %c0_5] : memref<72x8xbf16, #tpu.memory_space<vmem>>, vector<72x8xbf16>
    %cst = arith.constant dense<0.000000e+00> : vector<512x8xf32>
    %6 = tpu.matmul %4, %5, %cst {dimension_numbers = #tpu.dot_dimension_numbers<[1], [0], [0], [1], [0, 0, 1, 1], [], []>} : vector<512x72xbf16>, vector<72x8xbf16>, vector<512x8xf32> -> vector<512x8xf32>
    %7 = arith.addf %3, %6 : vector<512x8xf32>
    %c0_6 = arith.constant 0 : index
    %c0_7 = arith.constant 0 : index
    %8 = vector.load %arg8[%c0_6, %c0_7] : memref<512x8xf32, #tpu.memory_space<vmem>>, vector<512x8xf32>
    tpu.vector_store %arg8[%c0_6, %c0_7], %7 {strides = array<i32>} : memref<512x8xf32, #tpu.memory_space<vmem>>, vector<512x8xf32>,
    %c0_i32_8 = arith.constant 0 : i32
    %9 = arith.cmpi eq, %arg2, %c0_i32_8 : i32
    %10 = arith.extui %9 : i1 to i32
    %c0_i32_9 = arith.constant 0 : i32
    %11 = arith.cmpi ne, %10, %c0_i32_9 : i32
    scf.if %11 {
      %c0_10 = arith.constant 0 : index
      %c0_11 = arith.constant 0 : index
      %12 = vector.load %arg8[%c0_10, %c0_11] : memref<512x8xf32, #tpu.memory_space<vmem>>, vector<512x8xf32>
      %c0_12 = arith.constant 0 : index
      %c0_13 = arith.constant 0 : index
      %13 = vector.load %arg5[%c0_12, %c0_13] : memref<1x8xf32, #tpu.memory_space<vmem>>, vector<1x8xf32>
      %14 = vector.broadcast %13 : vector<1x8xf32> to vector<512x8xf32>
      %15 = arith.addf %12, %14 : vector<512x8xf32>
      %cst_14 = arith.constant 0.000000e+00 : f32
      %16 = vector.broadcast %cst_14 : f32 to vector<512x8xf32>
      %17 = arith.cmpf oge, %15, %16 : vector<512x8xf32>
      %cst_15 = arith.constant 0.00999999977 : f32
      %18 = vector.broadcast %cst_15 : f32 to vector<512x8xf32>
      %19 = arith.mulf %18, %15 : vector<512x8xf32>
      %20 = arith.select %17, %15, %19 : vector<512x8xi1>, vector<512x8xf32>
      %c0_16 = arith.constant 0 : index
      %c0_17 = arith.constant 0 : index
      %21 = vector.load %arg6[%c0_16, %c0_17] : memref<512x8xf32, #tpu.memory_space<vmem>>, vector<512x8xf32>
      %22 = arith.addf %20, %21 : vector<512x8xf32>
      %c0_18 = arith.constant 0 : index
      %c0_19 = arith.constant 0 : index
      %23 = vector.load %arg7[%c0_18, %c0_19] : memref<512x8xf32, #tpu.memory_space<vmem>>, vector<512x8xf32>
      tpu.vector_store %arg7[%c0_18, %c0_19], %22 {strides = array<i32>} : memref<512x8xf32, #tpu.memory_space<vmem>>, vector<512x8xf32>,
    } else {
    }
    return
  }
  func.func @transform_0(%arg0: i32, %arg1: i32, %arg2: i32) -> (i32, i32) {
    %c0_i32 = arith.constant 0 : i32
    return %arg0, %arg2 : i32, i32
  }
  func.func @transform_1(%arg0: i32, %arg1: i32, %arg2: i32) -> (i32, i32) {
    %c0_i32 = arith.constant 0 : i32
    return %arg2, %arg1 : i32, i32
  }
  func.func @transform_2(%arg0: i32, %arg1: i32, %arg2: i32) -> (i32, i32) {
    %c0_i32 = arith.constant 0 : i32
    %c0_i32_0 = arith.constant 0 : i32
    return %c0_i32, %arg1 : i32, i32
  }
  func.func @transform_3(%arg0: i32, %arg1: i32, %arg2: i32) -> (i32, i32) {
    %c0_i32 = arith.constant 0 : i32
    return %arg0, %arg1 : i32, i32
  }
  func.func @transform_4(%arg0: i32, %arg1: i32, %arg2: i32) -> (i32, i32) {
    %c0_i32 = arith.constant 0 : i32
    return %arg0, %arg1 : i32, i32
  }
}

</mosaic_0001>

<bundles_post_ra>
// kernel: residual_block_forward.3
= control target key start
LH: loop header
LB: loop body
LE: loop exit
PB: predicated region body
PF: predicated region fallthrough
CT: control target
= control target key end

     0   :  { %vm489_vm0 = vcmask 1041408   ;;  %vm392_vm1 = vcmask 293888   ;;  %vm19_vm2 = vcmask 64512   ;;  %v1400_v30 = vmov 0.0   ;;  %s2141_s1 = inlined_call_operand.vmem [shape: bf16[36,8], index: 1, kind: input, shape index: {}]   ;;  %s2142_s2 = inlined_call_operand.vmem [shape: f32[1,8], index: 2, kind: input, shape index: {}]   ;;  %s2143_s0 = inlined_call_operand.vmem [shape: bf16[512,36], index: 0, kind: input, shape index: {}]   ;;  %s2144_s3 = inlined_call_operand.vmem [shape: f32[512,8], index: 3, kind: output, shape index: {}]  }
   0x1   :  { %v216_v0 = vld [vmem:[%s2141_s1 + $0x10] sm:$0x3]  ;;  %v1387_v4 = vld [vmem:[%s2141_s1 + $0x8] sm:$0xff]  ;;  %v1386_v5 = vld [vmem:[%s2141_s1] sm:$0xff]  ;;  %20 = vst.msk [vmem:[#allocation2] sm:$0xff] %vm19_vm2, %v1400_v30 }
   0x2   :  { %v386_v1 = vunpack.c.l.b16 %v216_v0  ;;  %v1354_v6 = vld [vmem:[%s2143_s0] sm:$0xff]  ;;  %v1355_v10 = vld [vmem:[%s2143_s0 + $0x8] sm:$0xff]  ;;  %v1356_v14 = vld [vmem:[%s2143_s0 + $0x10] sm:$0xff]  ;;  %21 = vst.msk [vmem:[#allocation2 + $0x8] sm:$0xff] %vm19_vm2, %v1400_v30 }
   0x3   :  { %v1362_v7 = vld [vmem:[%s2143_s0 + $0x40] sm:$0xff]  ;;  %v1363_v11 = vld [vmem:[%s2143_s0 + $0x48] sm:$0xff]  ;;  %v1364_v15 = vld [vmem:[%s2143_s0 + $0x50] sm:$0xff]  ;;  %22 = vst.msk [vmem:[#allocation2 + $0x10] sm:$0xff] %vm19_vm2, %v1400_v30 }
   0x4   :  { %v389_v2 = vpack.c.b16 %v386_v1, %v386_v1  ;;  %v1370_v8 = vld [vmem:[%s2143_s0 + $0x80] sm:$0xff]  ;;  %v1371_v12 = vld [vmem:[%s2143_s0 + $0x88] sm:$0xff]  ;;  %v1372_v16 = vld [vmem:[%s2143_s0 + $0x90] sm:$0xff]  ;;  %23 = vst.msk [vmem:[#allocation2 + $0x18] sm:$0xff] %vm19_vm2, %v1400_v30 }
   0x5   :  { %v1378_v9 = vld [vmem:[%s2143_s0 + $0xc0] sm:$0xff]  ;;  %v1379_v13 = vld [vmem:[%s2143_s0 + $0xc8] sm:$0xff]  ;;  %v1380_v17 = vld [vmem:[%s2143_s0 + $0xd0] sm:$0xff]  ;;  %24 = vst.msk [vmem:[#allocation2 + $0x20] sm:$0xff] %vm19_vm2, %v1400_v30 }
   0x6   :  { %v491_v3 = vsel %vm489_vm0, %v389_v2, 0  ;;  %v1357_v18 = vld [vmem:[%s2143_s0 + $0x18] sm:$0xff]  ;;  %v1358_v22 = vld [vmem:[%s2143_s0 + $0x20] sm:$0xff]  ;;  %v1359_v26 = vld [vmem:[%s2143_s0 + $0x28] sm:$0xff]  ;;  %25 = vst.msk [vmem:[#allocation2 + $0x28] sm:$0xff] %vm19_vm2, %v1400_v30 }
   0x7   :  { %498 = vmatpush.bf16.msra.mxu0 %v491_v3  ;;  %1388 = vmatpush.bf16.msra.mxu1 %v491_v3  ;;  %v1365_v19 = vld [vmem:[%s2143_s0 + $0x58] sm:$0xff]  ;;  %v1366_v23 = vld [vmem:[%s2143_s0 + $0x60] sm:$0xff]  ;;  %v1367_v27 = vld [vmem:[%s2143_s0 + $0x68] sm:$0xff]  ;;  %26 = vst.msk [vmem:[#allocation2 + $0x30] sm:$0xff] %vm19_vm2, %v1400_v30 }
   0x8   :  { %1389 = vmatpush.bf16.msra.mxu2 %v491_v3  ;;  %1390 = vmatpush.bf16.msra.mxu3 %v491_v3  ;;  %v1373_v20 = vld [vmem:[%s2143_s0 + $0x98] sm:$0xff]  ;;  %v1374_v24 = vld [vmem:[%s2143_s0 + $0xa0] sm:$0xff]  ;;  %v1375_v28 = vld [vmem:[%s2143_s0 + $0xa8] sm:$0xff]  ;;  %27 = vst.msk [vmem:[#allocation2 + $0x38] sm:$0xff] %vm19_vm2, %v1400_v30 }
   0x9   :  { %v1381_v21 = vld [vmem:[%s2143_s0 + $0xd8] sm:$0xff]  ;;  %v1382_v25 = vld [vmem:[%s2143_s0 + $0xe0] sm:$0xff]  ;;  %v1383_v29 = vld [vmem:[%s2143_s0 + $0xe8] sm:$0xff]  ;;  %28 = vst.msk [vmem:[#allocation2 + $0x40] sm:$0xff] %vm19_vm2, %v1400_v30 }
   0xa   :  { %29 = vst.msk [vmem:[#allocation2 + $0x48] sm:$0xff] %vm19_vm2, %v1400_v30  ;;  %v1360_v31 = vld [vmem:[%s2143_s0 + $0x30] sm:$0xff]  ;;  %v1361_v35 = vld [vmem:[%s2143_s0 + $0x38] sm:$0xff]  ;;  %v84_v39 = vld [vmem:[#allocation2] sm:$0xff] }
   0xb   :  { %499 = vmatpush.bf16.msra.mxu0 %v1387_v4  ;;  %1391 = vmatpush.bf16.msra.mxu1 %v1387_v4  ;;  %v1368_v32 = vld [vmem:[%s2143_s0 + $0x70] sm:$0xff]  ;;  %30 = vst.msk [vmem:[#allocation2 + $0x50] sm:$0xff] %vm19_vm2, %v1400_v30  ;;  %v1369_v36 = vld [vmem:[%s2143_s0 + $0x78] sm:$0xff]  ;;  %v1660_v43 = vld [vmem:[%s2142_s2] ss:$0 sm:$0xff] }
   0xc   :  { %1392 = vmatpush.bf16.msra.mxu2 %v1387_v4  ;;  %1393 = vmatpush.bf16.msra.mxu3 %v1387_v4  ;;  %v1376_v33 = vld [vmem:[%s2143_s0 + $0xb0] sm:$0xff]  ;;  %31 = vst.msk [vmem:[#allocation2 + $0x58] sm:$0xff] %vm19_vm2, %v1400_v30  ;;  %v1377_v37 = vld [vmem:[%s2143_s0 + $0xb8] sm:$0xff]  ;;  %v85_v60 = vld [vmem:[#allocation2 + $0x8] sm:$0xff] }
   0xd   :  { %v1384_v34 = vld [vmem:[%s2143_s0 + $0xf0] sm:$0xff]  ;;  %32 = vst.msk [vmem:[#allocation2 + $0x60] sm:$0xff] %vm19_vm2, %v1400_v30  ;;  %v1385_v38 = vld [vmem:[%s2143_s0 + $0xf8] sm:$0xff] }
   0xe   :  { %33 = vst.msk [vmem:[#allocation2 + $0x68] sm:$0xff] %vm19_vm2, %v1400_v30  ;;  %v86_v4 = vld [vmem:[#allocation2 + $0x10] sm:$0xff] }
   0xf   :  { %500 = vmatpush.bf16.msra.mxu0 %v1386_v5  ;;  %1394 = vmatpush.bf16.msra.mxu1 %v1386_v5  ;;  %34 = vst.msk [vmem:[#allocation2 + $0x70] sm:$0xff] %vm19_vm2, %v1400_v30 }
  0x10   :  { %1395 = vmatpush.bf16.msra.mxu2 %v1386_v5  ;;  %1396 = vmatpush.bf16.msra.mxu3 %v1386_v5  ;;  %35 = vst.msk [vmem:[#allocation2 + $0x78] sm:$0xff] %vm19_vm2, %v1400_v30 }
  0x11   :  { %36 = vst.msk [vmem:[#allocation2 + $0x80] sm:$0xff] %vm19_vm2, %v1400_v30 }
  0x12   :  { %1322 = vmatmul.msk.bf16.vlgmr.msra.gmra.mxu0 %vm392_vm1, %v1354_v6  ;;  %1330 = vmatmul.msk.bf16.vlgmr.msra.gmra.mxu1 %vm392_vm1, %v1362_v7  ;;  %37 = vst.msk [vmem:[#allocation2 + $0x88] sm:$0xff] %vm19_vm2, %v1400_v30 }
  0x13   :  { %1338 = vmatmul.msk.bf16.vlgmr.msra.gmra.mxu2 %vm392_vm1, %v1370_v8  ;;  %1346 = vmatmul.msk.bf16.vlgmr.msra.gmra.mxu3 %vm392_vm1, %v1378_v9  ;;  %38 = vst.msk [vmem:[#allocation2 + $0x90] sm:$0xff] %vm19_vm2, %v1400_v30 }
  0x14   :  { %39 = vst.msk [vmem:[#allocation2 + $0x98] sm:$0xff] %vm19_vm2, %v1400_v30 }
  0x15   :  { %40 = vst.msk [vmem:[#allocation2 + $0xa0] sm:$0xff] %vm19_vm2, %v1400_v30 }
  0x16   :  { %41 = vst.msk [vmem:[#allocation2 + $0xa8] sm:$0xff] %vm19_vm2, %v1400_v30 }
  0x17   :  { %42 = vst.msk [vmem:[#allocation2 + $0xb0] sm:$0xff] %vm19_vm2, %v1400_v30 }
  0x18   :  { %43 = vst.msk [vmem:[#allocation2 + $0xb8] sm:$0xff] %vm19_vm2, %v1400_v30  ;;  %v100_v54 = vld [vmem:[#allocation2 + $0x80] sm:$0xff] }
  0x19   :  { %44 = vst.msk [vmem:[#allocation2 + $0xc0] sm:$0xff] %vm19_vm2, %v1400_v30  ;;  %v101_v62 = vld [vmem:[#allocation2 + $0x88] sm:$0xff] }
  0x1a   :  { %45 = vst.msk [vmem:[#allocation2 + $0xc8] sm:$0xff] %vm19_vm2, %v1400_v30  ;;  %v102_v8 = vld [vmem:[#allocation2 + $0x90] sm:$0xff] }
  0x1b   :  { %46 = vst.msk [vmem:[#allocation2 + $0xd0] sm:$0xff] %vm19_vm2, %v1400_v30 }
  0x1c   :  { %47 = vst.msk [vmem:[#allocation2 + $0xd8] sm:$0xff] %vm19_vm2, %v1400_v30 }
  0x1d   :  { %48 = vst.msk [vmem:[#allocation2 + $0xe0] sm:$0xff] %vm19_vm2, %v1400_v30 }
  0x1e   :  { %49 = vst.msk [vmem:[#allocation2 + $0xe8] sm:$0xff] %vm19_vm2, %v1400_v30 }
  0x1f   :  { %50 = vst.msk [vmem:[#allocation2 + $0xf0] sm:$0xff] %vm19_vm2, %v1400_v30 }
  0x20   :  { %51 = vst.msk [vmem:[#allocation2 + $0xf8] sm:$0xff] %vm19_vm2, %v1400_v30 }
  0x21   :  { %52 = vst.msk [vmem:[#allocation2 + $0x100] sm:$0xff] %vm19_vm2, %v1400_v30 }
  0x22   :  { %1323 = vmatmul.msk.bf16.gmra.mxu0 %vm392_vm1, %v1355_v10  ;;  %1331 = vmatmul.msk.bf16.gmra.mxu1 %vm392_vm1, %v1363_v11  ;;  %53 = vst.msk [vmem:[#allocation2 + $0x108] sm:$0xff] %vm19_vm2, %v1400_v30 }
  0x23   :  { %1339 = vmatmul.msk.bf16.gmra.mxu2 %vm392_vm1, %v1371_v12  ;;  %1347 = vmatmul.msk.bf16.gmra.mxu3 %vm392_vm1, %v1379_v13  ;;  %54 = vst.msk [vmem:[#allocation2 + $0x110] sm:$0xff] %vm19_vm2, %v1400_v30 }
  0x24   :  { %55 = vst.msk [vmem:[#allocation2 + $0x118] sm:$0xff] %vm19_vm2, %v1400_v30 }
  0x25   :  { %56 = vst.msk [vmem:[#allocation2 + $0x120] sm:$0xff] %vm19_vm2, %v1400_v30 }
  0x26   :  { %57 = vst.msk [vmem:[#allocation2 + $0x128] sm:$0xff] %vm19_vm2, %v1400_v30 }
  0x27   :  { %58 = vst.msk [vmem:[#allocation2 + $0x130] sm:$0xff] %vm19_vm2, %v1400_v30 }
  0x28   :  { %59 = vst.msk [vmem:[#allocation2 + $0x138] sm:$0xff] %vm19_vm2, %v1400_v30  ;;  %v116_v57 = vld [vmem:[#allocation2 + $0x100] sm:$0xff] }
  0x29   :  { %60 = vst.msk [vmem:[#allocation2 + $0x140] sm:$0xff] %vm19_vm2, %v1400_v30  ;;  %v117_v0 = vld [vmem:[#allocation2 + $0x108] sm:$0xff] }
  0x2a   :  { %61 = vst.msk [vmem:[#allocation2 + $0x148] sm:$0xff] %vm19_vm2, %v1400_v30  ;;  %v118_v12 = vld [vmem:[#allocation2 + $0x110] sm:$0xff] }
  0x2b   :  { %62 = vst.msk [vmem:[#allocation2 + $0x150] sm:$0xff] %vm19_vm2, %v1400_v30 }
  0x2c   :  { %63 = vst.msk [vmem:[#allocation2 + $0x158] sm:$0xff] %vm19_vm2, %v1400_v30 }
  0x2d   :  { %64 = vst.msk [vmem:[#allocation2 + $0x160] sm:$0xff] %vm19_vm2, %v1400_v30 }
  0x2e   :  { %65 = vst.msk [vmem:[#allocation2 + $0x168] sm:$0xff] %vm19_vm2, %v1400_v30 }
  0x2f   :  { %66 = vst.msk [vmem:[#allocation2 + $0x170] sm:$0xff] %vm19_vm2, %v1400_v30 }
  0x30   :  { %67 = vst.msk [vmem:[#allocation2 + $0x178] sm:$0xff] %vm19_vm2, %v1400_v30 }
  0x31   :  { %68 = vst.msk [vmem:[#allocation2 + $0x180] sm:$0xff] %vm19_vm2, %v1400_v30 }
  0x32   :  { %1324 = vmatmul.msk.bf16.gmra.mxu0 %vm392_vm1, %v1356_v14  ;;  %1332 = vmatmul.msk.bf16.gmra.mxu1 %vm392_vm1, %v1364_v15  ;;  %69 = vst.msk [vmem:[#allocation2 + $0x188] sm:$0xff] %vm19_vm2, %v1400_v30 }
  0x33   :  { %1340 = vmatmul.msk.bf16.gmra.mxu2 %vm392_vm1, %v1372_v16  ;;  %1348 = vmatmul.msk.bf16.gmra.mxu3 %vm392_vm1, %v1380_v17  ;;  %70 = vst.msk [vmem:[#allocation2 + $0x190] sm:$0xff] %vm19_vm2, %v1400_v30  ;;  %v87_v16 = vld [vmem:[#allocation2 + $0x18] sm:$0xff] }
  0x34   :  { %71 = vst.msk [vmem:[#allocation2 + $0x198] sm:$0xff] %vm19_vm2, %v1400_v30 }
  0x35   :  { %72 = vst.msk [vmem:[#allocation2 + $0x1a0] sm:$0xff] %vm19_vm2, %v1400_v30 }
  0x36   :  { %73 = vst.msk [vmem:[#allocation2 + $0x1a8] sm:$0xff] %vm19_vm2, %v1400_v30 }
  0x37   :  { %74 = vst.msk [vmem:[#allocation2 + $0x1b0] sm:$0xff] %vm19_vm2, %v1400_v30 }
  0x38   :  { %75 = vst.msk [vmem:[#allocation2 + $0x1b8] sm:$0xff] %vm19_vm2, %v1400_v30  ;;  %v132_v58 = vld [vmem:[#allocation2 + $0x180] sm:$0xff] }
  0x39   :  { %76 = vst.msk [vmem:[#allocation2 + $0x1c0] sm:$0xff] %vm19_vm2, %v1400_v30  ;;  %v133_v2 = vld [vmem:[#allocation2 + $0x188] sm:$0xff] }
  0x3a   :  { %77 = vst.msk [vmem:[#allocation2 + $0x1c8] sm:$0xff] %vm19_vm2, %v1400_v30  ;;  %v134_v14 = vld [vmem:[#allocation2 + $0x190] sm:$0xff] }
  0x3b   :  { %78 = vst.msk [vmem:[#allocation2 + $0x1d0] sm:$0xff] %vm19_vm2, %v1400_v30 }
  0x3c   :  { %79 = vst.msk [vmem:[#allocation2 + $0x1d8] sm:$0xff] %vm19_vm2, %v1400_v30 }
  0x3d   :  { %80 = vst.msk [vmem:[#allocation2 + $0x1e0] sm:$0xff] %vm19_vm2, %v1400_v30 }
  0x3e   :  { %81 = vst.msk [vmem:[#allocation2 + $0x1e8] sm:$0xff] %vm19_vm2, %v1400_v30 }
  0x3f   :  { %82 = vst.msk [vmem:[#allocation2 + $0x1f0] sm:$0xff] %vm19_vm2, %v1400_v30 }
  0x40   :  { %83 = vst.msk [vmem:[#allocation2 + $0x1f8] sm:$0xff] %vm19_vm2, %v1400_v30 }
  0x42   :  { %1325 = vmatmul.msk.bf16.gmra.mxu0 %vm392_vm1, %v1357_v18  ;;  %1333 = vmatmul.msk.bf16.gmra.mxu1 %vm392_vm1, %v1365_v19  ;;  %v103_v18 = vld [vmem:[#allocation2 + $0x98] sm:$0xff] }
  0x43   :  { %1341 = vmatmul.msk.bf16.gmra.mxu2 %vm392_vm1, %v1373_v20  ;;  %1349 = vmatmul.msk.bf16.gmra.mxu3 %vm392_vm1, %v1381_v21 }
  0x52   :  { %1326 = vmatmul.msk.bf16.gmra.mxu0 %vm392_vm1, %v1358_v22  ;;  %1334 = vmatmul.msk.bf16.gmra.mxu1 %vm392_vm1, %v1366_v23 }
  0x53   :  { %1342 = vmatmul.msk.bf16.gmra.mxu2 %vm392_vm1, %v1374_v24  ;;  %1350 = vmatmul.msk.bf16.gmra.mxu3 %vm392_vm1, %v1382_v25 }
  0x62   :  { %1327 = vmatmul.msk.bf16.gmra.mxu0 %vm392_vm1, %v1359_v26  ;;  %1335 = vmatmul.msk.bf16.gmra.mxu1 %vm392_vm1, %v1367_v27 }
  0x63   :  { %1343 = vmatmul.msk.bf16.gmra.mxu2 %vm392_vm1, %v1375_v28  ;;  %1351 = vmatmul.msk.bf16.gmra.mxu3 %vm392_vm1, %v1383_v29 }
  0x72   :  { %1328 = vmatmul.msk.bf16.gmra.mxu0 %vm392_vm1, %v1360_v31  ;;  %1336 = vmatmul.msk.bf16.gmra.mxu1 %vm392_vm1, %v1368_v32 }
  0x73   :  { %1344 = vmatmul.msk.bf16.gmra.mxu2 %vm392_vm1, %v1376_v33  ;;  %1352 = vmatmul.msk.bf16.gmra.mxu3 %vm392_vm1, %v1384_v34 }
  0x82   :  { %1329 = vmatmul.msk.bf16.gmra.mxu0 %vm392_vm1, %v1361_v35  ;;  %1337 = vmatmul.msk.bf16.gmra.mxu1 %vm392_vm1, %v1369_v36 }
  0x83   :  { %1345 = vmatmul.msk.bf16.gmra.mxu2 %vm392_vm1, %v1377_v37  ;;  %1353 = vmatmul.msk.bf16.gmra.mxu3 %vm392_vm1, %v1385_v38 }
  0x8f   :  { %v502_v40 = vpop.f32.mrf.mxu0  ;;  %v542_v41 = vpop.f32.mrf.mxu1 }
  0x90   :  { %v662_v42 = vadd.f32 %v502_v40, %v84_v39  ;;  %v678_v59 = vadd.f32 %v542_v41, %v100_v54 }
  0x92   :  { %727 = vst.msk [vmem:[#allocation2] sm:$0xff] %vm19_vm2, %v662_v42 }
  0x93   :  { %743 = vst.msk [vmem:[#allocation2 + $0x80] sm:$0xff] %vm19_vm2, %v678_v59 }
  0x96   :  { %v582_v44 = vpop.f32.mrf.mxu2  ;;  %v622_v45 = vpop.f32.mrf.mxu3 }
  0x97   :  { %v504_v46 = vpop.f32.mrf.mxu0  ;;  %v544_v47 = vpop.f32.mrf.mxu1  ;;  %v694_v61 = vadd.f32 %v582_v44, %v116_v57  ;;  %v710_v63 = vadd.f32 %v622_v45, %v132_v58 }
  0x98   :  { %v663_v1 = vadd.f32 %v504_v46, %v85_v60  ;;  %v679_v3 = vadd.f32 %v544_v47, %v101_v62 }
  0x99   :  { %v794_v48 = vld [vmem:[#allocation2] sm:$0xff]  ;;  %759 = vst.msk [vmem:[#allocation2 + $0x100] sm:$0xff] %vm19_vm2, %v694_v61 }
  0x9a   :  { %v862_v49 = vadd.f32 %v1660_v43, %v794_v48  ;;  %775 = vst.msk [vmem:[#allocation2 + $0x180] sm:$0xff] %vm19_vm2, %v710_v63  ;;  %v810_v20 = vld [vmem:[#allocation2 + $0x80] sm:$0xff] }
  0x9b   :  { %728 = vst.msk [vmem:[#allocation2 + $0x8] sm:$0xff] %vm19_vm2, %v663_v1  ;;  %v878_v22 = vadd.f32 %v1660_v43, %v810_v20 }
  0x9c   :  { %vm926_vm3 = vcmp.ge.f32.partialorder %v862_v49, 0.0  ;;  %v990_v50 = vmul.f32 0.01, %v862_v49  ;;  %744 = vst.msk [vmem:[#allocation2 + $0x88] sm:$0xff] %vm19_vm2, %v679_v3 }
  0x9d   :  { %vm942_vm4 = vcmp.ge.f32.partialorder %v878_v22, 0.0  ;;  %v1006_v31 = vmul.f32 0.01, %v878_v22 }
  0x9e   :  { %v1054_v51 = vsel %vm926_vm3, %v862_v49, %v990_v50  ;;  %v584_v52 = vpop.f32.mrf.mxu2  ;;  %v624_v53 = vpop.f32.mrf.mxu3 }
  0x9f   :  { %1118 = vst.msk [vmem:[%s2144_s3] sm:$0xff] %vm19_vm2, %v1054_v51  ;;  %v507_v55 = vpop.f32.mrf.mxu0  ;;  %v547_v56 = vpop.f32.mrf.mxu1  ;;  %v695_v7 = vadd.f32 %v584_v52, %v117_v0  ;;  %v711_v11 = vadd.f32 %v624_v53, %v133_v2  ;;  %v1070_v37 = vsel %vm942_vm4, %v878_v22, %v1006_v31  ;;  %v136_v31 = vld [vmem:[#allocation2 + $0x1a0] sm:$0xff] }
  0xa0   :  { %v664_v13 = vadd.f32 %v507_v55, %v86_v4  ;;  %v680_v15 = vadd.f32 %v547_v56, %v102_v8  ;;  %v826_v23 = vld [vmem:[#allocation2 + $0x100] sm:$0xff]  ;;  %1134 = vst.msk [vmem:[%s2144_s3 + $0x80] sm:$0xff] %vm19_vm2, %v1070_v37  ;;  %v105_v37 = vld [vmem:[#allocation2 + $0xa8] sm:$0xff] }
  0xa1   :  { %760 = vst.msk [vmem:[#allocation2 + $0x108] sm:$0xff] %vm19_vm2, %v695_v7  ;;  %v894_v27 = vadd.f32 %v1660_v43, %v826_v23  ;;  %v842_v28 = vld [vmem:[#allocation2 + $0x180] sm:$0xff] }
  0xa2   :  { %776 = vst.msk [vmem:[#allocation2 + $0x188] sm:$0xff] %vm19_vm2, %v711_v11  ;;  %v910_v32 = vadd.f32 %v1660_v43, %v842_v28  ;;  %v795_v33 = vld [vmem:[#allocation2 + $0x8] sm:$0xff] }
  0xa3   :  { %729 = vst.msk [vmem:[#allocation2 + $0x10] sm:$0xff] %vm19_vm2, %v664_v13  ;;  %vm958_vm5 = vcmp.ge.f32.partialorder %v894_v27, 0.0  ;;  %v1022_v34 = vmul.f32 0.01, %v894_v27  ;;  %v863_v35 = vadd.f32 %v1660_v43, %v795_v33  ;;  %v811_v36 = vld [vmem:[#allocation2 + $0x88] sm:$0xff] }
  0xa4   :  { %745 = vst.msk [vmem:[#allocation2 + $0x90] sm:$0xff] %vm19_vm2, %v680_v15  ;;  %vm974_vm6 = vcmp.ge.f32.partialorder %v910_v32, 0.0  ;;  %v1038_v38 = vmul.f32 0.01, %v910_v32  ;;  %v879_v39 = vadd.f32 %v1660_v43, %v811_v36 }
  0xa5   :  { %v1086_v41 = vsel %vm958_vm5, %v894_v27, %v1022_v34  ;;  %vm927_vm7 = vcmp.ge.f32.partialorder %v863_v35, 0.0  ;;  %v991_v42 = vmul.f32 0.01, %v863_v35 }
  0xa6   :  { %v587_v5 = vpop.f32.mrf.mxu2  ;;  %v627_v6 = vpop.f32.mrf.mxu3  ;;  %1150 = vst.msk [vmem:[%s2144_s3 + $0x100] sm:$0xff] %vm19_vm2, %v1086_v41  ;;  %v1102_v46 = vsel %vm974_vm6, %v910_v32, %v1038_v38  ;;  %vm943_vm8 = vcmp.ge.f32.partialorder %v879_v39, 0.0  ;;  %v1007_v47 = vmul.f32 0.01, %v879_v39  ;;  %v121_v38 = vld [vmem:[#allocation2 + $0x128] sm:$0xff] }
  0xa7   :  { %v509_v9 = vpop.f32.mrf.mxu0  ;;  %v549_v10 = vpop.f32.mrf.mxu1  ;;  %v696_v17 = vadd.f32 %v587_v5, %v118_v12  ;;  %v712_v19 = vadd.f32 %v627_v6, %v134_v14  ;;  %1166 = vst.msk [vmem:[%s2144_s3 + $0x180] sm:$0xff] %vm19_vm2, %v1102_v46  ;;  %v1055_v50 = vsel %vm927_vm7, %v863_v35, %v991_v42  ;;  %v135_v14 = vld [vmem:[#allocation2 + $0x198] sm:$0xff]  ;;  %v90_v42 = vld [vmem:[#allocation2 + $0x30] sm:$0xff] }
  0xa8   :  { %v665_v21 = vadd.f32 %v509_v9, %v87_v16  ;;  %v681_v24 = vadd.f32 %v549_v10, %v103_v18  ;;  %v827_v40 = vld [vmem:[#allocation2 + $0x108] sm:$0xff]  ;;  %1119 = vst.msk [vmem:[%s2144_s3 + $0x8] sm:$0xff] %vm19_vm2, %v1055_v50  ;;  %v1071_v54 = vsel %vm943_vm8, %v879_v39, %v1007_v47  ;;  %v119_v10 = vld [vmem:[#allocation2 + $0x118] sm:$0xff]  ;;  %v122_v46 = vld [vmem:[#allocation2 + $0x130] sm:$0xff] }
  0xa9   :  { %761 = vst.msk [vmem:[#allocation2 + $0x110] sm:$0xff] %vm19_vm2, %v696_v17  ;;  %v895_v44 = vadd.f32 %v1660_v43, %v827_v40  ;;  %v843_v45 = vld [vmem:[#allocation2 + $0x188] sm:$0xff]  ;;  %v88_v17 = vld [vmem:[#allocation2 + $0x20] sm:$0xff] }
  0xaa   :  { %777 = vst.msk [vmem:[#allocation2 + $0x190] sm:$0xff] %vm19_vm2, %v712_v19  ;;  %v911_v48 = vadd.f32 %v1660_v43, %v843_v45  ;;  %v796_v49 = vld [vmem:[#allocation2 + $0x10] sm:$0xff]  ;;  %v137_v40 = vld [vmem:[#allocation2 + $0x1a8] sm:$0xff] }
  0xab   :  { %730 = vst.msk [vmem:[#allocation2 + $0x18] sm:$0xff] %vm19_vm2, %v665_v21  ;;  %vm959_vm9 = vcmp.ge.f32.partialorder %v895_v44, 0.0  ;;  %v1023_v51 = vmul.f32 0.01, %v895_v44  ;;  %v864_v52 = vadd.f32 %v1660_v43, %v796_v49  ;;  %v812_v53 = vld [vmem:[#allocation2 + $0x90] sm:$0xff]  ;;  %v104_v21 = vld [vmem:[#allocation2 + $0xa0] sm:$0xff] }
  0xac   :  { %746 = vst.msk [vmem:[#allocation2 + $0x98] sm:$0xff] %vm19_vm2, %v681_v24  ;;  %vm975_vm10 = vcmp.ge.f32.partialorder %v911_v48, 0.0  ;;  %v1039_v55 = vmul.f32 0.01, %v911_v48  ;;  %v880_v56 = vadd.f32 %v1660_v43, %v812_v53  ;;  %v120_v24 = vld [vmem:[#allocation2 + $0x120] sm:$0xff] }
  0xad   :  { %1135 = vst.msk [vmem:[%s2144_s3 + $0x88] sm:$0xff] %vm19_vm2, %v1071_v54  ;;  %v1087_v60 = vsel %vm959_vm9, %v895_v44, %v1023_v51  ;;  %vm928_vm11 = vcmp.ge.f32.partialorder %v864_v52, 0.0  ;;  %v992_v61 = vmul.f32 0.01, %v864_v52  ;;  %v106_v44 = vld [vmem:[#allocation2 + $0xb0] sm:$0xff] }
  0xae   :  { %v1707_v25 = vpop.f32.mrf.mxu2  ;;  %v1709_v26 = vpop.f32.mrf.mxu3  ;;  %1151 = vst.msk [vmem:[%s2144_s3 + $0x108] sm:$0xff] %vm19_vm2, %v1087_v60  ;;  %v1103_v2 = vsel %vm975_vm10, %v911_v48, %v1039_v55  ;;  %vm944_vm12 = vcmp.ge.f32.partialorder %v880_v56, 0.0  ;;  %v1008_v3 = vmul.f32 0.01, %v880_v56 }
  0xaf   :  { %v1713_v29 = vpop.f32.mrf.mxu0  ;;  %v1715_v30 = vpop.f32.mrf.mxu1  ;;  %1167 = vst.msk [vmem:[%s2144_s3 + $0x188] sm:$0xff] %vm19_vm2, %v1103_v2  ;;  %v1056_v6 = vsel %vm928_vm11, %v864_v52, %v992_v61  ;;  %v697_v20 = vadd.f32 %v1707_v25, %v119_v10  ;;  %v713_v23 = vadd.f32 %v1709_v26, %v135_v14  ;;  %v89_v26 = vld [vmem:[#allocation2 + $0x28] sm:$0xff] }
  0xb0   :  { %v828_v57 = vld [vmem:[#allocation2 + $0x110] sm:$0xff]  ;;  %1120 = vst.msk [vmem:[%s2144_s3 + $0x10] sm:$0xff] %vm19_vm2, %v1056_v6  ;;  %v1072_v11 = vsel %vm944_vm12, %v880_v56, %v1008_v3  ;;  %v666_v28 = vadd.f32 %v1713_v29, %v88_v17  ;;  %v682_v33 = vadd.f32 %v1715_v30, %v104_v21 }
  0xb1   :  { %v896_v62 = vadd.f32 %v1660_v43, %v828_v57  ;;  %v844_v63 = vld [vmem:[#allocation2 + $0x190] sm:$0xff]  ;;  %1136 = vst.msk [vmem:[%s2144_s3 + $0x90] sm:$0xff] %vm19_vm2, %v1072_v11 }
  0xb2   :  { %v912_v4 = vadd.f32 %v1660_v43, %v844_v63  ;;  %v797_v5 = vld [vmem:[#allocation2 + $0x18] sm:$0xff]  ;;  %762 = vst.msk [vmem:[#allocation2 + $0x118] sm:$0xff] %vm19_vm2, %v697_v20 }
  0xb3   :  { %vm960_vm13 = vcmp.ge.f32.partialorder %v896_v62, 0.0  ;;  %v1024_v7 = vmul.f32 0.01, %v896_v62  ;;  %v865_v8 = vadd.f32 %v1660_v43, %v797_v5  ;;  %v813_v9 = vld [vmem:[#allocation2 + $0x98] sm:$0xff]  ;;  %778 = vst.msk [vmem:[#allocation2 + $0x198] sm:$0xff] %vm19_vm2, %v713_v23 }
  0xb4   :  { %vm976_vm14 = vcmp.ge.f32.partialorder %v912_v4, 0.0  ;;  %v1040_v12 = vmul.f32 0.01, %v912_v4  ;;  %v881_v13 = vadd.f32 %v1660_v43, %v813_v9  ;;  %731 = vst.msk [vmem:[#allocation2 + $0x20] sm:$0xff] %vm19_vm2, %v666_v28 }
  0xb5   :  { %v1088_v15 = vsel %vm960_vm13, %v896_v62, %v1024_v7  ;;  %vm929_vm15 = vcmp.ge.f32.partialorder %v865_v8, 0.0  ;;  %v993_v16 = vmul.f32 0.01, %v865_v8  ;;  %747 = vst.msk [vmem:[#allocation2 + $0xa0] sm:$0xff] %vm19_vm2, %v682_v33 }
  0xb6   :  { %v592_v58 = vpop.f32.mrf.mxu2  ;;  %v632_v59 = vpop.f32.mrf.mxu3  ;;  %1152 = vst.msk [vmem:[%s2144_s3 + $0x110] sm:$0xff] %vm19_vm2, %v1088_v15  ;;  %v1104_v18 = vsel %vm976_vm14, %v912_v4, %v1040_v12  ;;  %vm945_vm0 = vcmp.ge.f32.partialorder %v881_v13, 0.0  ;;  %v1009_v19 = vmul.f32 0.01, %v881_v13 }
  0xb7   :  { %v514_v0 = vpop.f32.mrf.mxu0  ;;  %v554_v1 = vpop.f32.mrf.mxu1  ;;  %1168 = vst.msk [vmem:[%s2144_s3 + $0x190] sm:$0xff] %vm19_vm2, %v1104_v18  ;;  %v1057_v22 = vsel %vm929_vm15, %v865_v8, %v993_v16  ;;  %v698_v36 = vadd.f32 %v592_v58, %v120_v24  ;;  %v714_v29 = vadd.f32 %v632_v59, %v136_v31 }
  0xb8   :  { %1121 = vst.msk [vmem:[%s2144_s3 + $0x18] sm:$0xff] %vm19_vm2, %v1057_v22  ;;  %v1073_v27 = vsel %vm945_vm0, %v881_v13, %v1009_v19  ;;  %v667_v39 = vadd.f32 %v514_v0, %v89_v26  ;;  %v683_v41 = vadd.f32 %v554_v1, %v105_v37 }
  0xb9   :  { %1137 = vst.msk [vmem:[%s2144_s3 + $0x98] sm:$0xff] %vm19_vm2, %v1073_v27  ;;  %v829_v50 = vld [vmem:[#allocation2 + $0x118] sm:$0xff] }
  0xba   :  { %763 = vst.msk [vmem:[#allocation2 + $0x120] sm:$0xff] %vm19_vm2, %v698_v36  ;;  %v897_v54 = vadd.f32 %v1660_v43, %v829_v50  ;;  %v845_v55 = vld [vmem:[#allocation2 + $0x198] sm:$0xff] }
  0xbb   :  { %779 = vst.msk [vmem:[#allocation2 + $0x1a0] sm:$0xff] %vm19_vm2, %v714_v29  ;;  %v913_v57 = vadd.f32 %v1660_v43, %v845_v55  ;;  %v798_v58 = vld [vmem:[#allocation2 + $0x20] sm:$0xff]  ;;  %v123_v50 = vld [vmem:[#allocation2 + $0x138] sm:$0xff] }
  0xbc   :  { %732 = vst.msk [vmem:[#allocation2 + $0x28] sm:$0xff] %vm19_vm2, %v667_v39  ;;  %vm961_vm1 = vcmp.ge.f32.partialorder %v897_v54, 0.0  ;;  %v1025_v59 = vmul.f32 0.01, %v897_v54  ;;  %v866_v60 = vadd.f32 %v1660_v43, %v798_v58  ;;  %v814_v61 = vld [vmem:[#allocation2 + $0xa0] sm:$0xff] }
  0xbd   :  { %748 = vst.msk [vmem:[#allocation2 + $0xa8] sm:$0xff] %vm19_vm2, %v683_v41  ;;  %vm977_vm3 = vcmp.ge.f32.partialorder %v913_v57, 0.0  ;;  %v1041_v62 = vmul.f32 0.01, %v913_v57  ;;  %v882_v63 = vadd.f32 %v1660_v43, %v814_v61  ;;  %v92_v61 = vld [vmem:[#allocation2 + $0x40] sm:$0xff] }
  0xbe   :  { %v594_v25 = vpop.f32.mrf.mxu2  ;;  %v634_v32 = vpop.f32.mrf.mxu3  ;;  %v1089_v1 = vsel %vm961_vm1, %v897_v54, %v1025_v59  ;;  %vm930_vm4 = vcmp.ge.f32.partialorder %v866_v60, 0.0  ;;  %v994_v2 = vmul.f32 0.01, %v866_v60 }
  0xbf   :  { %v517_v34 = vpop.f32.mrf.mxu0  ;;  %v557_v35 = vpop.f32.mrf.mxu1  ;;  %v699_v30 = vadd.f32 %v594_v25, %v121_v38  ;;  %v715_v45 = vadd.f32 %v634_v32, %v137_v40  ;;  %1153 = vst.msk [vmem:[%s2144_s3 + $0x118] sm:$0xff] %vm19_vm2, %v1089_v1  ;;  %v1105_v5 = vsel %vm977_vm3, %v913_v57, %v1041_v62  ;;  %vm946_vm5 = vcmp.ge.f32.partialorder %v882_v63, 0.0  ;;  %v138_v38 = vld [vmem:[#allocation2 + $0x1b0] sm:$0xff]  ;;  %v139_v57 = vld [vmem:[#allocation2 + $0x1b8] sm:$0xff] }
  0xc0   :  { %v668_v47 = vadd.f32 %v517_v34, %v90_v42  ;;  %v684_v51 = vadd.f32 %v557_v35, %v106_v44  ;;  %v1010_v6 = vmul.f32 0.01, %v882_v63  ;;  %1169 = vst.msk [vmem:[%s2144_s3 + $0x198] sm:$0xff] %vm19_vm2, %v1105_v5  ;;  %v1058_v9 = vsel %vm930_vm4, %v866_v60, %v994_v2  ;;  %v91_v42 = vld [vmem:[#allocation2 + $0x38] sm:$0xff]  ;;  %v140_v2 = vld [vmem:[#allocation2 + $0x1c0] sm:$0xff]  ;;  %v109_v5 = vld [vmem:[#allocation2 + $0xc8] sm:$0xff] }
  0xc1   :  { %764 = vst.msk [vmem:[#allocation2 + $0x128] sm:$0xff] %vm19_vm2, %v699_v30  ;;  %v830_v0 = vld [vmem:[#allocation2 + $0x120] sm:$0xff] }
  0xc2   :  { %780 = vst.msk [vmem:[#allocation2 + $0x1a8] sm:$0xff] %vm19_vm2, %v715_v45  ;;  %v898_v3 = vadd.f32 %v1660_v43, %v830_v0  ;;  %v846_v4 = vld [vmem:[#allocation2 + $0x1a0] sm:$0xff]  ;;  %v1074_v15 = vsel %vm946_vm5, %v882_v63, %v1010_v6  ;;  %v107_v45 = vld [vmem:[#allocation2 + $0xb8] sm:$0xff] }
  0xc3   :  { %733 = vst.msk [vmem:[#allocation2 + $0x30] sm:$0xff] %vm19_vm2, %v668_v47  ;;  %v914_v7 = vadd.f32 %v1660_v43, %v846_v4  ;;  %v799_v8 = vld [vmem:[#allocation2 + $0x28] sm:$0xff]  ;;  %v124_v0 = vld [vmem:[#allocation2 + $0x140] sm:$0xff] }
  0xc4   :  { %749 = vst.msk [vmem:[#allocation2 + $0xb0] sm:$0xff] %vm19_vm2, %v684_v51  ;;  %vm962_vm6 = vcmp.ge.f32.partialorder %v898_v3, 0.0  ;;  %v1026_v10 = vmul.f32 0.01, %v898_v3  ;;  %v867_v11 = vadd.f32 %v1660_v43, %v799_v8  ;;  %v815_v12 = vld [vmem:[#allocation2 + $0xa8] sm:$0xff] }
  0xc5   :  { %1122 = vst.msk [vmem:[%s2144_s3 + $0x20] sm:$0xff] %vm19_vm2, %v1058_v9  ;;  %vm978_vm7 = vcmp.ge.f32.partialorder %v914_v7, 0.0  ;;  %v1042_v16 = vmul.f32 0.01, %v914_v7  ;;  %v883_v17 = vadd.f32 %v1660_v43, %v815_v12 }
  0xc6   :  { %v597_v48 = vpop.f32.mrf.mxu2  ;;  %v1794_v49 = vpop.f32.mrf.mxu3  ;;  %1138 = vst.msk [vmem:[%s2144_s3 + $0xa0] sm:$0xff] %vm19_vm2, %v1074_v15  ;;  %v1090_v21 = vsel %vm962_vm6, %v898_v3, %v1026_v10  ;;  %vm931_vm8 = vcmp.ge.f32.partialorder %v867_v11, 0.0  ;;  %v995_v22 = vmul.f32 0.01, %v867_v11  ;;  %v93_v3 = vld [vmem:[#allocation2 + $0x48] sm:$0xff] }
  0xc7   :  { %v1797_v52 = vpop.f32.mrf.mxu0  ;;  %v1799_v53 = vpop.f32.mrf.mxu1  ;;  %v700_v56 = vadd.f32 %v597_v48, %v122_v46  ;;  %1154 = vst.msk [vmem:[%s2144_s3 + $0x120] sm:$0xff] %vm19_vm2, %v1090_v21  ;;  %v1106_v27 = vsel %vm978_vm7, %v914_v7, %v1042_v16  ;;  %vm947_vm9 = vcmp.ge.f32.partialorder %v883_v17, 0.0  ;;  %v1011_v28 = vmul.f32 0.01, %v883_v17  ;;  %v125_v7 = vld [vmem:[#allocation2 + $0x148] sm:$0xff] }
  0xc8   :  { %v831_v18 = vld [vmem:[#allocation2 + $0x128] sm:$0xff]  ;;  %1170 = vst.msk [vmem:[%s2144_s3 + $0x1a0] sm:$0xff] %vm19_vm2, %v1106_v27  ;;  %v1059_v32 = vsel %vm931_vm8, %v867_v11, %v995_v22  ;;  %v716_v48 = vadd.f32 %v1794_v49, %v138_v38  ;;  %v685_v60 = vadd.f32 %v1799_v53, %v107_v45 }
  0xc9   :  { %765 = vst.msk [vmem:[#allocation2 + $0x130] sm:$0xff] %vm19_vm2, %v700_v56  ;;  %v899_v23 = vadd.f32 %v1660_v43, %v831_v18  ;;  %v847_v24 = vld [vmem:[#allocation2 + $0x1a8] sm:$0xff]  ;;  %v1075_v35 = vsel %vm947_vm9, %v883_v17, %v1011_v28  ;;  %v669_v56 = vadd.f32 %v1797_v52, %v91_v42  ;;  %v108_v52 = vld [vmem:[#allocation2 + $0xc0] sm:$0xff] }
  0xca   :  { %v915_v31 = vadd.f32 %v1660_v43, %v847_v24  ;;  %v800_v25 = vld [vmem:[#allocation2 + $0x30] sm:$0xff]  ;;  %1123 = vst.msk [vmem:[%s2144_s3 + $0x28] sm:$0xff] %vm19_vm2, %v1059_v32  ;;  %v141_v11 = vld [vmem:[#allocation2 + $0x1c8] sm:$0xff] }
  0xcb   :  { %vm963_vm10 = vcmp.ge.f32.partialorder %v899_v23, 0.0  ;;  %v1027_v33 = vmul.f32 0.01, %v899_v23  ;;  %v868_v26 = vadd.f32 %v1660_v43, %v800_v25  ;;  %v816_v34 = vld [vmem:[#allocation2 + $0xb0] sm:$0xff]  ;;  %1139 = vst.msk [vmem:[%s2144_s3 + $0xa8] sm:$0xff] %vm19_vm2, %v1075_v35 }
  0xcc   :  { %vm979_vm11 = vcmp.ge.f32.partialorder %v915_v31, 0.0  ;;  %v1043_v36 = vmul.f32 0.01, %v915_v31  ;;  %v884_v37 = vadd.f32 %v1660_v43, %v816_v34  ;;  %781 = vst.msk [vmem:[#allocation2 + $0x1b0] sm:$0xff] %vm19_vm2, %v716_v48 }
  0xcd   :  { %v1091_v39 = vsel %vm963_vm10, %v899_v23, %v1027_v33  ;;  %vm932_vm12 = vcmp.ge.f32.partialorder %v868_v26, 0.0  ;;  %v996_v40 = vmul.f32 0.01, %v868_v26  ;;  %734 = vst.msk [vmem:[#allocation2 + $0x38] sm:$0xff] %vm19_vm2, %v669_v56 }
  0xce   :  { %v1821_v13 = vpop.f32.mrf.mxu2  ;;  %v1823_v14 = vpop.f32.mrf.mxu3  ;;  %1155 = vst.msk [vmem:[%s2144_s3 + $0x128] sm:$0xff] %vm19_vm2, %v1091_v39  ;;  %v1107_v30 = vsel %vm979_vm11, %v915_v31, %v1043_v36  ;;  %vm948_vm13 = vcmp.ge.f32.partialorder %v884_v37, 0.0  ;;  %v1012_v44 = vmul.f32 0.01, %v884_v37 }
  0xcf   :  { %v1830_v19 = vpop.f32.mrf.mxu0  ;;  %v1832_v20 = vpop.f32.mrf.mxu1  ;;  %1171 = vst.msk [vmem:[%s2144_s3 + $0x1a8] sm:$0xff] %vm19_vm2, %v1107_v30  ;;  %v1060_v46 = vsel %vm932_vm12, %v868_v26, %v996_v40  ;;  %v701_v62 = vadd.f32 %v1821_v13, %v123_v50  ;;  %v717_v63 = vadd.f32 %v1823_v14, %v139_v57 }
  0xd0   :  { %v832_v29 = vld [vmem:[#allocation2 + $0x130] sm:$0xff]  ;;  %1124 = vst.msk [vmem:[%s2144_s3 + $0x30] sm:$0xff] %vm19_vm2, %v1060_v46  ;;  %v1076_v55 = vsel %vm948_vm13, %v884_v37, %v1012_v44  ;;  %v670_v1 = vadd.f32 %v1830_v19, %v92_v61  ;;  %v686_v53 = vadd.f32 %v1832_v20, %v108_v52 }
  0xd1   :  { %v900_v41 = vadd.f32 %v1660_v43, %v832_v29  ;;  %1140 = vst.msk [vmem:[%s2144_s3 + $0xb0] sm:$0xff] %vm19_vm2, %v1076_v55 }
  0xd2   :  { %750 = vst.msk [vmem:[#allocation2 + $0xb8] sm:$0xff] %vm19_vm2, %v685_v60 }
  0xd3   :  { %vm964_vm14 = vcmp.ge.f32.partialorder %v900_v41, 0.0  ;;  %v1028_v47 = vmul.f32 0.01, %v900_v41  ;;  %766 = vst.msk [vmem:[#allocation2 + $0x138] sm:$0xff] %vm19_vm2, %v701_v62  ;;  %v848_v15 = vld [vmem:[#allocation2 + $0x1b0] sm:$0xff] }
  0xd4   :  { %782 = vst.msk [vmem:[#allocation2 + $0x1b8] sm:$0xff] %vm19_vm2, %v717_v63  ;;  %v916_v17 = vadd.f32 %v1660_v43, %v848_v15  ;;  %v801_v18 = vld [vmem:[#allocation2 + $0x38] sm:$0xff] }
  0xd5   :  { %v1092_v49 = vsel %vm964_vm14, %v900_v41, %v1028_v47  ;;  %735 = vst.msk [vmem:[#allocation2 + $0x40] sm:$0xff] %vm19_vm2, %v670_v1  ;;  %v869_v20 = vadd.f32 %v1660_v43, %v801_v18 }
  0xd6   :  { %v602_v51 = vpop.f32.mrf.mxu2  ;;  %v642_v54 = vpop.f32.mrf.mxu3  ;;  %1156 = vst.msk [vmem:[%s2144_s3 + $0x130] sm:$0xff] %vm19_vm2, %v1092_v49  ;;  %vm980_vm15 = vcmp.ge.f32.partialorder %v916_v17, 0.0  ;;  %v1044_v22 = vmul.f32 0.01, %v916_v17 }
  0xd7   :  { %v524_v58 = vpop.f32.mrf.mxu0  ;;  %v564_v59 = vpop.f32.mrf.mxu1  ;;  %v702_v4 = vadd.f32 %v602_v51, %v124_v0  ;;  %v718_v6 = vadd.f32 %v642_v54, %v140_v2  ;;  %751 = vst.msk [vmem:[#allocation2 + $0xc0] sm:$0xff] %vm19_vm2, %v686_v53  ;;  %vm933_vm0 = vcmp.ge.f32.partialorder %v869_v20, 0.0  ;;  %v997_v27 = vmul.f32 0.01, %v869_v20  ;;  %v94_v2 = vld [vmem:[#allocation2 + $0x50] sm:$0xff] }
  0xd8   :  { %v671_v10 = vadd.f32 %v524_v58, %v93_v3  ;;  %v687_v14 = vadd.f32 %v564_v59, %v109_v5  ;;  %v1108_v25 = vsel %vm980_vm15, %v916_v17, %v1044_v22  ;;  %v110_v5 = vld [vmem:[#allocation2 + $0xd0] sm:$0xff] }
  0xd9   :  { %767 = vst.msk [vmem:[#allocation2 + $0x140] sm:$0xff] %vm19_vm2, %v702_v4  ;;  %v817_v21 = vld [vmem:[#allocation2 + $0xb8] sm:$0xff]  ;;  %v1061_v36 = vsel %vm933_vm0, %v869_v20, %v997_v27  ;;  %v142_v17 = vld [vmem:[#allocation2 + $0x1d0] sm:$0xff] }
  0xda   :  { %783 = vst.msk [vmem:[#allocation2 + $0x1c0] sm:$0xff] %vm19_vm2, %v718_v6  ;;  %v885_v23 = vadd.f32 %v1660_v43, %v817_v21  ;;  %v833_v24 = vld [vmem:[#allocation2 + $0x138] sm:$0xff] }
  0xdb   :  { %736 = vst.msk [vmem:[#allocation2 + $0x48] sm:$0xff] %vm19_vm2, %v671_v10  ;;  %v901_v28 = vadd.f32 %v1660_v43, %v833_v24  ;;  %v849_v31 = vld [vmem:[#allocation2 + $0x1b8] sm:$0xff]  ;;  %v126_v10 = vld [vmem:[#allocation2 + $0x150] sm:$0xff] }
  0xdc   :  { %752 = vst.msk [vmem:[#allocation2 + $0xc8] sm:$0xff] %vm19_vm2, %v687_v14  ;;  %vm949_vm1 = vcmp.ge.f32.partialorder %v885_v23, 0.0  ;;  %v1013_v32 = vmul.f32 0.01, %v885_v23  ;;  %v917_v33 = vadd.f32 %v1660_v43, %v849_v31  ;;  %v802_v26 = vld [vmem:[#allocation2 + $0x40] sm:$0xff]  ;;  %v95_v20 = vld [vmem:[#allocation2 + $0x58] sm:$0xff] }
  0xdd   :  { %1172 = vst.msk [vmem:[%s2144_s3 + $0x1b0] sm:$0xff] %vm19_vm2, %v1108_v25  ;;  %vm965_vm3 = vcmp.ge.f32.partialorder %v901_v28, 0.0  ;;  %v1029_v37 = vmul.f32 0.01, %v901_v28  ;;  %v870_v29 = vadd.f32 %v1660_v43, %v802_v26  ;;  %v127_v27 = vld [vmem:[#allocation2 + $0x158] sm:$0xff]  ;;  %v96_v25 = vld [vmem:[#allocation2 + $0x60] sm:$0xff] }
  0xde   :  { %v604_v8 = vpop.f32.mrf.mxu2  ;;  %v644_v9 = vpop.f32.mrf.mxu3  ;;  %v818_v38 = vld [vmem:[#allocation2 + $0xc0] sm:$0xff]  ;;  %1125 = vst.msk [vmem:[%s2144_s3 + $0x38] sm:$0xff] %vm19_vm2, %v1061_v36  ;;  %v1077_v41 = vsel %vm949_vm1, %v885_v23, %v1013_v32  ;;  %vm981_vm4 = vcmp.ge.f32.partialorder %v917_v33, 0.0  ;;  %v1045_v42 = vmul.f32 0.01, %v917_v33 }
  0xdf   :  { %v1892_v12 = vpop.f32.mrf.mxu0  ;;  %v1894_v13 = vpop.f32.mrf.mxu1  ;;  %v703_v16 = vadd.f32 %v604_v8, %v125_v7  ;;  %v719_v19 = vadd.f32 %v644_v9, %v141_v11  ;;  %v886_v30 = vadd.f32 %v1660_v43, %v818_v38  ;;  %1141 = vst.msk [vmem:[%s2144_s3 + $0xb8] sm:$0xff] %vm19_vm2, %v1077_v41  ;;  %v1093_v45 = vsel %vm965_vm3, %v901_v28, %v1029_v37  ;;  %v143_v28 = vld [vmem:[#allocation2 + $0x1d8] sm:$0xff]  ;;  %v128_v36 = vld [vmem:[#allocation2 + $0x160] sm:$0xff] }
  0xe0   :  { %v834_v44 = vld [vmem:[#allocation2 + $0x140] sm:$0xff]  ;;  %vm934_vm5 = vcmp.ge.f32.partialorder %v870_v29, 0.0  ;;  %v998_v46 = vmul.f32 0.01, %v870_v29  ;;  %1157 = vst.msk [vmem:[%s2144_s3 + $0x138] sm:$0xff] %vm19_vm2, %v1093_v45  ;;  %v1109_v50 = vsel %vm981_vm4, %v917_v33, %v1045_v42 }
  0xe1   :  { %768 = vst.msk [vmem:[#allocation2 + $0x148] sm:$0xff] %vm19_vm2, %v703_v16  ;;  %v902_v47 = vadd.f32 %v1660_v43, %v834_v44  ;;  %v850_v48 = vld [vmem:[#allocation2 + $0x1c0] sm:$0xff]  ;;  %vm950_vm6 = vcmp.ge.f32.partialorder %v886_v30, 0.0  ;;  %v1014_v51 = vmul.f32 0.01, %v886_v30  ;;  %v672_v16 = vadd.f32 %v1892_v12, %v94_v2  ;;  %v111_v12 = vld [vmem:[#allocation2 + $0xd8] sm:$0xff] }
  0xe2   :  { %784 = vst.msk [vmem:[#allocation2 + $0x1c8] sm:$0xff] %vm19_vm2, %v719_v19  ;;  %v918_v54 = vadd.f32 %v1660_v43, %v850_v48  ;;  %v803_v55 = vld [vmem:[#allocation2 + $0x48] sm:$0xff]  ;;  %v1062_v56 = vsel %vm934_vm5, %v870_v29, %v998_v46  ;;  %v688_v19 = vadd.f32 %v1894_v13, %v110_v5  ;;  %v112_v33 = vld [vmem:[#allocation2 + $0xe0] sm:$0xff] }
  0xe3   :  { %1173 = vst.msk [vmem:[%s2144_s3 + $0x1b8] sm:$0xff] %vm19_vm2, %v1109_v50  ;;  %vm966_vm7 = vcmp.ge.f32.partialorder %v902_v47, 0.0  ;;  %v1030_v57 = vmul.f32 0.01, %v902_v47  ;;  %v871_v58 = vadd.f32 %v1660_v43, %v803_v55  ;;  %v819_v59 = vld [vmem:[#allocation2 + $0xc8] sm:$0xff]  ;;  %v1078_v49 = vsel %vm950_vm6, %v886_v30, %v1014_v51  ;;  %v144_v29 = vld [vmem:[#allocation2 + $0x1e0] sm:$0xff] }
  0xe4   :  { %1126 = vst.msk [vmem:[%s2144_s3 + $0x40] sm:$0xff] %vm19_vm2, %v1062_v56  ;;  %vm982_vm8 = vcmp.ge.f32.partialorder %v918_v54, 0.0  ;;  %v1046_v60 = vmul.f32 0.01, %v918_v54  ;;  %v887_v61 = vadd.f32 %v1660_v43, %v819_v59 }
  0xe5   :  { %1142 = vst.msk [vmem:[%s2144_s3 + $0xc0] sm:$0xff] %vm19_vm2, %v1078_v49  ;;  %v1094_v52 = vsel %vm966_vm7, %v902_v47, %v1030_v57  ;;  %vm935_vm9 = vcmp.ge.f32.partialorder %v871_v58, 0.0  ;;  %v999_v63 = vmul.f32 0.01, %v871_v58 }
  0xe6   :  { %v1908_v34 = vpop.f32.mrf.mxu2  ;;  %v1910_v35 = vpop.f32.mrf.mxu3  ;;  %1158 = vst.msk [vmem:[%s2144_s3 + $0x140] sm:$0xff] %vm19_vm2, %v1094_v52  ;;  %v1110_v53 = vsel %vm982_vm8, %v918_v54, %v1046_v60  ;;  %vm951_vm10 = vcmp.ge.f32.partialorder %v887_v61, 0.0  ;;  %v1015_v3 = vmul.f32 0.01, %v887_v61 }
  0xe7   :  { %v1917_v39 = vpop.f32.mrf.mxu0  ;;  %v1919_v40 = vpop.f32.mrf.mxu1  ;;  %1174 = vst.msk [vmem:[%s2144_s3 + $0x1c0] sm:$0xff] %vm19_vm2, %v1110_v53  ;;  %v1063_v8 = vsel %vm935_vm9, %v871_v58, %v999_v63  ;;  %v704_v23 = vadd.f32 %v1908_v34, %v126_v10  ;;  %v720_v24 = vadd.f32 %v1910_v35, %v142_v17 }
  0xe8   :  { %v835_v62 = vld [vmem:[#allocation2 + $0x148] sm:$0xff]  ;;  %1127 = vst.msk [vmem:[%s2144_s3 + $0x48] sm:$0xff] %vm19_vm2, %v1063_v8  ;;  %v1079_v14 = vsel %vm951_vm10, %v887_v61, %v1015_v3  ;;  %v673_v13 = vadd.f32 %v1917_v39, %v95_v20  ;;  %v689_v31 = vadd.f32 %v1919_v40, %v111_v12 }
  0xe9   :  { %v903_v0 = vadd.f32 %v1660_v43, %v835_v62  ;;  %v851_v1 = vld [vmem:[#allocation2 + $0x1c8] sm:$0xff]  ;;  %1143 = vst.msk [vmem:[%s2144_s3 + $0xc8] sm:$0xff] %vm19_vm2, %v1079_v14 }
  0xea   :  { %v919_v4 = vadd.f32 %v1660_v43, %v851_v1  ;;  %737 = vst.msk [vmem:[#allocation2 + $0x50] sm:$0xff] %vm19_vm2, %v672_v16  ;;  %v97_v39 = vld [vmem:[#allocation2 + $0x68] sm:$0xff] }
  0xeb   :  { %vm967_vm11 = vcmp.ge.f32.partialorder %v903_v0, 0.0  ;;  %v1031_v9 = vmul.f32 0.01, %v903_v0  ;;  %753 = vst.msk [vmem:[#allocation2 + $0xd0] sm:$0xff] %vm19_vm2, %v688_v19  ;;  %v2034_v19 = vld [vmem:[%s2142_s2] ss:$0 sm:$0xff] }
  0xec   :  { %vm983_vm12 = vcmp.ge.f32.partialorder %v919_v4, 0.0  ;;  %v1047_v15 = vmul.f32 0.01, %v919_v4  ;;  %769 = vst.msk [vmem:[#allocation2 + $0x150] sm:$0xff] %vm19_vm2, %v704_v23 }
  0xed   :  { %v1095_v18 = vsel %vm967_vm11, %v903_v0, %v1031_v9  ;;  %785 = vst.msk [vmem:[#allocation2 + $0x1d0] sm:$0xff] %vm19_vm2, %v720_v24 }
  0xee   :  { %v609_v6 = vpop.f32.mrf.mxu2  ;;  %v649_v7 = vpop.f32.mrf.mxu3  ;;  %1159 = vst.msk [vmem:[%s2144_s3 + $0x148] sm:$0xff] %vm19_vm2, %v1095_v18  ;;  %v1111_v22 = vsel %vm983_vm12, %v919_v4, %v1047_v15 }
  0xef   :  { %v532_v11 = vpop.f32.mrf.mxu0  ;;  %v572_v21 = vpop.f32.mrf.mxu1  ;;  %1175 = vst.msk [vmem:[%s2144_s3 + $0x1c8] sm:$0xff] %vm19_vm2, %v1111_v22  ;;  %v705_v32 = vadd.f32 %v609_v6, %v127_v27  ;;  %v721_v35 = vadd.f32 %v649_v7, %v143_v28 }
  0xf0   :  { %738 = vst.msk [vmem:[#allocation2 + $0x58] sm:$0xff] %vm19_vm2, %v673_v13  ;;  %v674_v37 = vadd.f32 %v532_v11, %v96_v25  ;;  %v690_v38 = vadd.f32 %v572_v21, %v112_v33 }
  0xf1   :  { %754 = vst.msk [vmem:[#allocation2 + $0xd8] sm:$0xff] %vm19_vm2, %v689_v31  ;;  %v804_v42 = vld [vmem:[#allocation2 + $0x50] sm:$0xff] }
  0xf2   :  { %770 = vst.msk [vmem:[#allocation2 + $0x158] sm:$0xff] %vm19_vm2, %v705_v32  ;;  %v872_v45 = vadd.f32 %v1660_v43, %v804_v42  ;;  %v820_v46 = vld [vmem:[#allocation2 + $0xd0] sm:$0xff]  ;;  %v113_v32 = vld [vmem:[#allocation2 + $0xe8] sm:$0xff] }
  0xf3   :  { %786 = vst.msk [vmem:[#allocation2 + $0x1d8] sm:$0xff] %vm19_vm2, %v721_v35  ;;  %v888_v48 = vadd.f32 %v1660_v43, %v820_v46  ;;  %v836_v50 = vld [vmem:[#allocation2 + $0x150] sm:$0xff] }
  0xf4   :  { %739 = vst.msk [vmem:[#allocation2 + $0x60] sm:$0xff] %vm19_vm2, %v674_v37  ;;  %vm936_vm13 = vcmp.ge.f32.partialorder %v872_v45, 0.0  ;;  %v1000_v51 = vmul.f32 0.01, %v872_v45  ;;  %v904_v54 = vadd.f32 %v1660_v43, %v836_v50  ;;  %v852_v55 = vld [vmem:[#allocation2 + $0x1d0] sm:$0xff] }
  0xf5   :  { %755 = vst.msk [vmem:[#allocation2 + $0xe0] sm:$0xff] %vm19_vm2, %v690_v38  ;;  %vm952_vm14 = vcmp.ge.f32.partialorder %v888_v48, 0.0  ;;  %v1016_v58 = vmul.f32 0.01, %v888_v48  ;;  %v920_v59 = vadd.f32 %v1660_v43, %v852_v55  ;;  %v145_v38 = vld [vmem:[#allocation2 + $0x1e8] sm:$0xff]  ;;  %v98_v42 = vld [vmem:[#allocation2 + $0x70] sm:$0xff] }
  0xf6   :  { %v612_v26 = vpop.f32.mrf.mxu2  ;;  %v652_v34 = vpop.f32.mrf.mxu3  ;;  %v1064_v60 = vsel %vm936_vm13, %v872_v45, %v1000_v51  ;;  %vm968_vm15 = vcmp.ge.f32.partialorder %v904_v54, 0.0  ;;  %v1032_v61 = vmul.f32 0.01, %v904_v54  ;;  %v114_v46 = vld [vmem:[#allocation2 + $0xf0] sm:$0xff]  ;;  %v99_v55 = vld [vmem:[#allocation2 + $0x78] sm:$0xff] }
  0xf7   :  { %v534_v40 = vpop.f32.mrf.mxu0  ;;  %v706_v41 = vadd.f32 %v612_v26, %v128_v36  ;;  %v722_v30 = vadd.f32 %v652_v34, %v144_v29  ;;  %v1991_v44 = vpop.f32.mrf.mxu1  ;;  %v805_v49 = vld [vmem:[#allocation2 + $0x58] sm:$0xff]  ;;  %1128 = vst.msk [vmem:[%s2144_s3 + $0x50] sm:$0xff] %vm19_vm2, %v1064_v60  ;;  %v1080_v63 = vsel %vm952_vm14, %v888_v48, %v1016_v58  ;;  %vm984_vm0 = vcmp.ge.f32.partialorder %v920_v59, 0.0  ;;  %v129_v36 = vld [vmem:[#allocation2 + $0x168] sm:$0xff]  ;;  %v130_v50 = vld [vmem:[#allocation2 + $0x170] sm:$0xff] }
  0xf8   :  { %v675_v47 = vadd.f32 %v534_v40, %v97_v39  ;;  %v873_v62 = vadd.f32 %v1660_v43, %v805_v49  ;;  %v821_v52 = vld [vmem:[#allocation2 + $0xd8] sm:$0xff]  ;;  %v1048_v0 = vmul.f32 0.01, %v920_v59  ;;  %1144 = vst.msk [vmem:[%s2144_s3 + $0xd0] sm:$0xff] %vm19_vm2, %v1080_v63  ;;  %v1096_v53 = vsel %vm968_vm15, %v904_v54, %v1032_v61  ;;  %v146_v51 = vld [vmem:[#allocation2 + $0x1f0] sm:$0xff] }
  0xf9   :  { %771 = vst.msk [vmem:[#allocation2 + $0x160] sm:$0xff] %vm19_vm2, %v706_v41  ;;  %v889_v1 = vadd.f32 %v1660_v43, %v821_v52  ;;  %v837_v2 = vld [vmem:[#allocation2 + $0x158] sm:$0xff]  ;;  %v691_v41 = vadd.f32 %v1991_v44, %v113_v32 }
  0xfa   :  { %787 = vst.msk [vmem:[#allocation2 + $0x1e0] sm:$0xff] %vm19_vm2, %v722_v30  ;;  %vm937_vm1 = vcmp.ge.f32.partialorder %v873_v62, 0.0  ;;  %v1001_v3 = vmul.f32 0.01, %v873_v62  ;;  %v905_v4 = vadd.f32 %v1660_v43, %v837_v2  ;;  %v853_v5 = vld [vmem:[#allocation2 + $0x1d8] sm:$0xff]  ;;  %v1112_v6 = vsel %vm984_vm0, %v920_v59, %v1048_v0 }
  0xfb   :  { %740 = vst.msk [vmem:[#allocation2 + $0x68] sm:$0xff] %vm19_vm2, %v675_v47  ;;  %vm953_vm3 = vcmp.ge.f32.partialorder %v889_v1, 0.0  ;;  %v1017_v7 = vmul.f32 0.01, %v889_v1  ;;  %v921_v8 = vadd.f32 %v1660_v43, %v853_v5  ;;  %v806_v9 = vld [vmem:[#allocation2 + $0x60] sm:$0xff]  ;;  %v115_v59 = vld [vmem:[#allocation2 + $0xf8] sm:$0xff] }
  0xfc   :  { %1160 = vst.msk [vmem:[%s2144_s3 + $0x150] sm:$0xff] %vm19_vm2, %v1096_v53  ;;  %v1065_v10 = vsel %vm937_vm1, %v873_v62, %v1001_v3  ;;  %vm969_vm4 = vcmp.ge.f32.partialorder %v905_v4, 0.0  ;;  %v1033_v11 = vmul.f32 0.01, %v905_v4  ;;  %v874_v14 = vadd.f32 %v1660_v43, %v806_v9  ;;  %v822_v15 = vld [vmem:[#allocation2 + $0xe0] sm:$0xff]  ;;  %v131_v60 = vld [vmem:[#allocation2 + $0x178] sm:$0xff] }
  0xfd   :  { %1176 = vst.msk [vmem:[%s2144_s3 + $0x1d0] sm:$0xff] %vm19_vm2, %v1112_v6  ;;  %v1081_v17 = vsel %vm953_vm3, %v889_v1, %v1017_v7  ;;  %vm985_vm5 = vcmp.ge.f32.partialorder %v921_v8, 0.0  ;;  %v1049_v18 = vmul.f32 0.01, %v921_v8  ;;  %v890_v20 = vadd.f32 %v2034_v19, %v822_v15  ;;  %v147_v52 = vld [vmem:[#allocation2 + $0x1f8] sm:$0xff] }
  0xfe   :  { %v1999_v56 = vpop.f32.mrf.mxu2  ;;  %v2001_v57 = vpop.f32.mrf.mxu3  ;;  %1129 = vst.msk [vmem:[%s2144_s3 + $0x58] sm:$0xff] %vm19_vm2, %v1065_v10  ;;  %v1097_v43 = vsel %vm969_vm4, %v905_v4, %v1033_v11  ;;  %vm938_vm6 = vcmp.ge.f32.partialorder %v874_v14, 0.0  ;;  %v1002_v23 = vmul.f32 0.01, %v874_v14 }
  0xff   :  { %v537_v16 = vpop.f32.mrf.mxu0  ;;  %v577_v22 = vpop.f32.mrf.mxu1  ;;  %1145 = vst.msk [vmem:[%s2144_s3 + $0xd8] sm:$0xff] %vm19_vm2, %v1081_v17  ;;  %v1113_v13 = vsel %vm985_vm5, %v921_v8, %v1049_v18  ;;  %vm954_vm7 = vcmp.ge.f32.partialorder %v890_v20, 0.0  ;;  %v1018_v28 = vmul.f32 0.01, %v890_v20  ;;  %v707_v45 = vadd.f32 %v1999_v56, %v129_v36 }
 0x100   :  { %v838_v21 = vld [vmem:[#allocation2 + $0x160] sm:$0xff]  ;;  %1161 = vst.msk [vmem:[%s2144_s3 + $0x158] sm:$0xff] %vm19_vm2, %v1097_v43  ;;  %v1066_v26 = vsel %vm938_vm6, %v874_v14, %v1002_v23  ;;  %v723_v48 = vadd.f32 %v2001_v57, %v145_v38  ;;  %v676_v44 = vadd.f32 %v537_v16, %v98_v42  ;;  %v692_v54 = vadd.f32 %v577_v22, %v114_v46 }
 0x101   :  { %v906_v12 = vadd.f32 %v2034_v19, %v838_v21  ;;  %v854_v24 = vld [vmem:[#allocation2 + $0x1e0] sm:$0xff]  ;;  %1177 = vst.msk [vmem:[%s2144_s3 + $0x1d8] sm:$0xff] %vm19_vm2, %v1113_v13  ;;  %v1082_v37 = vsel %vm954_vm7, %v890_v20, %v1018_v28 }
 0x102   :  { %v922_v31 = vadd.f32 %v2034_v19, %v854_v24  ;;  %v807_v25 = vld [vmem:[#allocation2 + $0x68] sm:$0xff]  ;;  %1130 = vst.msk [vmem:[%s2144_s3 + $0x60] sm:$0xff] %vm19_vm2, %v1066_v26 }
 0x103   :  { %vm970_vm8 = vcmp.ge.f32.partialorder %v906_v12, 0.0  ;;  %v1034_v34 = vmul.f32 0.01, %v906_v12  ;;  %v875_v35 = vadd.f32 %v2034_v19, %v807_v25  ;;  %1146 = vst.msk [vmem:[%s2144_s3 + $0xe0] sm:$0xff] %vm19_vm2, %v1082_v37 }
 0x104   :  { %vm986_vm9 = vcmp.ge.f32.partialorder %v922_v31, 0.0  ;;  %v1050_v29 = vmul.f32 0.01, %v922_v31  ;;  %756 = vst.msk [vmem:[#allocation2 + $0xe8] sm:$0xff] %vm19_vm2, %v691_v41 }
 0x105   :  { %v1098_v39 = vsel %vm970_vm8, %v906_v12, %v1034_v34  ;;  %vm939_vm10 = vcmp.ge.f32.partialorder %v875_v35, 0.0  ;;  %v1003_v40 = vmul.f32 0.01, %v875_v35  ;;  %772 = vst.msk [vmem:[#allocation2 + $0x168] sm:$0xff] %vm19_vm2, %v707_v45 }
 0x106   :  { %v617_v27 = vpop.f32.mrf.mxu2  ;;  %v657_v33 = vpop.f32.mrf.mxu3  ;;  %1162 = vst.msk [vmem:[%s2144_s3 + $0x160] sm:$0xff] %vm19_vm2, %v1098_v39  ;;  %v1114_v30 = vsel %vm986_vm9, %v922_v31, %v1050_v29 }
 0x107   :  { %1178 = vst.msk [vmem:[%s2144_s3 + $0x1e0] sm:$0xff] %vm19_vm2, %v1114_v30  ;;  %v1067_v47 = vsel %vm939_vm10, %v875_v35, %v1003_v40  ;;  %v539_v56 = vpop.f32.mrf.mxu0  ;;  %v708_v58 = vadd.f32 %v617_v27, %v130_v50  ;;  %v579_v49 = vpop.f32.mrf.mxu1  ;;  %v724_v57 = vadd.f32 %v657_v33, %v146_v51 }
 0x108   :  { %1131 = vst.msk [vmem:[%s2144_s3 + $0x68] sm:$0xff] %vm19_vm2, %v1067_v47  ;;  %v677_v62 = vadd.f32 %v539_v56, %v99_v55  ;;  %v693_v0 = vadd.f32 %v579_v49, %v115_v59 }
 0x109   :  { %788 = vst.msk [vmem:[#allocation2 + $0x1e8] sm:$0xff] %vm19_vm2, %v723_v48 }
 0x10a   :  { %741 = vst.msk [vmem:[#allocation2 + $0x70] sm:$0xff] %vm19_vm2, %v676_v44 }
 0x10b   :  { %757 = vst.msk [vmem:[#allocation2 + $0xf0] sm:$0xff] %vm19_vm2, %v692_v54  ;;  %v823_v53 = vld [vmem:[#allocation2 + $0xe8] sm:$0xff] }
 0x10c   :  { %773 = vst.msk [vmem:[#allocation2 + $0x170] sm:$0xff] %vm19_vm2, %v708_v58  ;;  %v891_v3 = vadd.f32 %v2034_v19, %v823_v53  ;;  %v839_v4 = vld [vmem:[#allocation2 + $0x168] sm:$0xff] }
 0x10d   :  { %789 = vst.msk [vmem:[#allocation2 + $0x1f0] sm:$0xff] %vm19_vm2, %v724_v57  ;;  %v907_v5 = vadd.f32 %v2034_v19, %v839_v4 }
 0x10e   :  { %v619_v61 = vpop.f32.mrf.mxu2  ;;  %v659_v63 = vpop.f32.mrf.mxu3  ;;  %742 = vst.msk [vmem:[#allocation2 + $0x78] sm:$0xff] %vm19_vm2, %v677_v62  ;;  %vm955_vm11 = vcmp.ge.f32.partialorder %v891_v3, 0.0  ;;  %v1019_v7 = vmul.f32 0.01, %v891_v3 }
 0x10f   :  { %v709_v1 = vadd.f32 %v619_v61, %v131_v60  ;;  %v725_v2 = vadd.f32 %v659_v63, %v147_v52  ;;  %758 = vst.msk [vmem:[#allocation2 + $0xf8] sm:$0xff] %vm19_vm2, %v693_v0  ;;  %vm971_vm12 = vcmp.ge.f32.partialorder %v907_v5, 0.0  ;;  %v1035_v10 = vmul.f32 0.01, %v907_v5 }
 0x110   :  { %v855_v6 = vld [vmem:[#allocation2 + $0x1e8] sm:$0xff]  ;;  %v1083_v15 = vsel %vm955_vm11, %v891_v3, %v1019_v7 }
 0x111   :  { %774 = vst.msk [vmem:[#allocation2 + $0x178] sm:$0xff] %vm19_vm2, %v709_v1  ;;  %v923_v8 = vadd.f32 %v2034_v19, %v855_v6  ;;  %v808_v9 = vld [vmem:[#allocation2 + $0x70] sm:$0xff]  ;;  %v1099_v20 = vsel %vm971_vm12, %v907_v5, %v1035_v10 }
 0x112   :  { %790 = vst.msk [vmem:[#allocation2 + $0x1f8] sm:$0xff] %vm19_vm2, %v725_v2  ;;  %v876_v11 = vadd.f32 %v2034_v19, %v808_v9  ;;  %v824_v14 = vld [vmem:[#allocation2 + $0xf0] sm:$0xff] }
 0x113   :  { %vm987_vm13 = vcmp.ge.f32.partialorder %v923_v8, 0.0  ;;  %v1051_v16 = vmul.f32 0.01, %v923_v8  ;;  %v892_v17 = vadd.f32 %v2034_v19, %v824_v14  ;;  %v840_v18 = vld [vmem:[#allocation2 + $0x170] sm:$0xff]  ;;  %1147 = vst.msk [vmem:[%s2144_s3 + $0xe8] sm:$0xff] %vm19_vm2, %v1083_v15 }
 0x114   :  { %vm940_vm14 = vcmp.ge.f32.partialorder %v876_v11, 0.0  ;;  %v1004_v21 = vmul.f32 0.01, %v876_v11  ;;  %v908_v22 = vadd.f32 %v2034_v19, %v840_v18  ;;  %v856_v43 = vld [vmem:[#allocation2 + $0x1f0] sm:$0xff]  ;;  %1163 = vst.msk [vmem:[%s2144_s3 + $0x168] sm:$0xff] %vm19_vm2, %v1099_v20 }
 0x115   :  { %v1115_v23 = vsel %vm987_vm13, %v923_v8, %v1051_v16  ;;  %vm956_vm15 = vcmp.ge.f32.partialorder %v892_v17, 0.0  ;;  %v1020_v12 = vmul.f32 0.01, %v892_v17  ;;  %v924_v24 = vadd.f32 %v2034_v19, %v856_v43  ;;  %v809_v27 = vld [vmem:[#allocation2 + $0x78] sm:$0xff] }
 0x116   :  { %1179 = vst.msk [vmem:[%s2144_s3 + $0x1e8] sm:$0xff] %vm19_vm2, %v1115_v23  ;;  %v1068_v13 = vsel %vm940_vm14, %v876_v11, %v1004_v21  ;;  %vm972_vm0 = vcmp.ge.f32.partialorder %v908_v22, 0.0  ;;  %v1036_v28 = vmul.f32 0.01, %v908_v22  ;;  %v877_v31 = vadd.f32 %v2034_v19, %v809_v27  ;;  %v825_v25 = vld [vmem:[#allocation2 + $0xf8] sm:$0xff] }
 0x117   :  { %1132 = vst.msk [vmem:[%s2144_s3 + $0x70] sm:$0xff] %vm19_vm2, %v1068_v13  ;;  %v1084_v32 = vsel %vm956_vm15, %v892_v17, %v1020_v12  ;;  %vm988_vm1 = vcmp.ge.f32.partialorder %v924_v24, 0.0  ;;  %v1052_v33 = vmul.f32 0.01, %v924_v24  ;;  %v893_v26 = vadd.f32 %v2034_v19, %v825_v25 }
 0x118   :  { %v841_v34 = vld [vmem:[#allocation2 + $0x178] sm:$0xff]  ;;  %1148 = vst.msk [vmem:[%s2144_s3 + $0xf0] sm:$0xff] %vm19_vm2, %v1084_v32  ;;  %v1100_v35 = vsel %vm972_vm0, %v908_v22, %v1036_v28  ;;  %vm941_vm3 = vcmp.ge.f32.partialorder %v877_v31, 0.0  ;;  %v1005_v36 = vmul.f32 0.01, %v877_v31 }
 0x119   :  { %v909_v37 = vadd.f32 %v2034_v19, %v841_v34  ;;  %v857_v29 = vld [vmem:[#allocation2 + $0x1f8] sm:$0xff]  ;;  %1164 = vst.msk [vmem:[%s2144_s3 + $0x170] sm:$0xff] %vm19_vm2, %v1100_v35  ;;  %v1116_v38 = vsel %vm988_vm1, %v924_v24, %v1052_v33  ;;  %vm957_vm4 = vcmp.ge.f32.partialorder %v893_v26, 0.0  ;;  %v1021_v39 = vmul.f32 0.01, %v893_v26 }
 0x11a   :  { %v925_v40 = vadd.f32 %v2034_v19, %v857_v29  ;;  %1180 = vst.msk [vmem:[%s2144_s3 + $0x1f0] sm:$0xff] %vm19_vm2, %v1116_v38  ;;  %v1069_v41 = vsel %vm941_vm3, %v877_v31, %v1005_v36 }
 0x11b   :  { %vm973_vm5 = vcmp.ge.f32.partialorder %v909_v37, 0.0  ;;  %v1037_v42 = vmul.f32 0.01, %v909_v37  ;;  %1133 = vst.msk [vmem:[%s2144_s3 + $0x78] sm:$0xff] %vm19_vm2, %v1069_v41  ;;  %v1085_v30 = vsel %vm957_vm4, %v893_v26, %v1021_v39 }
 0x11c   :  { %vm989_vm6 = vcmp.ge.f32.partialorder %v925_v40, 0.0  ;;  %v1053_v45 = vmul.f32 0.01, %v925_v40  ;;  %1149 = vst.msk [vmem:[%s2144_s3 + $0xf8] sm:$0xff] %vm19_vm2, %v1085_v30 }
 0x11d   :  { %v1101_v19 = vsel %vm973_vm5, %v909_v37, %v1037_v42 }
 0x11e   :  { %1165 = vst.msk [vmem:[%s2144_s3 + $0x178] sm:$0xff] %vm19_vm2, %v1101_v19  ;;  %v1117_v46 = vsel %vm989_vm6, %v925_v40, %v1053_v45 }
 0x11f   :  { %1181 = vst.msk [vmem:[%s2144_s3 + $0x1f8] sm:$0xff] %vm19_vm2, %v1117_v46 }

// kernel: residual_block_forward.4
= control target key start
LH: loop header
LB: loop body
LE: loop exit
PB: predicated region body
PF: predicated region fallthrough
CT: control target
= control target key end

     0   :  { %vm470_vm0 = vcmask 1041408   ;;  %vm373_vm1 = vcmask 31744   ;;  %vm19_vm2 = vcmask 64512   ;;  %v1172_v26 = vmov 0.0   ;;  %s1844_s1 = inlined_call_operand.vmem [shape: bf16[4,8], index: 1, kind: input, shape index: {}]   ;;  %s1845_s0 = inlined_call_operand.vmem [shape: bf16[512,4], index: 0, kind: input, shape index: {}]   ;;  %s1846_s2 = inlined_call_operand.vmem [shape: f32[1,8], index: 2, kind: input, shape index: {}]   ;;  %s1847_s3 = inlined_call_operand.vmem [shape: f32[512,8], index: 3, kind: output, shape index: {}]  }
   0x1   :  { %v212_v0 = vld [vmem:[%s1844_s1] sm:$0x3]  ;;  %v1136_v6 = vld [vmem:[%s1845_s0 + $0x8] sm:$0xff]  ;;  %v1137_v10 = vld [vmem:[%s1845_s0 + $0x10] sm:$0xff]  ;;  %20 = vst.msk [vmem:[#allocation2] sm:$0xff] %vm19_vm2, %v1172_v26 }
   0x2   :  { %v472_v1 = vsel %vm470_vm0, %v212_v0, 0  ;;  %v1135_v2 = vld [vmem:[%s1845_s0] sm:$0xff]  ;;  %v1144_v7 = vld [vmem:[%s1845_s0 + $0x48] sm:$0xff]  ;;  %v1145_v11 = vld [vmem:[%s1845_s0 + $0x50] sm:$0xff]  ;;  %21 = vst.msk [vmem:[#allocation2 + $0x8] sm:$0xff] %vm19_vm2, %v1172_v26 }
   0x3   :  { %v1143_v3 = vld [vmem:[%s1845_s0 + $0x40] sm:$0xff]  ;;  %481 = vmatpush.bf16.msra.mxu0 %v472_v1  ;;  %1167 = vmatpush.bf16.msra.mxu1 %v472_v1  ;;  %v1152_v8 = vld [vmem:[%s1845_s0 + $0x88] sm:$0xff]  ;;  %v1153_v12 = vld [vmem:[%s1845_s0 + $0x90] sm:$0xff]  ;;  %22 = vst.msk [vmem:[#allocation2 + $0x10] sm:$0xff] %vm19_vm2, %v1172_v26 }
   0x4   :  { %v1151_v4 = vld [vmem:[%s1845_s0 + $0x80] sm:$0xff]  ;;  %1168 = vmatpush.bf16.msra.mxu2 %v472_v1  ;;  %1169 = vmatpush.bf16.msra.mxu3 %v472_v1  ;;  %v1160_v9 = vld [vmem:[%s1845_s0 + $0xc8] sm:$0xff]  ;;  %v1161_v13 = vld [vmem:[%s1845_s0 + $0xd0] sm:$0xff]  ;;  %23 = vst.msk [vmem:[#allocation2 + $0x18] sm:$0xff] %vm19_vm2, %v1172_v26 }
   0x5   :  { %v1159_v5 = vld [vmem:[%s1845_s0 + $0xc0] sm:$0xff]  ;;  %v1138_v14 = vld [vmem:[%s1845_s0 + $0x18] sm:$0xff]  ;;  %v1140_v22 = vld [vmem:[%s1845_s0 + $0x28] sm:$0xff]  ;;  %24 = vst.msk [vmem:[#allocation2 + $0x20] sm:$0xff] %vm19_vm2, %v1172_v26 }
   0x6   :  { %1103 = vmatmul.msk.bf16.vlgmr.msra.gmra.mxu0 %vm373_vm1, %v1135_v2  ;;  %1111 = vmatmul.msk.bf16.vlgmr.msra.gmra.mxu1 %vm373_vm1, %v1143_v3  ;;  %v1146_v15 = vld [vmem:[%s1845_s0 + $0x58] sm:$0xff]  ;;  %v1139_v18 = vld [vmem:[%s1845_s0 + $0x20] sm:$0xff]  ;;  %v1148_v23 = vld [vmem:[%s1845_s0 + $0x68] sm:$0xff]  ;;  %25 = vst.msk [vmem:[#allocation2 + $0x28] sm:$0xff] %vm19_vm2, %v1172_v26 }
   0x7   :  { %1119 = vmatmul.msk.bf16.vlgmr.msra.gmra.mxu2 %vm373_vm1, %v1151_v4  ;;  %1127 = vmatmul.msk.bf16.vlgmr.msra.gmra.mxu3 %vm373_vm1, %v1159_v5  ;;  %v1154_v16 = vld [vmem:[%s1845_s0 + $0x98] sm:$0xff]  ;;  %v1147_v19 = vld [vmem:[%s1845_s0 + $0x60] sm:$0xff]  ;;  %v1156_v24 = vld [vmem:[%s1845_s0 + $0xa8] sm:$0xff]  ;;  %26 = vst.msk [vmem:[#allocation2 + $0x30] sm:$0xff] %vm19_vm2, %v1172_v26 }
   0x8   :  { %v1162_v17 = vld [vmem:[%s1845_s0 + $0xd8] sm:$0xff]  ;;  %v1155_v20 = vld [vmem:[%s1845_s0 + $0xa0] sm:$0xff]  ;;  %v1164_v25 = vld [vmem:[%s1845_s0 + $0xe8] sm:$0xff]  ;;  %27 = vst.msk [vmem:[#allocation2 + $0x38] sm:$0xff] %vm19_vm2, %v1172_v26 }
   0x9   :  { %v1163_v21 = vld [vmem:[%s1845_s0 + $0xe0] sm:$0xff]  ;;  %28 = vst.msk [vmem:[#allocation2 + $0x40] sm:$0xff] %vm19_vm2, %v1172_v26  ;;  %v1141_v27 = vld [vmem:[%s1845_s0 + $0x30] sm:$0xff]  ;;  %v1142_v31 = vld [vmem:[%s1845_s0 + $0x38] sm:$0xff] }
   0xa   :  { %29 = vst.msk [vmem:[#allocation2 + $0x48] sm:$0xff] %vm19_vm2, %v1172_v26  ;;  %v1149_v28 = vld [vmem:[%s1845_s0 + $0x70] sm:$0xff]  ;;  %v1150_v32 = vld [vmem:[%s1845_s0 + $0x78] sm:$0xff]  ;;  %v84_v35 = vld [vmem:[#allocation2] sm:$0xff] }
   0xb   :  { %30 = vst.msk [vmem:[#allocation2 + $0x50] sm:$0xff] %vm19_vm2, %v1172_v26  ;;  %v1157_v29 = vld [vmem:[%s1845_s0 + $0xb0] sm:$0xff]  ;;  %v1158_v33 = vld [vmem:[%s1845_s0 + $0xb8] sm:$0xff]  ;;  %v1426_v39 = vld [vmem:[%s1846_s2] ss:$0 sm:$0xff] }
   0xc   :  { %v1165_v30 = vld [vmem:[%s1845_s0 + $0xf0] sm:$0xff]  ;;  %31 = vst.msk [vmem:[#allocation2 + $0x58] sm:$0xff] %vm19_vm2, %v1172_v26  ;;  %v1166_v34 = vld [vmem:[%s1845_s0 + $0xf8] sm:$0xff]  ;;  %v85_v54 = vld [vmem:[#allocation2 + $0x8] sm:$0xff] }
   0xd   :  { %32 = vst.msk [vmem:[#allocation2 + $0x60] sm:$0xff] %vm19_vm2, %v1172_v26  ;;  %v86_v62 = vld [vmem:[#allocation2 + $0x10] sm:$0xff] }
   0xe   :  { %33 = vst.msk [vmem:[#allocation2 + $0x68] sm:$0xff] %vm19_vm2, %v1172_v26 }
   0xf   :  { %34 = vst.msk [vmem:[#allocation2 + $0x70] sm:$0xff] %vm19_vm2, %v1172_v26 }
  0x10   :  { %35 = vst.msk [vmem:[#allocation2 + $0x78] sm:$0xff] %vm19_vm2, %v1172_v26 }
  0x11   :  { %36 = vst.msk [vmem:[#allocation2 + $0x80] sm:$0xff] %vm19_vm2, %v1172_v26 }
  0x12   :  { %37 = vst.msk [vmem:[#allocation2 + $0x88] sm:$0xff] %vm19_vm2, %v1172_v26 }
  0x13   :  { %38 = vst.msk [vmem:[#allocation2 + $0x90] sm:$0xff] %vm19_vm2, %v1172_v26 }
  0x14   :  { %39 = vst.msk [vmem:[#allocation2 + $0x98] sm:$0xff] %vm19_vm2, %v1172_v26 }
  0x15   :  { %40 = vst.msk [vmem:[#allocation2 + $0xa0] sm:$0xff] %vm19_vm2, %v1172_v26 }
  0x16   :  { %1104 = vmatmul.msk.bf16.gmra.mxu0 %vm373_vm1, %v1136_v6  ;;  %1112 = vmatmul.msk.bf16.gmra.mxu1 %vm373_vm1, %v1144_v7  ;;  %41 = vst.msk [vmem:[#allocation2 + $0xa8] sm:$0xff] %vm19_vm2, %v1172_v26 }
  0x17   :  { %1120 = vmatmul.msk.bf16.gmra.mxu2 %vm373_vm1, %v1152_v8  ;;  %1128 = vmatmul.msk.bf16.gmra.mxu3 %vm373_vm1, %v1160_v9  ;;  %42 = vst.msk [vmem:[#allocation2 + $0xb0] sm:$0xff] %vm19_vm2, %v1172_v26 }
  0x18   :  { %43 = vst.msk [vmem:[#allocation2 + $0xb8] sm:$0xff] %vm19_vm2, %v1172_v26  ;;  %v100_v48 = vld [vmem:[#allocation2 + $0x80] sm:$0xff] }
  0x19   :  { %44 = vst.msk [vmem:[#allocation2 + $0xc0] sm:$0xff] %vm19_vm2, %v1172_v26  ;;  %v101_v56 = vld [vmem:[#allocation2 + $0x88] sm:$0xff] }
  0x1a   :  { %45 = vst.msk [vmem:[#allocation2 + $0xc8] sm:$0xff] %vm19_vm2, %v1172_v26  ;;  %v102_v2 = vld [vmem:[#allocation2 + $0x90] sm:$0xff] }
  0x1b   :  { %46 = vst.msk [vmem:[#allocation2 + $0xd0] sm:$0xff] %vm19_vm2, %v1172_v26 }
  0x1c   :  { %47 = vst.msk [vmem:[#allocation2 + $0xd8] sm:$0xff] %vm19_vm2, %v1172_v26 }
  0x1d   :  { %48 = vst.msk [vmem:[#allocation2 + $0xe0] sm:$0xff] %vm19_vm2, %v1172_v26 }
  0x1e   :  { %49 = vst.msk [vmem:[#allocation2 + $0xe8] sm:$0xff] %vm19_vm2, %v1172_v26 }
  0x1f   :  { %50 = vst.msk [vmem:[#allocation2 + $0xf0] sm:$0xff] %vm19_vm2, %v1172_v26 }
  0x20   :  { %51 = vst.msk [vmem:[#allocation2 + $0xf8] sm:$0xff] %vm19_vm2, %v1172_v26 }
  0x21   :  { %52 = vst.msk [vmem:[#allocation2 + $0x100] sm:$0xff] %vm19_vm2, %v1172_v26 }
  0x22   :  { %53 = vst.msk [vmem:[#allocation2 + $0x108] sm:$0xff] %vm19_vm2, %v1172_v26 }
  0x23   :  { %54 = vst.msk [vmem:[#allocation2 + $0x110] sm:$0xff] %vm19_vm2, %v1172_v26 }
  0x24   :  { %55 = vst.msk [vmem:[#allocation2 + $0x118] sm:$0xff] %vm19_vm2, %v1172_v26 }
  0x25   :  { %56 = vst.msk [vmem:[#allocation2 + $0x120] sm:$0xff] %vm19_vm2, %v1172_v26 }
  0x26   :  { %1105 = vmatmul.msk.bf16.gmra.mxu0 %vm373_vm1, %v1137_v10  ;;  %1113 = vmatmul.msk.bf16.gmra.mxu1 %vm373_vm1, %v1145_v11  ;;  %57 = vst.msk [vmem:[#allocation2 + $0x128] sm:$0xff] %vm19_vm2, %v1172_v26 }
  0x27   :  { %1121 = vmatmul.msk.bf16.gmra.mxu2 %vm373_vm1, %v1153_v12  ;;  %1129 = vmatmul.msk.bf16.gmra.mxu3 %vm373_vm1, %v1161_v13  ;;  %58 = vst.msk [vmem:[#allocation2 + $0x130] sm:$0xff] %vm19_vm2, %v1172_v26 }
  0x28   :  { %59 = vst.msk [vmem:[#allocation2 + $0x138] sm:$0xff] %vm19_vm2, %v1172_v26  ;;  %v116_v51 = vld [vmem:[#allocation2 + $0x100] sm:$0xff] }
  0x29   :  { %60 = vst.msk [vmem:[#allocation2 + $0x140] sm:$0xff] %vm19_vm2, %v1172_v26  ;;  %v117_v58 = vld [vmem:[#allocation2 + $0x108] sm:$0xff] }
  0x2a   :  { %61 = vst.msk [vmem:[#allocation2 + $0x148] sm:$0xff] %vm19_vm2, %v1172_v26  ;;  %v118_v6 = vld [vmem:[#allocation2 + $0x110] sm:$0xff] }
  0x2b   :  { %62 = vst.msk [vmem:[#allocation2 + $0x150] sm:$0xff] %vm19_vm2, %v1172_v26 }
  0x2c   :  { %63 = vst.msk [vmem:[#allocation2 + $0x158] sm:$0xff] %vm19_vm2, %v1172_v26 }
  0x2d   :  { %64 = vst.msk [vmem:[#allocation2 + $0x160] sm:$0xff] %vm19_vm2, %v1172_v26 }
  0x2e   :  { %65 = vst.msk [vmem:[#allocation2 + $0x168] sm:$0xff] %vm19_vm2, %v1172_v26 }
  0x2f   :  { %66 = vst.msk [vmem:[#allocation2 + $0x170] sm:$0xff] %vm19_vm2, %v1172_v26 }
  0x30   :  { %67 = vst.msk [vmem:[#allocation2 + $0x178] sm:$0xff] %vm19_vm2, %v1172_v26 }
  0x31   :  { %68 = vst.msk [vmem:[#allocation2 + $0x180] sm:$0xff] %vm19_vm2, %v1172_v26 }
  0x32   :  { %69 = vst.msk [vmem:[#allocation2 + $0x188] sm:$0xff] %vm19_vm2, %v1172_v26 }
  0x33   :  { %70 = vst.msk [vmem:[#allocation2 + $0x190] sm:$0xff] %vm19_vm2, %v1172_v26 }
  0x34   :  { %71 = vst.msk [vmem:[#allocation2 + $0x198] sm:$0xff] %vm19_vm2, %v1172_v26 }
  0x35   :  { %72 = vst.msk [vmem:[#allocation2 + $0x1a0] sm:$0xff] %vm19_vm2, %v1172_v26 }
  0x36   :  { %1106 = vmatmul.msk.bf16.gmra.mxu0 %vm373_vm1, %v1138_v14  ;;  %1114 = vmatmul.msk.bf16.gmra.mxu1 %vm373_vm1, %v1146_v15  ;;  %73 = vst.msk [vmem:[#allocation2 + $0x1a8] sm:$0xff] %vm19_vm2, %v1172_v26 }
  0x37   :  { %1122 = vmatmul.msk.bf16.gmra.mxu2 %vm373_vm1, %v1154_v16  ;;  %1130 = vmatmul.msk.bf16.gmra.mxu3 %vm373_vm1, %v1162_v17  ;;  %74 = vst.msk [vmem:[#allocation2 + $0x1b0] sm:$0xff] %vm19_vm2, %v1172_v26 }
  0x38   :  { %75 = vst.msk [vmem:[#allocation2 + $0x1b8] sm:$0xff] %vm19_vm2, %v1172_v26  ;;  %v132_v52 = vld [vmem:[#allocation2 + $0x180] sm:$0xff] }
  0x39   :  { %76 = vst.msk [vmem:[#allocation2 + $0x1c0] sm:$0xff] %vm19_vm2, %v1172_v26  ;;  %v133_v60 = vld [vmem:[#allocation2 + $0x188] sm:$0xff] }
  0x3a   :  { %77 = vst.msk [vmem:[#allocation2 + $0x1c8] sm:$0xff] %vm19_vm2, %v1172_v26 }
  0x3b   :  { %78 = vst.msk [vmem:[#allocation2 + $0x1d0] sm:$0xff] %vm19_vm2, %v1172_v26 }
  0x3c   :  { %79 = vst.msk [vmem:[#allocation2 + $0x1d8] sm:$0xff] %vm19_vm2, %v1172_v26 }
  0x3d   :  { %80 = vst.msk [vmem:[#allocation2 + $0x1e0] sm:$0xff] %vm19_vm2, %v1172_v26 }
  0x3e   :  { %81 = vst.msk [vmem:[#allocation2 + $0x1e8] sm:$0xff] %vm19_vm2, %v1172_v26 }
  0x3f   :  { %82 = vst.msk [vmem:[#allocation2 + $0x1f0] sm:$0xff] %vm19_vm2, %v1172_v26 }
  0x40   :  { %83 = vst.msk [vmem:[#allocation2 + $0x1f8] sm:$0xff] %vm19_vm2, %v1172_v26 }
  0x46   :  { %1107 = vmatmul.msk.bf16.gmra.mxu0 %vm373_vm1, %v1139_v18  ;;  %1115 = vmatmul.msk.bf16.gmra.mxu1 %vm373_vm1, %v1147_v19 }
  0x47   :  { %1123 = vmatmul.msk.bf16.gmra.mxu2 %vm373_vm1, %v1155_v20  ;;  %1131 = vmatmul.msk.bf16.gmra.mxu3 %vm373_vm1, %v1163_v21 }
  0x56   :  { %1108 = vmatmul.msk.bf16.gmra.mxu0 %vm373_vm1, %v1140_v22  ;;  %1116 = vmatmul.msk.bf16.gmra.mxu1 %vm373_vm1, %v1148_v23 }
  0x57   :  { %1124 = vmatmul.msk.bf16.gmra.mxu2 %vm373_vm1, %v1156_v24  ;;  %1132 = vmatmul.msk.bf16.gmra.mxu3 %vm373_vm1, %v1164_v25 }
  0x66   :  { %1109 = vmatmul.msk.bf16.gmra.mxu0 %vm373_vm1, %v1141_v27  ;;  %1117 = vmatmul.msk.bf16.gmra.mxu1 %vm373_vm1, %v1149_v28  ;;  %v134_v27 = vld [vmem:[#allocation2 + $0x190] sm:$0xff] }
  0x67   :  { %1125 = vmatmul.msk.bf16.gmra.mxu2 %vm373_vm1, %v1157_v29  ;;  %1133 = vmatmul.msk.bf16.gmra.mxu3 %vm373_vm1, %v1165_v30  ;;  %v87_v30 = vld [vmem:[#allocation2 + $0x18] sm:$0xff] }
  0x76   :  { %1110 = vmatmul.msk.bf16.gmra.mxu0 %vm373_vm1, %v1142_v31  ;;  %1118 = vmatmul.msk.bf16.gmra.mxu1 %vm373_vm1, %v1150_v32 }
  0x77   :  { %1126 = vmatmul.msk.bf16.gmra.mxu2 %vm373_vm1, %v1158_v33  ;;  %1134 = vmatmul.msk.bf16.gmra.mxu3 %vm373_vm1, %v1166_v34  ;;  %v103_v33 = vld [vmem:[#allocation2 + $0x98] sm:$0xff] }
  0x83   :  { %v483_v36 = vpop.f32.mrf.mxu0  ;;  %v523_v37 = vpop.f32.mrf.mxu1 }
  0x84   :  { %v643_v38 = vadd.f32 %v483_v36, %v84_v35  ;;  %v659_v53 = vadd.f32 %v523_v37, %v100_v48  ;;  %v119_v37 = vld [vmem:[#allocation2 + $0x118] sm:$0xff] }
  0x86   :  { %708 = vst.msk [vmem:[#allocation2] sm:$0xff] %vm19_vm2, %v643_v38 }
  0x87   :  { %724 = vst.msk [vmem:[#allocation2 + $0x80] sm:$0xff] %vm19_vm2, %v659_v53  ;;  %v136_v53 = vld [vmem:[#allocation2 + $0x1a0] sm:$0xff] }
  0x8a   :  { %v563_v40 = vpop.f32.mrf.mxu2  ;;  %v603_v41 = vpop.f32.mrf.mxu3 }
  0x8b   :  { %v485_v42 = vpop.f32.mrf.mxu0  ;;  %v525_v43 = vpop.f32.mrf.mxu1  ;;  %v675_v55 = vadd.f32 %v563_v40, %v116_v51  ;;  %v691_v57 = vadd.f32 %v603_v41, %v132_v52  ;;  %v120_v51 = vld [vmem:[#allocation2 + $0x120] sm:$0xff] }
  0x8c   :  { %v644_v59 = vadd.f32 %v485_v42, %v85_v54  ;;  %v660_v61 = vadd.f32 %v525_v43, %v101_v56  ;;  %v135_v43 = vld [vmem:[#allocation2 + $0x198] sm:$0xff] }
  0x8d   :  { %v775_v44 = vld [vmem:[#allocation2] sm:$0xff]  ;;  %740 = vst.msk [vmem:[#allocation2 + $0x100] sm:$0xff] %vm19_vm2, %v675_v55  ;;  %v89_v55 = vld [vmem:[#allocation2 + $0x28] sm:$0xff] }
  0x8e   :  { %v843_v45 = vadd.f32 %v1426_v39, %v775_v44  ;;  %756 = vst.msk [vmem:[#allocation2 + $0x180] sm:$0xff] %vm19_vm2, %v691_v57  ;;  %v791_v10 = vld [vmem:[#allocation2 + $0x80] sm:$0xff] }
  0x8f   :  { %709 = vst.msk [vmem:[#allocation2 + $0x8] sm:$0xff] %vm19_vm2, %v644_v59  ;;  %v859_v11 = vadd.f32 %v1426_v39, %v791_v10 }
  0x90   :  { %907 = vst.msk [vmem:[%s1847_s3] sm:$0xff] %vm19_vm2, %v843_v45 }
  0x91   :  { %725 = vst.msk [vmem:[#allocation2 + $0x88] sm:$0xff] %vm19_vm2, %v660_v61 }
  0x92   :  { %v565_v46 = vpop.f32.mrf.mxu2  ;;  %v605_v47 = vpop.f32.mrf.mxu3  ;;  %923 = vst.msk [vmem:[%s1847_s3 + $0x80] sm:$0xff] %vm19_vm2, %v859_v11 }
  0x93   :  { %v488_v49 = vpop.f32.mrf.mxu0  ;;  %v528_v50 = vpop.f32.mrf.mxu1  ;;  %v676_v1 = vadd.f32 %v565_v46, %v117_v58  ;;  %v692_v5 = vadd.f32 %v605_v47, %v133_v60  ;;  %v88_v47 = vld [vmem:[#allocation2 + $0x20] sm:$0xff] }
  0x94   :  { %v645_v7 = vadd.f32 %v488_v49, %v86_v62  ;;  %v661_v8 = vadd.f32 %v528_v50, %v102_v2  ;;  %v807_v12 = vld [vmem:[#allocation2 + $0x100] sm:$0xff] }
  0x95   :  { %741 = vst.msk [vmem:[#allocation2 + $0x108] sm:$0xff] %vm19_vm2, %v676_v1  ;;  %v875_v15 = vadd.f32 %v1426_v39, %v807_v12  ;;  %v823_v16 = vld [vmem:[#allocation2 + $0x180] sm:$0xff] }
  0x96   :  { %757 = vst.msk [vmem:[#allocation2 + $0x188] sm:$0xff] %vm19_vm2, %v692_v5  ;;  %v891_v19 = vadd.f32 %v1426_v39, %v823_v16  ;;  %v776_v20 = vld [vmem:[#allocation2 + $0x8] sm:$0xff]  ;;  %v104_v49 = vld [vmem:[#allocation2 + $0xa0] sm:$0xff] }
  0x97   :  { %710 = vst.msk [vmem:[#allocation2 + $0x10] sm:$0xff] %vm19_vm2, %v645_v7  ;;  %v844_v21 = vadd.f32 %v1426_v39, %v776_v20 }
  0x98   :  { %726 = vst.msk [vmem:[#allocation2 + $0x90] sm:$0xff] %vm19_vm2, %v661_v8  ;;  %v792_v22 = vld [vmem:[#allocation2 + $0x88] sm:$0xff] }
  0x99   :  { %939 = vst.msk [vmem:[%s1847_s3 + $0x100] sm:$0xff] %vm19_vm2, %v875_v15  ;;  %v860_v23 = vadd.f32 %v1426_v39, %v792_v22  ;;  %v137_v22 = vld [vmem:[#allocation2 + $0x1a8] sm:$0xff] }
  0x9a   :  { %v568_v63 = vpop.f32.mrf.mxu2  ;;  %v608_v0 = vpop.f32.mrf.mxu3  ;;  %955 = vst.msk [vmem:[%s1847_s3 + $0x180] sm:$0xff] %vm19_vm2, %v891_v19  ;;  %v121_v19 = vld [vmem:[#allocation2 + $0x128] sm:$0xff] }
  0x9b   :  { %v490_v3 = vpop.f32.mrf.mxu0  ;;  %v530_v4 = vpop.f32.mrf.mxu1  ;;  %v677_v9 = vadd.f32 %v568_v63, %v118_v6  ;;  %908 = vst.msk [vmem:[%s1847_s3 + $0x8] sm:$0xff] %vm19_vm2, %v844_v21  ;;  %v693_v36 = vadd.f32 %v608_v0, %v134_v27 }
  0x9c   :  { %v808_v24 = vld [vmem:[#allocation2 + $0x108] sm:$0xff]  ;;  %924 = vst.msk [vmem:[%s1847_s3 + $0x88] sm:$0xff] %vm19_vm2, %v860_v23  ;;  %v646_v42 = vadd.f32 %v490_v3, %v87_v30  ;;  %v662_v46 = vadd.f32 %v530_v4, %v103_v33  ;;  %v138_v33 = vld [vmem:[#allocation2 + $0x1b0] sm:$0xff] }
  0x9d   :  { %742 = vst.msk [vmem:[#allocation2 + $0x110] sm:$0xff] %vm19_vm2, %v677_v9  ;;  %v876_v25 = vadd.f32 %v1426_v39, %v808_v24  ;;  %v824_v26 = vld [vmem:[#allocation2 + $0x188] sm:$0xff] }
  0x9e   :  { %v892_v28 = vadd.f32 %v1426_v39, %v824_v26  ;;  %v777_v29 = vld [vmem:[#allocation2 + $0x10] sm:$0xff]  ;;  %758 = vst.msk [vmem:[#allocation2 + $0x190] sm:$0xff] %vm19_vm2, %v693_v36 }
  0x9f   :  { %940 = vst.msk [vmem:[%s1847_s3 + $0x108] sm:$0xff] %vm19_vm2, %v876_v25  ;;  %v845_v31 = vadd.f32 %v1426_v39, %v777_v29  ;;  %v793_v32 = vld [vmem:[#allocation2 + $0x90] sm:$0xff] }
  0xa0   :  { %956 = vst.msk [vmem:[%s1847_s3 + $0x188] sm:$0xff] %vm19_vm2, %v892_v28  ;;  %v861_v34 = vadd.f32 %v1426_v39, %v793_v32  ;;  %v90_v26 = vld [vmem:[#allocation2 + $0x30] sm:$0xff] }
  0xa1   :  { %909 = vst.msk [vmem:[%s1847_s3 + $0x10] sm:$0xff] %vm19_vm2, %v845_v31  ;;  %v106_v29 = vld [vmem:[#allocation2 + $0xb0] sm:$0xff] }
  0xa2   :  { %v570_v13 = vpop.f32.mrf.mxu2  ;;  %v610_v14 = vpop.f32.mrf.mxu3  ;;  %925 = vst.msk [vmem:[%s1847_s3 + $0x90] sm:$0xff] %vm19_vm2, %v861_v34  ;;  %v122_v31 = vld [vmem:[#allocation2 + $0x130] sm:$0xff] }
  0xa3   :  { %v493_v17 = vpop.f32.mrf.mxu0  ;;  %v533_v18 = vpop.f32.mrf.mxu1  ;;  %v678_v48 = vadd.f32 %v570_v13, %v119_v37  ;;  %v694_v50 = vadd.f32 %v610_v14, %v135_v43  ;;  %711 = vst.msk [vmem:[#allocation2 + $0x18] sm:$0xff] %vm19_vm2, %v646_v42  ;;  %v105_v14 = vld [vmem:[#allocation2 + $0xa8] sm:$0xff] }
  0xa4   :  { %v809_v35 = vld [vmem:[#allocation2 + $0x110] sm:$0xff]  ;;  %v647_v52 = vadd.f32 %v493_v17, %v88_v47  ;;  %727 = vst.msk [vmem:[#allocation2 + $0x98] sm:$0xff] %vm19_vm2, %v662_v46  ;;  %v663_v54 = vadd.f32 %v533_v18, %v104_v49 }
  0xa5   :  { %v877_v41 = vadd.f32 %v1426_v39, %v809_v35  ;;  %743 = vst.msk [vmem:[#allocation2 + $0x118] sm:$0xff] %vm19_vm2, %v678_v48  ;;  %v825_v63 = vld [vmem:[#allocation2 + $0x190] sm:$0xff]  ;;  %v91_v35 = vld [vmem:[#allocation2 + $0x38] sm:$0xff] }
  0xa6   :  { %759 = vst.msk [vmem:[#allocation2 + $0x198] sm:$0xff] %vm19_vm2, %v694_v50  ;;  %v893_v0 = vadd.f32 %v1426_v39, %v825_v63 }
  0xa7   :  { %941 = vst.msk [vmem:[%s1847_s3 + $0x110] sm:$0xff] %vm19_vm2, %v877_v41 }
  0xa8   :  { %712 = vst.msk [vmem:[#allocation2 + $0x20] sm:$0xff] %vm19_vm2, %v647_v52 }
  0xa9   :  { %728 = vst.msk [vmem:[#allocation2 + $0xa0] sm:$0xff] %vm19_vm2, %v663_v54 }
  0xaa   :  { %v573_v38 = vpop.f32.mrf.mxu2  ;;  %v613_v40 = vpop.f32.mrf.mxu3  ;;  %v778_v1 = vld [vmem:[#allocation2 + $0x18] sm:$0xff]  ;;  %957 = vst.msk [vmem:[%s1847_s3 + $0x190] sm:$0xff] %vm19_vm2, %v893_v0 }
  0xab   :  { %v495_v44 = vpop.f32.mrf.mxu0  ;;  %v1515_v45 = vpop.f32.mrf.mxu1  ;;  %v679_v56 = vadd.f32 %v573_v38, %v120_v51  ;;  %v695_v57 = vadd.f32 %v613_v40, %v136_v53  ;;  %v846_v2 = vadd.f32 %v1426_v39, %v778_v1  ;;  %v794_v3 = vld [vmem:[#allocation2 + $0x98] sm:$0xff] }
  0xac   :  { %v648_v60 = vadd.f32 %v495_v44, %v89_v55  ;;  %v862_v4 = vadd.f32 %v1426_v39, %v794_v3  ;;  %v810_v5 = vld [vmem:[#allocation2 + $0x118] sm:$0xff]  ;;  %v664_v25 = vadd.f32 %v1515_v45, %v105_v14 }
  0xad   :  { %744 = vst.msk [vmem:[#allocation2 + $0x120] sm:$0xff] %vm19_vm2, %v679_v56  ;;  %v878_v6 = vadd.f32 %v1426_v39, %v810_v5  ;;  %v826_v7 = vld [vmem:[#allocation2 + $0x198] sm:$0xff] }
  0xae   :  { %760 = vst.msk [vmem:[#allocation2 + $0x1a0] sm:$0xff] %vm19_vm2, %v695_v57  ;;  %v894_v8 = vadd.f32 %v1426_v39, %v826_v7  ;;  %v107_v40 = vld [vmem:[#allocation2 + $0xb8] sm:$0xff]  ;;  %v108_v7 = vld [vmem:[#allocation2 + $0xc0] sm:$0xff] }
  0xaf   :  { %713 = vst.msk [vmem:[#allocation2 + $0x28] sm:$0xff] %vm19_vm2, %v648_v60  ;;  %v779_v9 = vld [vmem:[#allocation2 + $0x20] sm:$0xff]  ;;  %v123_v44 = vld [vmem:[#allocation2 + $0x138] sm:$0xff] }
  0xb0   :  { %910 = vst.msk [vmem:[%s1847_s3 + $0x18] sm:$0xff] %vm19_vm2, %v846_v2  ;;  %v847_v12 = vadd.f32 %v1426_v39, %v779_v9  ;;  %v795_v13 = vld [vmem:[#allocation2 + $0xa0] sm:$0xff]  ;;  %v139_v1 = vld [vmem:[#allocation2 + $0x1b8] sm:$0xff] }
  0xb1   :  { %926 = vst.msk [vmem:[%s1847_s3 + $0x98] sm:$0xff] %vm19_vm2, %v862_v4  ;;  %v863_v17 = vadd.f32 %v1426_v39, %v795_v13  ;;  %v92_v4 = vld [vmem:[#allocation2 + $0x40] sm:$0xff] }
  0xb2   :  { %v575_v58 = vpop.f32.mrf.mxu2  ;;  %v615_v59 = vpop.f32.mrf.mxu3  ;;  %942 = vst.msk [vmem:[%s1847_s3 + $0x118] sm:$0xff] %vm19_vm2, %v878_v6 }
  0xb3   :  { %v498_v61 = vpop.f32.mrf.mxu0  ;;  %v538_v62 = vpop.f32.mrf.mxu1  ;;  %958 = vst.msk [vmem:[%s1847_s3 + $0x198] sm:$0xff] %vm19_vm2, %v894_v8  ;;  %v680_v28 = vadd.f32 %v575_v58, %v121_v19  ;;  %v696_v30 = vadd.f32 %v615_v59, %v137_v22  ;;  %v93_v19 = vld [vmem:[#allocation2 + $0x48] sm:$0xff] }
  0xb4   :  { %v811_v18 = vld [vmem:[#allocation2 + $0x120] sm:$0xff]  ;;  %911 = vst.msk [vmem:[%s1847_s3 + $0x20] sm:$0xff] %vm19_vm2, %v847_v12  ;;  %v649_v32 = vadd.f32 %v498_v61, %v90_v26  ;;  %v665_v34 = vadd.f32 %v538_v62, %v106_v29 }
  0xb5   :  { %v879_v20 = vadd.f32 %v1426_v39, %v811_v18  ;;  %v827_v21 = vld [vmem:[#allocation2 + $0x1a0] sm:$0xff]  ;;  %927 = vst.msk [vmem:[%s1847_s3 + $0xa0] sm:$0xff] %vm19_vm2, %v863_v17 }
  0xb6   :  { %v895_v23 = vadd.f32 %v1426_v39, %v827_v21  ;;  %v780_v24 = vld [vmem:[#allocation2 + $0x28] sm:$0xff]  ;;  %729 = vst.msk [vmem:[#allocation2 + $0xa8] sm:$0xff] %vm19_vm2, %v664_v25 }
  0xb7   :  { %943 = vst.msk [vmem:[%s1847_s3 + $0x120] sm:$0xff] %vm19_vm2, %v879_v20  ;;  %v848_v27 = vadd.f32 %v1426_v39, %v780_v24  ;;  %v109_v21 = vld [vmem:[#allocation2 + $0xc8] sm:$0xff] }
  0xb8   :  { %959 = vst.msk [vmem:[%s1847_s3 + $0x1a0] sm:$0xff] %vm19_vm2, %v895_v23  ;;  %v125_v23 = vld [vmem:[#allocation2 + $0x148] sm:$0xff] }
  0xb9   :  { %912 = vst.msk [vmem:[%s1847_s3 + $0x28] sm:$0xff] %vm19_vm2, %v848_v27  ;;  %v141_v25 = vld [vmem:[#allocation2 + $0x1c8] sm:$0xff] }
  0xba   :  { %v578_v10 = vpop.f32.mrf.mxu2  ;;  %v618_v11 = vpop.f32.mrf.mxu3  ;;  %745 = vst.msk [vmem:[#allocation2 + $0x128] sm:$0xff] %vm19_vm2, %v680_v28  ;;  %v94_v28 = vld [vmem:[#allocation2 + $0x50] sm:$0xff] }
  0xbb   :  { %v500_v15 = vpop.f32.mrf.mxu0  ;;  %v540_v16 = vpop.f32.mrf.mxu1  ;;  %v681_v38 = vadd.f32 %v578_v10, %v122_v31  ;;  %761 = vst.msk [vmem:[#allocation2 + $0x1a8] sm:$0xff] %vm19_vm2, %v696_v30  ;;  %v697_v43 = vadd.f32 %v618_v11, %v138_v33  ;;  %v124_v11 = vld [vmem:[#allocation2 + $0x140] sm:$0xff] }
  0xbc   :  { %714 = vst.msk [vmem:[#allocation2 + $0x30] sm:$0xff] %vm19_vm2, %v649_v32  ;;  %v650_v45 = vadd.f32 %v500_v15, %v91_v35  ;;  %v666_v46 = vadd.f32 %v540_v16, %v107_v40  ;;  %v140_v16 = vld [vmem:[#allocation2 + $0x1c0] sm:$0xff] }
  0xbd   :  { %730 = vst.msk [vmem:[#allocation2 + $0xb0] sm:$0xff] %vm19_vm2, %v665_v34  ;;  %v796_v48 = vld [vmem:[#allocation2 + $0xa8] sm:$0xff] }
  0xbe   :  { %746 = vst.msk [vmem:[#allocation2 + $0x130] sm:$0xff] %vm19_vm2, %v681_v38  ;;  %v864_v49 = vadd.f32 %v1426_v39, %v796_v48 }
  0xbf   :  { %762 = vst.msk [vmem:[#allocation2 + $0x1b0] sm:$0xff] %vm19_vm2, %v697_v43 }
  0xc0   :  { %715 = vst.msk [vmem:[#allocation2 + $0x38] sm:$0xff] %vm19_vm2, %v650_v45 }
  0xc1   :  { %v812_v50 = vld [vmem:[#allocation2 + $0x128] sm:$0xff]  ;;  %731 = vst.msk [vmem:[#allocation2 + $0xb8] sm:$0xff] %vm19_vm2, %v666_v46 }
  0xc2   :  { %v580_v36 = vpop.f32.mrf.mxu2  ;;  %v620_v37 = vpop.f32.mrf.mxu3  ;;  %v880_v53 = vadd.f32 %v1426_v39, %v812_v50  ;;  %v828_v54 = vld [vmem:[#allocation2 + $0x1a8] sm:$0xff]  ;;  %928 = vst.msk [vmem:[%s1847_s3 + $0xa8] sm:$0xff] %vm19_vm2, %v864_v49 }
  0xc3   :  { %v503_v41 = vpop.f32.mrf.mxu0  ;;  %v543_v42 = vpop.f32.mrf.mxu1  ;;  %v682_v47 = vadd.f32 %v580_v36, %v123_v44  ;;  %v896_v56 = vadd.f32 %v1426_v39, %v828_v54  ;;  %v781_v57 = vld [vmem:[#allocation2 + $0x30] sm:$0xff]  ;;  %v698_v10 = vadd.f32 %v620_v37, %v139_v1 }
  0xc4   :  { %944 = vst.msk [vmem:[%s1847_s3 + $0x128] sm:$0xff] %vm19_vm2, %v880_v53  ;;  %v849_v58 = vadd.f32 %v1426_v39, %v781_v57  ;;  %v797_v59 = vld [vmem:[#allocation2 + $0xb0] sm:$0xff]  ;;  %v651_v15 = vadd.f32 %v503_v41, %v92_v4  ;;  %v667_v18 = vadd.f32 %v543_v42, %v108_v7  ;;  %v127_v4 = vld [vmem:[#allocation2 + $0x158] sm:$0xff] }
  0xc5   :  { %747 = vst.msk [vmem:[#allocation2 + $0x138] sm:$0xff] %vm19_vm2, %v682_v47  ;;  %v865_v61 = vadd.f32 %v1426_v39, %v797_v59  ;;  %v813_v62 = vld [vmem:[#allocation2 + $0x130] sm:$0xff] }
  0xc6   :  { %960 = vst.msk [vmem:[%s1847_s3 + $0x1a8] sm:$0xff] %vm19_vm2, %v896_v56  ;;  %v881_v63 = vadd.f32 %v1426_v39, %v813_v62  ;;  %v829_v0 = vld [vmem:[#allocation2 + $0x1b0] sm:$0xff] }
  0xc7   :  { %913 = vst.msk [vmem:[%s1847_s3 + $0x30] sm:$0xff] %vm19_vm2, %v849_v58  ;;  %v897_v2 = vadd.f32 %v1426_v39, %v829_v0  ;;  %v782_v3 = vld [vmem:[#allocation2 + $0x38] sm:$0xff]  ;;  %v126_v56 = vld [vmem:[#allocation2 + $0x150] sm:$0xff] }
  0xc8   :  { %929 = vst.msk [vmem:[%s1847_s3 + $0xb0] sm:$0xff] %vm19_vm2, %v865_v61  ;;  %v850_v5 = vadd.f32 %v1426_v39, %v782_v3  ;;  %v798_v6 = vld [vmem:[#allocation2 + $0xb8] sm:$0xff]  ;;  %v142_v59 = vld [vmem:[#allocation2 + $0x1d0] sm:$0xff] }
  0xc9   :  { %945 = vst.msk [vmem:[%s1847_s3 + $0x130] sm:$0xff] %vm19_vm2, %v881_v63  ;;  %v866_v8 = vadd.f32 %v1426_v39, %v798_v6  ;;  %v95_v63 = vld [vmem:[#allocation2 + $0x58] sm:$0xff] }
  0xca   :  { %v583_v51 = vpop.f32.mrf.mxu2  ;;  %v623_v52 = vpop.f32.mrf.mxu3  ;;  %961 = vst.msk [vmem:[%s1847_s3 + $0x1b0] sm:$0xff] %vm19_vm2, %v897_v2  ;;  %v111_v2 = vld [vmem:[#allocation2 + $0xd8] sm:$0xff] }
  0xcb   :  { %v505_v55 = vpop.f32.mrf.mxu0  ;;  %v545_v60 = vpop.f32.mrf.mxu1  ;;  %914 = vst.msk [vmem:[%s1847_s3 + $0x38] sm:$0xff] %vm19_vm2, %v850_v5  ;;  %v683_v20 = vadd.f32 %v583_v51, %v124_v11  ;;  %v699_v22 = vadd.f32 %v623_v52, %v140_v16  ;;  %v110_v52 = vld [vmem:[#allocation2 + $0xd0] sm:$0xff]  ;;  %v143_v6 = vld [vmem:[#allocation2 + $0x1d8] sm:$0xff]  ;;  %v112_v11 = vld [vmem:[#allocation2 + $0xe0] sm:$0xff] }
  0xcc   :  { %v814_v9 = vld [vmem:[#allocation2 + $0x138] sm:$0xff]  ;;  %930 = vst.msk [vmem:[%s1847_s3 + $0xb8] sm:$0xff] %vm19_vm2, %v866_v8  ;;  %v652_v24 = vadd.f32 %v505_v55, %v93_v19  ;;  %v668_v27 = vadd.f32 %v545_v60, %v109_v21  ;;  %v96_v8 = vld [vmem:[#allocation2 + $0x60] sm:$0xff] }
  0xcd   :  { %v882_v14 = vadd.f32 %v1426_v39, %v814_v9  ;;  %763 = vst.msk [vmem:[#allocation2 + $0x1b8] sm:$0xff] %vm19_vm2, %v698_v10 }
  0xce   :  { %716 = vst.msk [vmem:[#allocation2 + $0x40] sm:$0xff] %vm19_vm2, %v651_v15  ;;  %v128_v15 = vld [vmem:[#allocation2 + $0x160] sm:$0xff] }
  0xcf   :  { %946 = vst.msk [vmem:[%s1847_s3 + $0x138] sm:$0xff] %vm19_vm2, %v882_v14 }
  0xd0   :  { %732 = vst.msk [vmem:[#allocation2 + $0xc0] sm:$0xff] %vm19_vm2, %v667_v18 }
  0xd1   :  { %748 = vst.msk [vmem:[#allocation2 + $0x140] sm:$0xff] %vm19_vm2, %v683_v20 }
  0xd2   :  { %v585_v12 = vpop.f32.mrf.mxu2  ;;  %v625_v13 = vpop.f32.mrf.mxu3  ;;  %764 = vst.msk [vmem:[#allocation2 + $0x1c0] sm:$0xff] %vm19_vm2, %v699_v22 }
  0xd3   :  { %v508_v17 = vpop.f32.mrf.mxu0  ;;  %v548_v26 = vpop.f32.mrf.mxu1  ;;  %v684_v29 = vadd.f32 %v585_v12, %v125_v23  ;;  %v700_v30 = vadd.f32 %v625_v13, %v141_v25  ;;  %717 = vst.msk [vmem:[#allocation2 + $0x48] sm:$0xff] %vm19_vm2, %v652_v24 }
  0xd4   :  { %v653_v33 = vadd.f32 %v508_v17, %v94_v28  ;;  %733 = vst.msk [vmem:[#allocation2 + $0xc8] sm:$0xff] %vm19_vm2, %v668_v27  ;;  %v830_v35 = vld [vmem:[#allocation2 + $0x1b8] sm:$0xff]  ;;  %v669_v62 = vadd.f32 %v548_v26, %v110_v52 }
  0xd5   :  { %749 = vst.msk [vmem:[#allocation2 + $0x148] sm:$0xff] %vm19_vm2, %v684_v29  ;;  %v898_v36 = vadd.f32 %v1426_v39, %v830_v35  ;;  %v783_v37 = vld [vmem:[#allocation2 + $0x40] sm:$0xff] }
  0xd6   :  { %765 = vst.msk [vmem:[#allocation2 + $0x1c8] sm:$0xff] %vm19_vm2, %v700_v30  ;;  %v851_v38 = vadd.f32 %v1426_v39, %v783_v37  ;;  %v144_v37 = vld [vmem:[#allocation2 + $0x1e0] sm:$0xff] }
  0xd7   :  { %v799_v40 = vld [vmem:[#allocation2 + $0xc0] sm:$0xff]  ;;  %718 = vst.msk [vmem:[#allocation2 + $0x50] sm:$0xff] %vm19_vm2, %v653_v33 }
  0xd8   :  { %962 = vst.msk [vmem:[%s1847_s3 + $0x1b8] sm:$0xff] %vm19_vm2, %v898_v36  ;;  %v867_v41 = vadd.f32 %v1426_v39, %v799_v40  ;;  %v815_v42 = vld [vmem:[#allocation2 + $0x140] sm:$0xff] }
  0xd9   :  { %915 = vst.msk [vmem:[%s1847_s3 + $0x40] sm:$0xff] %vm19_vm2, %v851_v38  ;;  %v883_v43 = vadd.f32 %v1426_v39, %v815_v42  ;;  %v831_v44 = vld [vmem:[#allocation2 + $0x1c0] sm:$0xff] }
  0xda   :  { %v588_v31 = vpop.f32.mrf.mxu2  ;;  %v628_v32 = vpop.f32.mrf.mxu3  ;;  %931 = vst.msk [vmem:[%s1847_s3 + $0xc0] sm:$0xff] %vm19_vm2, %v867_v41  ;;  %v899_v46 = vadd.f32 %v1426_v39, %v831_v44  ;;  %v784_v47 = vld [vmem:[#allocation2 + $0x48] sm:$0xff] }
  0xdb   :  { %v510_v34 = vpop.f32.mrf.mxu0  ;;  %v550_v45 = vpop.f32.mrf.mxu1  ;;  %947 = vst.msk [vmem:[%s1847_s3 + $0x140] sm:$0xff] %vm19_vm2, %v883_v43  ;;  %v852_v50 = vadd.f32 %v1426_v39, %v784_v47  ;;  %v800_v51 = vld [vmem:[#allocation2 + $0xc8] sm:$0xff]  ;;  %v685_v1 = vadd.f32 %v588_v31, %v126_v56  ;;  %v701_v3 = vadd.f32 %v628_v32, %v142_v59 }
  0xdc   :  { %963 = vst.msk [vmem:[%s1847_s3 + $0x1c0] sm:$0xff] %vm19_vm2, %v899_v46  ;;  %v868_v54 = vadd.f32 %v1426_v39, %v800_v51  ;;  %v816_v55 = vld [vmem:[#allocation2 + $0x148] sm:$0xff]  ;;  %v654_v5 = vadd.f32 %v510_v34, %v95_v63  ;;  %v670_v7 = vadd.f32 %v550_v45, %v111_v2 }
  0xdd   :  { %916 = vst.msk [vmem:[%s1847_s3 + $0x48] sm:$0xff] %vm19_vm2, %v852_v50  ;;  %v884_v57 = vadd.f32 %v1426_v39, %v816_v55  ;;  %v832_v58 = vld [vmem:[#allocation2 + $0x1c8] sm:$0xff]  ;;  %v114_v55 = vld [vmem:[#allocation2 + $0xf0] sm:$0xff] }
  0xde   :  { %932 = vst.msk [vmem:[%s1847_s3 + $0xc8] sm:$0xff] %vm19_vm2, %v868_v54  ;;  %v900_v60 = vadd.f32 %v1426_v39, %v832_v58  ;;  %v785_v61 = vld [vmem:[#allocation2 + $0x50] sm:$0xff]  ;;  %v97_v41 = vld [vmem:[#allocation2 + $0x68] sm:$0xff] }
  0xdf   :  { %948 = vst.msk [vmem:[%s1847_s3 + $0x148] sm:$0xff] %vm19_vm2, %v884_v57  ;;  %v853_v0 = vadd.f32 %v1426_v39, %v785_v61  ;;  %v113_v44 = vld [vmem:[#allocation2 + $0xe8] sm:$0xff]  ;;  %v130_v57 = vld [vmem:[#allocation2 + $0x170] sm:$0xff] }
  0xe0   :  { %964 = vst.msk [vmem:[%s1847_s3 + $0x1c8] sm:$0xff] %vm19_vm2, %v900_v60  ;;  %v145_v51 = vld [vmem:[#allocation2 + $0x1e8] sm:$0xff]  ;;  %v146_v61 = vld [vmem:[#allocation2 + $0x1f0] sm:$0xff] }
  0xe1   :  { %917 = vst.msk [vmem:[%s1847_s3 + $0x50] sm:$0xff] %vm19_vm2, %v853_v0  ;;  %v99_v0 = vld [vmem:[#allocation2 + $0x78] sm:$0xff] }
  0xe2   :  { %v590_v48 = vpop.f32.mrf.mxu2  ;;  %v630_v49 = vpop.f32.mrf.mxu3  ;;  %734 = vst.msk [vmem:[#allocation2 + $0xd0] sm:$0xff] %vm19_vm2, %v669_v62 }
  0xe3   :  { %v513_v53 = vpop.f32.mrf.mxu0  ;;  %750 = vst.msk [vmem:[#allocation2 + $0x150] sm:$0xff] %vm19_vm2, %v685_v1  ;;  %v686_v10 = vadd.f32 %v590_v48, %v127_v4  ;;  %v553_v12 = vpop.f32.mrf.mxu1  ;;  %v702_v14 = vadd.f32 %v630_v49, %v143_v6  ;;  %v129_v48 = vld [vmem:[#allocation2 + $0x168] sm:$0xff] }
  0xe4   :  { %766 = vst.msk [vmem:[#allocation2 + $0x1d0] sm:$0xff] %vm19_vm2, %v701_v3  ;;  %v655_v17 = vadd.f32 %v513_v53, %v96_v8  ;;  %v671_v18 = vadd.f32 %v553_v12, %v112_v11  ;;  %v98_v53 = vld [vmem:[#allocation2 + $0x70] sm:$0xff] }
  0xe5   :  { %719 = vst.msk [vmem:[#allocation2 + $0x58] sm:$0xff] %vm19_vm2, %v654_v5 }
  0xe6   :  { %735 = vst.msk [vmem:[#allocation2 + $0xd8] sm:$0xff] %vm19_vm2, %v670_v7 }
  0xe7   :  { %751 = vst.msk [vmem:[#allocation2 + $0x158] sm:$0xff] %vm19_vm2, %v686_v10 }
  0xe8   :  { %767 = vst.msk [vmem:[#allocation2 + $0x1d8] sm:$0xff] %vm19_vm2, %v702_v14 }
  0xe9   :  { %v801_v20 = vld [vmem:[#allocation2 + $0xd0] sm:$0xff]  ;;  %720 = vst.msk [vmem:[#allocation2 + $0x60] sm:$0xff] %vm19_vm2, %v655_v17 }
  0xea   :  { %v593_v9 = vpop.f32.mrf.mxu2  ;;  %v633_v13 = vpop.f32.mrf.mxu3  ;;  %v869_v21 = vadd.f32 %v1426_v39, %v801_v20  ;;  %v817_v22 = vld [vmem:[#allocation2 + $0x150] sm:$0xff]  ;;  %736 = vst.msk [vmem:[#allocation2 + $0xe0] sm:$0xff] %vm19_vm2, %v671_v18  ;;  %v115_v18 = vld [vmem:[#allocation2 + $0xf8] sm:$0xff] }
  0xeb   :  { %v515_v16 = vpop.f32.mrf.mxu0  ;;  %v687_v19 = vadd.f32 %v593_v9, %v128_v15  ;;  %v885_v23 = vadd.f32 %v1426_v39, %v817_v22  ;;  %v833_v24 = vld [vmem:[#allocation2 + $0x1d0] sm:$0xff]  ;;  %v555_v30 = vpop.f32.mrf.mxu1  ;;  %v703_v47 = vadd.f32 %v633_v13, %v144_v37  ;;  %v131_v22 = vld [vmem:[#allocation2 + $0x178] sm:$0xff] }
  0xec   :  { %933 = vst.msk [vmem:[%s1847_s3 + $0xd0] sm:$0xff] %vm19_vm2, %v869_v21  ;;  %v901_v25 = vadd.f32 %v1426_v39, %v833_v24  ;;  %v786_v26 = vld [vmem:[#allocation2 + $0x58] sm:$0xff]  ;;  %v656_v50 = vadd.f32 %v515_v16, %v97_v41  ;;  %v672_v52 = vadd.f32 %v555_v30, %v113_v44 }
  0xed   :  { %752 = vst.msk [vmem:[#allocation2 + $0x160] sm:$0xff] %vm19_vm2, %v687_v19  ;;  %v854_v28 = vadd.f32 %v1426_v39, %v786_v26  ;;  %v802_v29 = vld [vmem:[#allocation2 + $0xd8] sm:$0xff] }
  0xee   :  { %949 = vst.msk [vmem:[%s1847_s3 + $0x150] sm:$0xff] %vm19_vm2, %v885_v23  ;;  %v870_v32 = vadd.f32 %v1426_v39, %v802_v29  ;;  %v818_v33 = vld [vmem:[#allocation2 + $0x158] sm:$0xff] }
  0xef   :  { %965 = vst.msk [vmem:[%s1847_s3 + $0x1d0] sm:$0xff] %vm19_vm2, %v901_v25  ;;  %v886_v35 = vadd.f32 %v1426_v39, %v818_v33  ;;  %v834_v36 = vld [vmem:[#allocation2 + $0x1d8] sm:$0xff] }
  0xf0   :  { %918 = vst.msk [vmem:[%s1847_s3 + $0x58] sm:$0xff] %vm19_vm2, %v854_v28  ;;  %v902_v38 = vadd.f32 %v1426_v39, %v834_v36  ;;  %v787_v40 = vld [vmem:[#allocation2 + $0x60] sm:$0xff]  ;;  %v147_v26 = vld [vmem:[#allocation2 + $0x1f8] sm:$0xff] }
  0xf1   :  { %934 = vst.msk [vmem:[%s1847_s3 + $0xd8] sm:$0xff] %vm19_vm2, %v870_v32  ;;  %v855_v42 = vadd.f32 %v1426_v39, %v787_v40  ;;  %v803_v43 = vld [vmem:[#allocation2 + $0xe0] sm:$0xff] }
  0xf2   :  { %v595_v27 = vpop.f32.mrf.mxu2  ;;  %v635_v31 = vpop.f32.mrf.mxu3  ;;  %950 = vst.msk [vmem:[%s1847_s3 + $0x158] sm:$0xff] %vm19_vm2, %v886_v35  ;;  %v871_v45 = vadd.f32 %v1426_v39, %v803_v43 }
  0xf3   :  { %v518_v34 = vpop.f32.mrf.mxu0  ;;  %966 = vst.msk [vmem:[%s1847_s3 + $0x1d8] sm:$0xff] %vm19_vm2, %v902_v38  ;;  %v688_v54 = vadd.f32 %v595_v27, %v129_v48  ;;  %v704_v56 = vadd.f32 %v635_v31, %v145_v51  ;;  %v558_v60 = vpop.f32.mrf.mxu1 }
  0xf4   :  { %v819_v46 = vld [vmem:[#allocation2 + $0x160] sm:$0xff]  ;;  %919 = vst.msk [vmem:[%s1847_s3 + $0x60] sm:$0xff] %vm19_vm2, %v855_v42  ;;  %v657_v59 = vadd.f32 %v518_v34, %v98_v53  ;;  %v673_v63 = vadd.f32 %v558_v60, %v114_v55 }
  0xf5   :  { %v887_v49 = vadd.f32 %v1426_v39, %v819_v46  ;;  %935 = vst.msk [vmem:[%s1847_s3 + $0xe0] sm:$0xff] %vm19_vm2, %v871_v45 }
  0xf6   :  { %768 = vst.msk [vmem:[#allocation2 + $0x1e0] sm:$0xff] %vm19_vm2, %v703_v47 }
  0xf7   :  { %951 = vst.msk [vmem:[%s1847_s3 + $0x160] sm:$0xff] %vm19_vm2, %v887_v49 }
  0xf8   :  { %721 = vst.msk [vmem:[#allocation2 + $0x68] sm:$0xff] %vm19_vm2, %v656_v50 }
  0xf9   :  { %737 = vst.msk [vmem:[#allocation2 + $0xe8] sm:$0xff] %vm19_vm2, %v672_v52 }
  0xfa   :  { %v598_v58 = vpop.f32.mrf.mxu2  ;;  %v638_v62 = vpop.f32.mrf.mxu3  ;;  %753 = vst.msk [vmem:[#allocation2 + $0x168] sm:$0xff] %vm19_vm2, %v688_v54 }
  0xfb   :  { %v520_v1 = vpop.f32.mrf.mxu0  ;;  %v689_v2 = vadd.f32 %v598_v58, %v130_v57  ;;  %769 = vst.msk [vmem:[#allocation2 + $0x1e8] sm:$0xff] %vm19_vm2, %v704_v56  ;;  %v705_v3 = vadd.f32 %v638_v62, %v146_v61  ;;  %v560_v19 = vpop.f32.mrf.mxu1 }
  0xfc   :  { %722 = vst.msk [vmem:[#allocation2 + $0x70] sm:$0xff] %vm19_vm2, %v657_v59  ;;  %v658_v4 = vadd.f32 %v520_v1, %v99_v0  ;;  %v674_v30 = vadd.f32 %v560_v19, %v115_v18 }
  0xfd   :  { %738 = vst.msk [vmem:[#allocation2 + $0xf0] sm:$0xff] %vm19_vm2, %v673_v63  ;;  %v835_v5 = vld [vmem:[#allocation2 + $0x1e0] sm:$0xff] }
  0xfe   :  { %754 = vst.msk [vmem:[#allocation2 + $0x170] sm:$0xff] %vm19_vm2, %v689_v2  ;;  %v903_v6 = vadd.f32 %v1426_v39, %v835_v5 }
  0xff   :  { %v788_v7 = vld [vmem:[#allocation2 + $0x68] sm:$0xff]  ;;  %770 = vst.msk [vmem:[#allocation2 + $0x1f0] sm:$0xff] %vm19_vm2, %v705_v3 }
 0x100   :  { %v856_v8 = vadd.f32 %v1426_v39, %v788_v7  ;;  %v804_v9 = vld [vmem:[#allocation2 + $0xe8] sm:$0xff]  ;;  %723 = vst.msk [vmem:[#allocation2 + $0x78] sm:$0xff] %vm19_vm2, %v658_v4 }
 0x101   :  { %967 = vst.msk [vmem:[%s1847_s3 + $0x1e0] sm:$0xff] %vm19_vm2, %v903_v6  ;;  %v872_v10 = vadd.f32 %v1426_v39, %v804_v9  ;;  %v820_v11 = vld [vmem:[#allocation2 + $0x168] sm:$0xff] }
 0x102   :  { %920 = vst.msk [vmem:[%s1847_s3 + $0x68] sm:$0xff] %vm19_vm2, %v856_v8  ;;  %v888_v12 = vadd.f32 %v1426_v39, %v820_v11  ;;  %v836_v13 = vld [vmem:[#allocation2 + $0x1e8] sm:$0xff]  ;;  %v600_v23 = vpop.f32.mrf.mxu2  ;;  %v640_v27 = vpop.f32.mrf.mxu3 }
 0x103   :  { %936 = vst.msk [vmem:[%s1847_s3 + $0xe8] sm:$0xff] %vm19_vm2, %v872_v10  ;;  %v904_v14 = vadd.f32 %v1426_v39, %v836_v13  ;;  %v789_v15 = vld [vmem:[#allocation2 + $0x70] sm:$0xff]  ;;  %v690_v32 = vadd.f32 %v600_v23, %v131_v22  ;;  %v706_v33 = vadd.f32 %v640_v27, %v147_v26 }
 0x104   :  { %952 = vst.msk [vmem:[%s1847_s3 + $0x168] sm:$0xff] %vm19_vm2, %v888_v12  ;;  %v857_v16 = vadd.f32 %v1426_v39, %v789_v15  ;;  %v805_v17 = vld [vmem:[#allocation2 + $0xf0] sm:$0xff] }
 0x105   :  { %968 = vst.msk [vmem:[%s1847_s3 + $0x1e8] sm:$0xff] %vm19_vm2, %v904_v14  ;;  %v873_v20 = vadd.f32 %v1426_v39, %v805_v17  ;;  %v821_v21 = vld [vmem:[#allocation2 + $0x170] sm:$0xff] }
 0x106   :  { %921 = vst.msk [vmem:[%s1847_s3 + $0x70] sm:$0xff] %vm19_vm2, %v857_v16  ;;  %v889_v24 = vadd.f32 %v1426_v39, %v821_v21  ;;  %v837_v25 = vld [vmem:[#allocation2 + $0x1f0] sm:$0xff] }
 0x107   :  { %937 = vst.msk [vmem:[%s1847_s3 + $0xf0] sm:$0xff] %vm19_vm2, %v873_v20  ;;  %v905_v28 = vadd.f32 %v1426_v39, %v837_v25  ;;  %v790_v29 = vld [vmem:[#allocation2 + $0x78] sm:$0xff] }
 0x108   :  { %953 = vst.msk [vmem:[%s1847_s3 + $0x170] sm:$0xff] %vm19_vm2, %v889_v24  ;;  %v858_v31 = vadd.f32 %v1426_v39, %v790_v29 }
 0x109   :  { %969 = vst.msk [vmem:[%s1847_s3 + $0x1f0] sm:$0xff] %vm19_vm2, %v905_v28 }
 0x10a   :  { %922 = vst.msk [vmem:[%s1847_s3 + $0x78] sm:$0xff] %vm19_vm2, %v858_v31 }
 0x10b   :  { %739 = vst.msk [vmem:[#allocation2 + $0xf8] sm:$0xff] %vm19_vm2, %v674_v30 }
 0x10c   :  { %755 = vst.msk [vmem:[#allocation2 + $0x178] sm:$0xff] %vm19_vm2, %v690_v32 }
 0x10d   :  { %771 = vst.msk [vmem:[#allocation2 + $0x1f8] sm:$0xff] %vm19_vm2, %v706_v33 }
 0x112   :  { %v806_v34 = vld [vmem:[#allocation2 + $0xf8] sm:$0xff] }
 0x113   :  { %v874_v35 = vadd.f32 %v1426_v39, %v806_v34  ;;  %v822_v36 = vld [vmem:[#allocation2 + $0x178] sm:$0xff] }
 0x114   :  { %v890_v37 = vadd.f32 %v1426_v39, %v822_v36  ;;  %v838_v38 = vld [vmem:[#allocation2 + $0x1f8] sm:$0xff] }
 0x115   :  { %938 = vst.msk [vmem:[%s1847_s3 + $0xf8] sm:$0xff] %vm19_vm2, %v874_v35  ;;  %v906_v40 = vadd.f32 %v1426_v39, %v838_v38 }
 0x116   :  { %954 = vst.msk [vmem:[%s1847_s3 + $0x178] sm:$0xff] %vm19_vm2, %v890_v37 }
 0x117   :  { %970 = vst.msk [vmem:[%s1847_s3 + $0x1f8] sm:$0xff] %vm19_vm2, %v906_v40 }

// kernel: residual_block_forward.5
= control target key start
LH: loop header
LB: loop body
LE: loop exit
PB: predicated region body
PF: predicated region fallthrough
CT: control target
= control target key end

     0   :  { %vm508_vm0 = vcmask 1043456   ;;  %vm411_vm1 = vcmask 588800   ;;  %vm22_vm2 = vcmask 64512   ;;  %v1563_v32 = vmov 0.0   ;;  %s2514_s1 = inlined_call_operand.vmem [shape: bf16[72,8], index: 1, kind: input, shape index: {}]   ;;  %s2515_s2 = inlined_call_operand.vmem [shape: f32[1,8], index: 2, kind: input, shape index: {}]   ;;  %s2516_s0 = inlined_call_operand.vmem [shape: bf16[512,72], index: 0, kind: input, shape index: {}]   ;;  %s2517_s3 = inlined_call_operand.vmem [shape: f32[512,8], index: 3, kind: input, shape index: {}]   ;;  %s2518_s4 = inlined_call_operand.vmem [shape: f32[512,8], index: 4, kind: output, shape index: {}]  }
   0x1   :  { %v223_v0 = vld [vmem:[%s2514_s1 + $0x20] sm:$0xf]  ;;  %v1544_v4 = vld [vmem:[%s2514_s1 + $0x18] sm:$0xff]  ;;  %v1543_v5 = vld [vmem:[%s2514_s1 + $0x10] sm:$0xff]  ;;  %23 = vst.msk [vmem:[#allocation2] sm:$0xff] %vm22_vm2, %v1563_v32 }
   0x2   :  { %v401_v1 = vunpack.c.l.b16 %v223_v0  ;;  %v1542_v6 = vld [vmem:[%s2514_s1 + $0x8] sm:$0xff]  ;;  %v1541_v7 = vld [vmem:[%s2514_s1] sm:$0xff]  ;;  %v1511_v16 = vld [vmem:[%s2516_s0 + $0x10] sm:$0xff]  ;;  %24 = vst.msk [vmem:[#allocation2 + $0x8] sm:$0xff] %vm22_vm2, %v1563_v32 }
   0x3   :  { %v1509_v8 = vld [vmem:[%s2516_s0] sm:$0xff]  ;;  %v1510_v12 = vld [vmem:[%s2516_s0 + $0x8] sm:$0xff]  ;;  %v1519_v17 = vld [vmem:[%s2516_s0 + $0x50] sm:$0xff]  ;;  %25 = vst.msk [vmem:[#allocation2 + $0x10] sm:$0xff] %vm22_vm2, %v1563_v32 }
   0x4   :  { %v406_v2 = vpack.c.b16 %v401_v1, %v401_v1  ;;  %v1517_v9 = vld [vmem:[%s2516_s0 + $0x40] sm:$0xff]  ;;  %v1518_v13 = vld [vmem:[%s2516_s0 + $0x48] sm:$0xff]  ;;  %v1527_v18 = vld [vmem:[%s2516_s0 + $0x90] sm:$0xff]  ;;  %26 = vst.msk [vmem:[#allocation2 + $0x18] sm:$0xff] %vm22_vm2, %v1563_v32 }
   0x5   :  { %v1525_v10 = vld [vmem:[%s2516_s0 + $0x80] sm:$0xff]  ;;  %v1526_v14 = vld [vmem:[%s2516_s0 + $0x88] sm:$0xff]  ;;  %v1535_v19 = vld [vmem:[%s2516_s0 + $0xd0] sm:$0xff]  ;;  %27 = vst.msk [vmem:[#allocation2 + $0x20] sm:$0xff] %vm22_vm2, %v1563_v32 }
   0x6   :  { %v510_v3 = vsel %vm508_vm0, %v406_v2, 0  ;;  %v1533_v11 = vld [vmem:[%s2516_s0 + $0xc0] sm:$0xff]  ;;  %v1534_v15 = vld [vmem:[%s2516_s0 + $0xc8] sm:$0xff]  ;;  %v1512_v20 = vld [vmem:[%s2516_s0 + $0x18] sm:$0xff]  ;;  %28 = vst.msk [vmem:[#allocation2 + $0x28] sm:$0xff] %vm22_vm2, %v1563_v32 }
   0x7   :  { %515 = vmatpush.bf16.msra.mxu0 %v510_v3  ;;  %1545 = vmatpush.bf16.msra.mxu1 %v510_v3  ;;  %v1520_v21 = vld [vmem:[%s2516_s0 + $0x58] sm:$0xff]  ;;  %v1513_v24 = vld [vmem:[%s2516_s0 + $0x20] sm:$0xff]  ;;  %v1514_v28 = vld [vmem:[%s2516_s0 + $0x28] sm:$0xff]  ;;  %29 = vst.msk [vmem:[#allocation2 + $0x30] sm:$0xff] %vm22_vm2, %v1563_v32 }
   0x8   :  { %1546 = vmatpush.bf16.msra.mxu2 %v510_v3  ;;  %1547 = vmatpush.bf16.msra.mxu3 %v510_v3  ;;  %v1528_v22 = vld [vmem:[%s2516_s0 + $0x98] sm:$0xff]  ;;  %v1521_v25 = vld [vmem:[%s2516_s0 + $0x60] sm:$0xff]  ;;  %v1522_v29 = vld [vmem:[%s2516_s0 + $0x68] sm:$0xff]  ;;  %30 = vst.msk [vmem:[#allocation2 + $0x38] sm:$0xff] %vm22_vm2, %v1563_v32 }
   0x9   :  { %v1536_v23 = vld [vmem:[%s2516_s0 + $0xd8] sm:$0xff]  ;;  %v1529_v26 = vld [vmem:[%s2516_s0 + $0xa0] sm:$0xff]  ;;  %v1530_v30 = vld [vmem:[%s2516_s0 + $0xa8] sm:$0xff]  ;;  %31 = vst.msk [vmem:[#allocation2 + $0x40] sm:$0xff] %vm22_vm2, %v1563_v32 }
   0xa   :  { %v1537_v27 = vld [vmem:[%s2516_s0 + $0xe0] sm:$0xff]  ;;  %v1538_v31 = vld [vmem:[%s2516_s0 + $0xe8] sm:$0xff]  ;;  %32 = vst.msk [vmem:[#allocation2 + $0x48] sm:$0xff] %vm22_vm2, %v1563_v32  ;;  %v1515_v33 = vld [vmem:[%s2516_s0 + $0x30] sm:$0xff] }
   0xb   :  { %516 = vmatpush.bf16.msra.mxu0 %v1544_v4  ;;  %1548 = vmatpush.bf16.msra.mxu1 %v1544_v4  ;;  %v1523_v34 = vld [vmem:[%s2516_s0 + $0x70] sm:$0xff]  ;;  %33 = vst.msk [vmem:[#allocation2 + $0x50] sm:$0xff] %vm22_vm2, %v1563_v32  ;;  %v1516_v37 = vld [vmem:[%s2516_s0 + $0x38] sm:$0xff]  ;;  %v87_v41 = vld [vmem:[#allocation2] sm:$0xff] }
   0xc   :  { %1549 = vmatpush.bf16.msra.mxu2 %v1544_v4  ;;  %1550 = vmatpush.bf16.msra.mxu3 %v1544_v4  ;;  %v1531_v35 = vld [vmem:[%s2516_s0 + $0xb0] sm:$0xff]  ;;  %34 = vst.msk [vmem:[#allocation2 + $0x58] sm:$0xff] %vm22_vm2, %v1563_v32  ;;  %v1524_v38 = vld [vmem:[%s2516_s0 + $0x78] sm:$0xff]  ;;  %v1834_v45 = vld [vmem:[%s2515_s2] ss:$0 sm:$0xff] }
   0xd   :  { %v1539_v36 = vld [vmem:[%s2516_s0 + $0xf0] sm:$0xff]  ;;  %35 = vst.msk [vmem:[#allocation2 + $0x60] sm:$0xff] %vm22_vm2, %v1563_v32  ;;  %v1532_v39 = vld [vmem:[%s2516_s0 + $0xb8] sm:$0xff]  ;;  %v1137_v53 = vld [vmem:[%s2517_s3] sm:$0xff] }
   0xe   :  { %36 = vst.msk [vmem:[#allocation2 + $0x68] sm:$0xff] %vm22_vm2, %v1563_v32  ;;  %v1540_v40 = vld [vmem:[%s2516_s0 + $0xf8] sm:$0xff]  ;;  %v88_v0 = vld [vmem:[#allocation2 + $0x8] sm:$0xff] }
   0xf   :  { %517 = vmatpush.bf16.msra.mxu0 %v1543_v5  ;;  %1551 = vmatpush.bf16.msra.mxu1 %v1543_v5  ;;  %37 = vst.msk [vmem:[#allocation2 + $0x70] sm:$0xff] %vm22_vm2, %v1563_v32 }
  0x10   :  { %1552 = vmatpush.bf16.msra.mxu2 %v1543_v5  ;;  %1553 = vmatpush.bf16.msra.mxu3 %v1543_v5  ;;  %38 = vst.msk [vmem:[#allocation2 + $0x78] sm:$0xff] %vm22_vm2, %v1563_v32 }
  0x11   :  { %39 = vst.msk [vmem:[#allocation2 + $0x80] sm:$0xff] %vm22_vm2, %v1563_v32 }
  0x12   :  { %40 = vst.msk [vmem:[#allocation2 + $0x88] sm:$0xff] %vm22_vm2, %v1563_v32 }
  0x13   :  { %518 = vmatpush.bf16.msra.mxu0 %v1542_v6  ;;  %1554 = vmatpush.bf16.msra.mxu1 %v1542_v6  ;;  %41 = vst.msk [vmem:[#allocation2 + $0x90] sm:$0xff] %vm22_vm2, %v1563_v32 }
  0x14   :  { %1555 = vmatpush.bf16.msra.mxu2 %v1542_v6  ;;  %1556 = vmatpush.bf16.msra.mxu3 %v1542_v6  ;;  %42 = vst.msk [vmem:[#allocation2 + $0x98] sm:$0xff] %vm22_vm2, %v1563_v32 }
  0x15   :  { %43 = vst.msk [vmem:[#allocation2 + $0xa0] sm:$0xff] %vm22_vm2, %v1563_v32 }
  0x16   :  { %44 = vst.msk [vmem:[#allocation2 + $0xa8] sm:$0xff] %vm22_vm2, %v1563_v32 }
  0x17   :  { %519 = vmatpush.bf16.msra.mxu0 %v1541_v7  ;;  %1557 = vmatpush.bf16.msra.mxu1 %v1541_v7  ;;  %45 = vst.msk [vmem:[#allocation2 + $0xb0] sm:$0xff] %vm22_vm2, %v1563_v32 }
  0x18   :  { %1558 = vmatpush.bf16.msra.mxu2 %v1541_v7  ;;  %1559 = vmatpush.bf16.msra.mxu3 %v1541_v7  ;;  %46 = vst.msk [vmem:[#allocation2 + $0xb8] sm:$0xff] %vm22_vm2, %v1563_v32  ;;  %v103_v58 = vld [vmem:[#allocation2 + $0x80] sm:$0xff] }
  0x19   :  { %47 = vst.msk [vmem:[#allocation2 + $0xc0] sm:$0xff] %vm22_vm2, %v1563_v32  ;;  %v104_v2 = vld [vmem:[#allocation2 + $0x88] sm:$0xff] }
  0x1a   :  { %1477 = vmatmul.msk.bf16.vlgmr.msra.gmra.mxu0 %vm411_vm1, %v1509_v8  ;;  %1485 = vmatmul.msk.bf16.vlgmr.msra.gmra.mxu1 %vm411_vm1, %v1517_v9  ;;  %48 = vst.msk [vmem:[#allocation2 + $0xc8] sm:$0xff] %vm22_vm2, %v1563_v32  ;;  %v89_v8 = vld [vmem:[#allocation2 + $0x10] sm:$0xff] }
  0x1b   :  { %1493 = vmatmul.msk.bf16.vlgmr.msra.gmra.mxu2 %vm411_vm1, %v1525_v10  ;;  %1501 = vmatmul.msk.bf16.vlgmr.msra.gmra.mxu3 %vm411_vm1, %v1533_v11  ;;  %49 = vst.msk [vmem:[#allocation2 + $0xd0] sm:$0xff] %vm22_vm2, %v1563_v32 }
  0x1c   :  { %50 = vst.msk [vmem:[#allocation2 + $0xd8] sm:$0xff] %vm22_vm2, %v1563_v32 }
  0x1d   :  { %51 = vst.msk [vmem:[#allocation2 + $0xe0] sm:$0xff] %vm22_vm2, %v1563_v32 }
  0x1e   :  { %52 = vst.msk [vmem:[#allocation2 + $0xe8] sm:$0xff] %vm22_vm2, %v1563_v32 }
  0x1f   :  { %53 = vst.msk [vmem:[#allocation2 + $0xf0] sm:$0xff] %vm22_vm2, %v1563_v32 }
  0x20   :  { %54 = vst.msk [vmem:[#allocation2 + $0xf8] sm:$0xff] %vm22_vm2, %v1563_v32 }
  0x21   :  { %55 = vst.msk [vmem:[#allocation2 + $0x100] sm:$0xff] %vm22_vm2, %v1563_v32 }
  0x22   :  { %56 = vst.msk [vmem:[#allocation2 + $0x108] sm:$0xff] %vm22_vm2, %v1563_v32 }
  0x23   :  { %57 = vst.msk [vmem:[#allocation2 + $0x110] sm:$0xff] %vm22_vm2, %v1563_v32 }
  0x24   :  { %58 = vst.msk [vmem:[#allocation2 + $0x118] sm:$0xff] %vm22_vm2, %v1563_v32 }
  0x25   :  { %59 = vst.msk [vmem:[#allocation2 + $0x120] sm:$0xff] %vm22_vm2, %v1563_v32 }
  0x26   :  { %60 = vst.msk [vmem:[#allocation2 + $0x128] sm:$0xff] %vm22_vm2, %v1563_v32 }
  0x27   :  { %61 = vst.msk [vmem:[#allocation2 + $0x130] sm:$0xff] %vm22_vm2, %v1563_v32 }
  0x28   :  { %62 = vst.msk [vmem:[#allocation2 + $0x138] sm:$0xff] %vm22_vm2, %v1563_v32  ;;  %v119_v61 = vld [vmem:[#allocation2 + $0x100] sm:$0xff] }
  0x29   :  { %63 = vst.msk [vmem:[#allocation2 + $0x140] sm:$0xff] %vm22_vm2, %v1563_v32  ;;  %v120_v4 = vld [vmem:[#allocation2 + $0x108] sm:$0xff] }
  0x2a   :  { %1478 = vmatmul.msk.bf16.gmra.mxu0 %vm411_vm1, %v1510_v12  ;;  %1486 = vmatmul.msk.bf16.gmra.mxu1 %vm411_vm1, %v1518_v13  ;;  %64 = vst.msk [vmem:[#allocation2 + $0x148] sm:$0xff] %vm22_vm2, %v1563_v32  ;;  %v105_v12 = vld [vmem:[#allocation2 + $0x90] sm:$0xff] }
  0x2b   :  { %1494 = vmatmul.msk.bf16.gmra.mxu2 %vm411_vm1, %v1526_v14  ;;  %1502 = vmatmul.msk.bf16.gmra.mxu3 %vm411_vm1, %v1534_v15  ;;  %65 = vst.msk [vmem:[#allocation2 + $0x150] sm:$0xff] %vm22_vm2, %v1563_v32 }
  0x2c   :  { %66 = vst.msk [vmem:[#allocation2 + $0x158] sm:$0xff] %vm22_vm2, %v1563_v32 }
  0x2d   :  { %67 = vst.msk [vmem:[#allocation2 + $0x160] sm:$0xff] %vm22_vm2, %v1563_v32 }
  0x2e   :  { %68 = vst.msk [vmem:[#allocation2 + $0x168] sm:$0xff] %vm22_vm2, %v1563_v32 }
  0x2f   :  { %69 = vst.msk [vmem:[#allocation2 + $0x170] sm:$0xff] %vm22_vm2, %v1563_v32 }
  0x30   :  { %70 = vst.msk [vmem:[#allocation2 + $0x178] sm:$0xff] %vm22_vm2, %v1563_v32 }
  0x31   :  { %71 = vst.msk [vmem:[#allocation2 + $0x180] sm:$0xff] %vm22_vm2, %v1563_v32 }
  0x32   :  { %72 = vst.msk [vmem:[#allocation2 + $0x188] sm:$0xff] %vm22_vm2, %v1563_v32 }
  0x33   :  { %73 = vst.msk [vmem:[#allocation2 + $0x190] sm:$0xff] %vm22_vm2, %v1563_v32 }
  0x34   :  { %74 = vst.msk [vmem:[#allocation2 + $0x198] sm:$0xff] %vm22_vm2, %v1563_v32 }
  0x35   :  { %75 = vst.msk [vmem:[#allocation2 + $0x1a0] sm:$0xff] %vm22_vm2, %v1563_v32 }
  0x36   :  { %76 = vst.msk [vmem:[#allocation2 + $0x1a8] sm:$0xff] %vm22_vm2, %v1563_v32 }
  0x37   :  { %77 = vst.msk [vmem:[#allocation2 + $0x1b0] sm:$0xff] %vm22_vm2, %v1563_v32 }
  0x38   :  { %78 = vst.msk [vmem:[#allocation2 + $0x1b8] sm:$0xff] %vm22_vm2, %v1563_v32  ;;  %v135_v62 = vld [vmem:[#allocation2 + $0x180] sm:$0xff] }
  0x39   :  { %79 = vst.msk [vmem:[#allocation2 + $0x1c0] sm:$0xff] %vm22_vm2, %v1563_v32  ;;  %v136_v6 = vld [vmem:[#allocation2 + $0x188] sm:$0xff] }
  0x3a   :  { %1479 = vmatmul.msk.bf16.gmra.mxu0 %vm411_vm1, %v1511_v16  ;;  %1487 = vmatmul.msk.bf16.gmra.mxu1 %vm411_vm1, %v1519_v17  ;;  %80 = vst.msk [vmem:[#allocation2 + $0x1c8] sm:$0xff] %vm22_vm2, %v1563_v32  ;;  %v121_v16 = vld [vmem:[#allocation2 + $0x110] sm:$0xff] }
  0x3b   :  { %1495 = vmatmul.msk.bf16.gmra.mxu2 %vm411_vm1, %v1527_v18  ;;  %1503 = vmatmul.msk.bf16.gmra.mxu3 %vm411_vm1, %v1535_v19  ;;  %81 = vst.msk [vmem:[#allocation2 + $0x1d0] sm:$0xff] %vm22_vm2, %v1563_v32  ;;  %v137_v18 = vld [vmem:[#allocation2 + $0x190] sm:$0xff] }
  0x3c   :  { %82 = vst.msk [vmem:[#allocation2 + $0x1d8] sm:$0xff] %vm22_vm2, %v1563_v32 }
  0x3d   :  { %83 = vst.msk [vmem:[#allocation2 + $0x1e0] sm:$0xff] %vm22_vm2, %v1563_v32 }
  0x3e   :  { %84 = vst.msk [vmem:[#allocation2 + $0x1e8] sm:$0xff] %vm22_vm2, %v1563_v32 }
  0x3f   :  { %85 = vst.msk [vmem:[#allocation2 + $0x1f0] sm:$0xff] %vm22_vm2, %v1563_v32 }
  0x40   :  { %86 = vst.msk [vmem:[#allocation2 + $0x1f8] sm:$0xff] %vm22_vm2, %v1563_v32 }
  0x4a   :  { %1480 = vmatmul.msk.bf16.gmra.mxu0 %vm411_vm1, %v1512_v20  ;;  %1488 = vmatmul.msk.bf16.gmra.mxu1 %vm411_vm1, %v1520_v21  ;;  %v90_v20 = vld [vmem:[#allocation2 + $0x18] sm:$0xff] }
  0x4b   :  { %1496 = vmatmul.msk.bf16.gmra.mxu2 %vm411_vm1, %v1528_v22  ;;  %1504 = vmatmul.msk.bf16.gmra.mxu3 %vm411_vm1, %v1536_v23  ;;  %v106_v22 = vld [vmem:[#allocation2 + $0x98] sm:$0xff] }
  0x5a   :  { %1481 = vmatmul.msk.bf16.gmra.mxu0 %vm411_vm1, %v1513_v24  ;;  %1489 = vmatmul.msk.bf16.gmra.mxu1 %vm411_vm1, %v1521_v25  ;;  %v122_v24 = vld [vmem:[#allocation2 + $0x118] sm:$0xff] }
  0x5b   :  { %1497 = vmatmul.msk.bf16.gmra.mxu2 %vm411_vm1, %v1529_v26  ;;  %1505 = vmatmul.msk.bf16.gmra.mxu3 %vm411_vm1, %v1537_v27  ;;  %v138_v25 = vld [vmem:[#allocation2 + $0x198] sm:$0xff] }
  0x6a   :  { %1482 = vmatmul.msk.bf16.gmra.mxu0 %vm411_vm1, %v1514_v28  ;;  %1490 = vmatmul.msk.bf16.gmra.mxu1 %vm411_vm1, %v1522_v29  ;;  %v91_v28 = vld [vmem:[#allocation2 + $0x20] sm:$0xff] }
  0x6b   :  { %1498 = vmatmul.msk.bf16.gmra.mxu2 %vm411_vm1, %v1530_v30  ;;  %1506 = vmatmul.msk.bf16.gmra.mxu3 %vm411_vm1, %v1538_v31 }
  0x7a   :  { %1483 = vmatmul.msk.bf16.gmra.mxu0 %vm411_vm1, %v1515_v33  ;;  %1491 = vmatmul.msk.bf16.gmra.mxu1 %vm411_vm1, %v1523_v34  ;;  %v107_v34 = vld [vmem:[#allocation2 + $0xa0] sm:$0xff] }
  0x7b   :  { %1499 = vmatmul.msk.bf16.gmra.mxu2 %vm411_vm1, %v1531_v35  ;;  %1507 = vmatmul.msk.bf16.gmra.mxu3 %vm411_vm1, %v1539_v36 }
  0x8a   :  { %1484 = vmatmul.msk.bf16.gmra.mxu0 %vm411_vm1, %v1516_v37  ;;  %1492 = vmatmul.msk.bf16.gmra.mxu1 %vm411_vm1, %v1524_v38 }
  0x8b   :  { %1500 = vmatmul.msk.bf16.gmra.mxu2 %vm411_vm1, %v1532_v39  ;;  %1508 = vmatmul.msk.bf16.gmra.mxu3 %vm411_vm1, %v1540_v40 }
  0x97   :  { %v521_v42 = vpop.f32.mrf.mxu0  ;;  %v561_v43 = vpop.f32.mrf.mxu1 }
  0x98   :  { %v681_v44 = vadd.f32 %v521_v42, %v87_v41  ;;  %v697_v63 = vadd.f32 %v561_v43, %v103_v58  ;;  %v1153_v42 = vld [vmem:[%s2517_s3 + $0x80] sm:$0xff] }
  0x9a   :  { %746 = vst.msk [vmem:[#allocation2] sm:$0xff] %vm22_vm2, %v681_v44 }
  0x9b   :  { %762 = vst.msk [vmem:[#allocation2 + $0x80] sm:$0xff] %vm22_vm2, %v697_v63 }
  0x9e   :  { %v601_v46 = vpop.f32.mrf.mxu2  ;;  %v641_v47 = vpop.f32.mrf.mxu3 }
  0x9f   :  { %v523_v48 = vpop.f32.mrf.mxu0  ;;  %v563_v49 = vpop.f32.mrf.mxu1  ;;  %v713_v1 = vadd.f32 %v601_v46, %v119_v61  ;;  %v729_v3 = vadd.f32 %v641_v47, %v135_v62 }
  0xa0   :  { %v682_v5 = vadd.f32 %v523_v48, %v88_v0  ;;  %v698_v7 = vadd.f32 %v563_v49, %v104_v2  ;;  %v1169_v48 = vld [vmem:[%s2517_s3 + $0x100] sm:$0xff] }
  0xa1   :  { %v813_v50 = vld [vmem:[#allocation2] sm:$0xff]  ;;  %778 = vst.msk [vmem:[#allocation2 + $0x100] sm:$0xff] %vm22_vm2, %v713_v1  ;;  %v1154_v1 = vld [vmem:[%s2517_s3 + $0x88] sm:$0xff] }
  0xa2   :  { %v881_v51 = vadd.f32 %v1834_v45, %v813_v50  ;;  %794 = vst.msk [vmem:[#allocation2 + $0x180] sm:$0xff] %vm22_vm2, %v729_v3  ;;  %v829_v26 = vld [vmem:[#allocation2 + $0x80] sm:$0xff] }
  0xa3   :  { %747 = vst.msk [vmem:[#allocation2 + $0x8] sm:$0xff] %vm22_vm2, %v682_v5  ;;  %v897_v29 = vadd.f32 %v1834_v45, %v829_v26 }
  0xa4   :  { %vm945_vm3 = vcmp.ge.f32.partialorder %v881_v51, 0.0  ;;  %v1009_v52 = vmul.f32 0.01, %v881_v51  ;;  %763 = vst.msk [vmem:[#allocation2 + $0x88] sm:$0xff] %vm22_vm2, %v698_v7 }
  0xa5   :  { %vm961_vm4 = vcmp.ge.f32.partialorder %v897_v29, 0.0  ;;  %v1025_v41 = vmul.f32 0.01, %v897_v29 }
  0xa6   :  { %v1073_v54 = vsel %vm945_vm3, %v881_v51, %v1009_v52  ;;  %v603_v55 = vpop.f32.mrf.mxu2  ;;  %v643_v56 = vpop.f32.mrf.mxu3 }
  0xa7   :  { %v1201_v57 = vadd.f32 %v1137_v53, %v1073_v54  ;;  %v526_v59 = vpop.f32.mrf.mxu0  ;;  %v566_v60 = vpop.f32.mrf.mxu1  ;;  %v714_v11 = vadd.f32 %v603_v55, %v120_v4  ;;  %v730_v15 = vadd.f32 %v643_v56, %v136_v6  ;;  %v1089_v52 = vsel %vm961_vm4, %v897_v29, %v1025_v41  ;;  %v1185_v54 = vld [vmem:[%s2517_s3 + $0x180] sm:$0xff]  ;;  %v1170_v6 = vld [vmem:[%s2517_s3 + $0x108] sm:$0xff] }
  0xa8   :  { %v683_v17 = vadd.f32 %v526_v59, %v89_v8  ;;  %v699_v19 = vadd.f32 %v566_v60, %v105_v12  ;;  %v845_v30 = vld [vmem:[#allocation2 + $0x100] sm:$0xff]  ;;  %v1138_v60 = vld [vmem:[%s2517_s3 + $0x8] sm:$0xff] }
  0xa9   :  { %1265 = vst.msk [vmem:[%s2518_s4] sm:$0xff] %vm22_vm2, %v1201_v57  ;;  %v913_v35 = vadd.f32 %v1834_v45, %v845_v30  ;;  %v861_v36 = vld [vmem:[#allocation2 + $0x180] sm:$0xff]  ;;  %v1217_v57 = vadd.f32 %v1153_v42, %v1089_v52 }
  0xaa   :  { %779 = vst.msk [vmem:[#allocation2 + $0x108] sm:$0xff] %vm22_vm2, %v714_v11  ;;  %v929_v43 = vadd.f32 %v1834_v45, %v861_v36  ;;  %v814_v44 = vld [vmem:[#allocation2 + $0x8] sm:$0xff] }
  0xab   :  { %795 = vst.msk [vmem:[#allocation2 + $0x188] sm:$0xff] %vm22_vm2, %v730_v15  ;;  %vm977_vm5 = vcmp.ge.f32.partialorder %v913_v35, 0.0  ;;  %v1041_v47 = vmul.f32 0.01, %v913_v35  ;;  %v882_v49 = vadd.f32 %v1834_v45, %v814_v44  ;;  %v830_v50 = vld [vmem:[#allocation2 + $0x88] sm:$0xff]  ;;  %v1187_v44 = vld [vmem:[%s2517_s3 + $0x190] sm:$0xff] }
  0xac   :  { %748 = vst.msk [vmem:[#allocation2 + $0x10] sm:$0xff] %vm22_vm2, %v683_v17  ;;  %vm993_vm6 = vcmp.ge.f32.partialorder %v929_v43, 0.0  ;;  %v1057_v53 = vmul.f32 0.01, %v929_v43  ;;  %v898_v55 = vadd.f32 %v1834_v45, %v830_v50  ;;  %v1186_v11 = vld [vmem:[%s2517_s3 + $0x188] sm:$0xff]  ;;  %v1156_v50 = vld [vmem:[%s2517_s3 + $0x98] sm:$0xff] }
  0xad   :  { %764 = vst.msk [vmem:[#allocation2 + $0x90] sm:$0xff] %vm22_vm2, %v699_v19  ;;  %v1105_v58 = vsel %vm977_vm5, %v913_v35, %v1041_v47  ;;  %vm946_vm7 = vcmp.ge.f32.partialorder %v882_v49, 0.0  ;;  %v1010_v59 = vmul.f32 0.01, %v882_v49 }
  0xae   :  { %v606_v9 = vpop.f32.mrf.mxu2  ;;  %v646_v10 = vpop.f32.mrf.mxu3  ;;  %v1233_v62 = vadd.f32 %v1169_v48, %v1105_v58  ;;  %v1121_v63 = vsel %vm993_vm6, %v929_v43, %v1057_v53  ;;  %vm962_vm8 = vcmp.ge.f32.partialorder %v898_v55, 0.0  ;;  %v1026_v0 = vmul.f32 0.01, %v898_v55  ;;  %1281 = vst.msk [vmem:[%s2518_s4 + $0x80] sm:$0xff] %vm22_vm2, %v1217_v57  ;;  %v1140_v48 = vld [vmem:[%s2517_s3 + $0x18] sm:$0xff] }
  0xaf   :  { %v528_v13 = vpop.f32.mrf.mxu0  ;;  %v568_v14 = vpop.f32.mrf.mxu1  ;;  %v715_v21 = vadd.f32 %v606_v9, %v121_v16  ;;  %v731_v23 = vadd.f32 %v646_v10, %v137_v18  ;;  %v1249_v3 = vadd.f32 %v1185_v54, %v1121_v63  ;;  %v1074_v4 = vsel %vm946_vm7, %v882_v49, %v1010_v59  ;;  %v1188_v57 = vld [vmem:[%s2517_s3 + $0x198] sm:$0xff] }
  0xb0   :  { %v684_v27 = vadd.f32 %v528_v13, %v90_v20  ;;  %v700_v31 = vadd.f32 %v568_v14, %v106_v22  ;;  %1297 = vst.msk [vmem:[%s2518_s4 + $0x100] sm:$0xff] %vm22_vm2, %v1233_v62  ;;  %v1202_v9 = vadd.f32 %v1138_v60, %v1074_v4  ;;  %v1090_v10 = vsel %vm962_vm8, %v898_v55, %v1026_v0  ;;  %v1139_v13 = vld [vmem:[%s2517_s3 + $0x10] sm:$0xff]  ;;  %v123_v62 = vld [vmem:[#allocation2 + $0x120] sm:$0xff] }
  0xb1   :  { %780 = vst.msk [vmem:[#allocation2 + $0x110] sm:$0xff] %vm22_vm2, %v715_v21  ;;  %v846_v56 = vld [vmem:[#allocation2 + $0x108] sm:$0xff]  ;;  %v1218_v18 = vadd.f32 %v1154_v1, %v1090_v10 }
  0xb2   :  { %796 = vst.msk [vmem:[#allocation2 + $0x190] sm:$0xff] %vm22_vm2, %v731_v23  ;;  %v862_v61 = vld [vmem:[#allocation2 + $0x188] sm:$0xff]  ;;  %v914_v5 = vadd.f32 %v1834_v45, %v846_v56  ;;  %v1172_v56 = vld [vmem:[%s2517_s3 + $0x118] sm:$0xff] }
  0xb3   :  { %749 = vst.msk [vmem:[#allocation2 + $0x18] sm:$0xff] %vm22_vm2, %v684_v27  ;;  %v815_v2 = vld [vmem:[#allocation2 + $0x10] sm:$0xff]  ;;  %v930_v7 = vadd.f32 %v1834_v45, %v862_v61 }
  0xb4   :  { %765 = vst.msk [vmem:[#allocation2 + $0x98] sm:$0xff] %vm22_vm2, %v700_v31  ;;  %v831_v8 = vld [vmem:[#allocation2 + $0x90] sm:$0xff]  ;;  %v883_v12 = vadd.f32 %v1834_v45, %v815_v2  ;;  %vm978_vm9 = vcmp.ge.f32.partialorder %v914_v5, 0.0  ;;  %v1042_v19 = vmul.f32 0.01, %v914_v5 }
  0xb5   :  { %v899_v14 = vadd.f32 %v1834_v45, %v831_v8  ;;  %1313 = vst.msk [vmem:[%s2518_s4 + $0x180] sm:$0xff] %vm22_vm2, %v1249_v3  ;;  %vm994_vm10 = vcmp.ge.f32.partialorder %v930_v7, 0.0  ;;  %v1058_v23 = vmul.f32 0.01, %v930_v7 }
  0xb6   :  { %v608_v32 = vpop.f32.mrf.mxu2  ;;  %v648_v33 = vpop.f32.mrf.mxu3  ;;  %1266 = vst.msk [vmem:[%s2518_s4 + $0x8] sm:$0xff] %vm22_vm2, %v1202_v9  ;;  %vm947_vm11 = vcmp.ge.f32.partialorder %v883_v12, 0.0  ;;  %v1106_v26 = vsel %vm978_vm9, %v914_v5, %v1042_v19 }
  0xb7   :  { %v716_v37 = vadd.f32 %v608_v32, %v122_v24  ;;  %v732_v38 = vadd.f32 %v648_v33, %v138_v25  ;;  %v531_v39 = vpop.f32.mrf.mxu0  ;;  %v571_v40 = vpop.f32.mrf.mxu1  ;;  %v1011_v24 = vmul.f32 0.01, %v883_v12  ;;  %1282 = vst.msk [vmem:[%s2518_s4 + $0x88] sm:$0xff] %vm22_vm2, %v1218_v18  ;;  %vm963_vm12 = vcmp.ge.f32.partialorder %v899_v14, 0.0 }
  0xb8   :  { %v1891_v46 = vadd.f32 %v531_v39, %v91_v28  ;;  %v1898_v51 = vadd.f32 %v571_v40, %v107_v34  ;;  %v847_v15 = vld [vmem:[#allocation2 + $0x110] sm:$0xff]  ;;  %v1027_v27 = vmul.f32 0.01, %v899_v14  ;;  %v1234_v31 = vadd.f32 %v1170_v6, %v1106_v26  ;;  %v108_v26 = vld [vmem:[#allocation2 + $0xa8] sm:$0xff] }
  0xb9   :  { %781 = vst.msk [vmem:[#allocation2 + $0x118] sm:$0xff] %vm22_vm2, %v716_v37  ;;  %v863_v20 = vld [vmem:[#allocation2 + $0x190] sm:$0xff]  ;;  %v915_v25 = vadd.f32 %v1834_v45, %v847_v15  ;;  %v1122_v32 = vsel %vm994_vm10, %v930_v7, %v1058_v23  ;;  %v1075_v33 = vsel %vm947_vm11, %v883_v12, %v1011_v24  ;;  %v139_v7 = vld [vmem:[#allocation2 + $0x1a0] sm:$0xff]  ;;  %v92_v24 = vld [vmem:[#allocation2 + $0x28] sm:$0xff] }
  0xba   :  { %797 = vst.msk [vmem:[#allocation2 + $0x198] sm:$0xff] %vm22_vm2, %v732_v38  ;;  %v1155_v28 = vld [vmem:[%s2517_s3 + $0x90] sm:$0xff]  ;;  %v931_v29 = vadd.f32 %v1834_v45, %v863_v20  ;;  %v816_v30 = vld [vmem:[#allocation2 + $0x18] sm:$0xff]  ;;  %v1250_v36 = vadd.f32 %v1186_v11, %v1122_v32  ;;  %v1203_v37 = vadd.f32 %v1139_v13, %v1075_v33  ;;  %v1091_v38 = vsel %vm963_vm12, %v899_v14, %v1027_v27  ;;  %v1141_v20 = vld [vmem:[%s2517_s3 + $0x20] sm:$0xff] }
  0xbb   :  { %vm979_vm13 = vcmp.ge.f32.partialorder %v915_v25, 0.0  ;;  %v832_v34 = vld [vmem:[#allocation2 + $0x98] sm:$0xff]  ;;  %750 = vst.msk [vmem:[#allocation2 + $0x20] sm:$0xff] %vm22_vm2, %v1891_v46  ;;  %v1043_v39 = vmul.f32 0.01, %v915_v25  ;;  %v1171_v40 = vld [vmem:[%s2517_s3 + $0x110] sm:$0xff]  ;;  %v1219_v42 = vadd.f32 %v1155_v28, %v1091_v38  ;;  %v884_v46 = vadd.f32 %v1834_v45, %v816_v30 }
  0xbc   :  { %766 = vst.msk [vmem:[#allocation2 + $0xa0] sm:$0xff] %vm22_vm2, %v1898_v51  ;;  %vm995_vm14 = vcmp.ge.f32.partialorder %v931_v29, 0.0  ;;  %v1059_v43 = vmul.f32 0.01, %v931_v29  ;;  %v900_v49 = vadd.f32 %v1834_v45, %v832_v34  ;;  %v140_v33 = vld [vmem:[#allocation2 + $0x1a8] sm:$0xff]  ;;  %v93_v38 = vld [vmem:[#allocation2 + $0x30] sm:$0xff] }
  0xbd   :  { %1298 = vst.msk [vmem:[%s2518_s4 + $0x108] sm:$0xff] %vm22_vm2, %v1234_v31  ;;  %v1107_v47 = vsel %vm979_vm13, %v915_v25, %v1043_v39  ;;  %vm948_vm15 = vcmp.ge.f32.partialorder %v884_v46, 0.0  ;;  %v1012_v55 = vmul.f32 0.01, %v884_v46  ;;  %v1157_v25 = vld [vmem:[%s2517_s3 + $0xa0] sm:$0xff] }
  0xbe   :  { %v1934_v16 = vpop.f32.mrf.mxu2  ;;  %v1936_v17 = vpop.f32.mrf.mxu3  ;;  %1314 = vst.msk [vmem:[%s2518_s4 + $0x188] sm:$0xff] %vm22_vm2, %v1250_v36  ;;  %v1235_v53 = vadd.f32 %v1171_v40, %v1107_v47  ;;  %v1123_v54 = vsel %vm995_vm14, %v931_v29, %v1059_v43  ;;  %vm964_vm0 = vcmp.ge.f32.partialorder %v900_v49, 0.0  ;;  %v1028_v61 = vmul.f32 0.01, %v900_v49  ;;  %v109_v40 = vld [vmem:[#allocation2 + $0xb0] sm:$0xff]  ;;  %v110_v47 = vld [vmem:[#allocation2 + $0xb8] sm:$0xff] }
  0xbf   :  { %v1942_v21 = vpop.f32.mrf.mxu0  ;;  %v1944_v22 = vpop.f32.mrf.mxu1  ;;  %1267 = vst.msk [vmem:[%s2518_s4 + $0x10] sm:$0xff] %vm22_vm2, %v1203_v37  ;;  %v1251_v60 = vadd.f32 %v1187_v44, %v1123_v54  ;;  %v1076_v1 = vsel %vm948_vm15, %v884_v46, %v1012_v55  ;;  %v717_v18 = vadd.f32 %v1934_v16, %v123_v62  ;;  %v733_v23 = vadd.f32 %v1936_v17, %v139_v7  ;;  %v124_v17 = vld [vmem:[#allocation2 + $0x128] sm:$0xff]  ;;  %v141_v43 = vld [vmem:[#allocation2 + $0x1b0] sm:$0xff]  ;;  %v94_v44 = vld [vmem:[#allocation2 + $0x38] sm:$0xff] }
  0xc0   :  { %v848_v35 = vld [vmem:[#allocation2 + $0x118] sm:$0xff]  ;;  %1283 = vst.msk [vmem:[%s2518_s4 + $0x90] sm:$0xff] %vm22_vm2, %v1219_v42  ;;  %v1204_v4 = vadd.f32 %v1140_v48, %v1076_v1  ;;  %v1092_v5 = vsel %vm964_vm0, %v900_v49, %v1028_v61  ;;  %v686_v32 = vadd.f32 %v1942_v21, %v92_v24  ;;  %v702_v37 = vadd.f32 %v1944_v22, %v108_v26  ;;  %v1173_v62 = vld [vmem:[%s2517_s3 + $0x120] sm:$0xff]  ;;  %v1158_v24 = vld [vmem:[%s2517_s3 + $0xa8] sm:$0xff] }
  0xc1   :  { %v864_v41 = vld [vmem:[#allocation2 + $0x198] sm:$0xff]  ;;  %v916_v51 = vadd.f32 %v1834_v45, %v848_v35  ;;  %1299 = vst.msk [vmem:[%s2518_s4 + $0x110] sm:$0xff] %vm22_vm2, %v1235_v53  ;;  %v1220_v8 = vadd.f32 %v1156_v50, %v1092_v5 }
  0xc2   :  { %v932_v52 = vadd.f32 %v1834_v45, %v864_v41  ;;  %1315 = vst.msk [vmem:[%s2518_s4 + $0x190] sm:$0xff] %vm22_vm2, %v1251_v60  ;;  %v817_v6 = vld [vmem:[#allocation2 + $0x20] sm:$0xff]  ;;  %v125_v41 = vld [vmem:[#allocation2 + $0x130] sm:$0xff]  ;;  %v126_v50 = vld [vmem:[#allocation2 + $0x138] sm:$0xff] }
  0xc3   :  { %vm980_vm1 = vcmp.ge.f32.partialorder %v916_v51, 0.0  ;;  %v1044_v2 = vmul.f32 0.01, %v916_v51  ;;  %v885_v11 = vadd.f32 %v1834_v45, %v817_v6  ;;  %v833_v12 = vld [vmem:[#allocation2 + $0xa0] sm:$0xff]  ;;  %1268 = vst.msk [vmem:[%s2518_s4 + $0x18] sm:$0xff] %vm22_vm2, %v1204_v4  ;;  %v142_v60 = vld [vmem:[#allocation2 + $0x1b8] sm:$0xff] }
  0xc4   :  { %vm996_vm3 = vcmp.ge.f32.partialorder %v932_v52, 0.0  ;;  %v1060_v3 = vmul.f32 0.01, %v932_v52  ;;  %v901_v15 = vadd.f32 %v1834_v45, %v833_v12  ;;  %1284 = vst.msk [vmem:[%s2518_s4 + $0x98] sm:$0xff] %vm22_vm2, %v1220_v8  ;;  %v111_v8 = vld [vmem:[#allocation2 + $0xc0] sm:$0xff] }
  0xc5   :  { %v1108_v9 = vsel %vm980_vm1, %v916_v51, %v1044_v2  ;;  %vm949_vm4 = vcmp.ge.f32.partialorder %v885_v11, 0.0  ;;  %v1013_v19 = vmul.f32 0.01, %v885_v11  ;;  %782 = vst.msk [vmem:[#allocation2 + $0x120] sm:$0xff] %vm22_vm2, %v717_v18  ;;  %v1189_v2 = vld [vmem:[%s2517_s3 + $0x1a0] sm:$0xff]  ;;  %v1142_v18 = vld [vmem:[%s2517_s3 + $0x28] sm:$0xff] }
  0xc6   :  { %v613_v58 = vpop.f32.mrf.mxu2  ;;  %v653_v59 = vpop.f32.mrf.mxu3  ;;  %v1124_v10 = vsel %vm996_vm3, %v932_v52, %v1060_v3  ;;  %v1236_v13 = vadd.f32 %v1172_v56, %v1108_v9  ;;  %vm965_vm5 = vcmp.ge.f32.partialorder %v901_v15, 0.0  ;;  %v1029_v16 = vmul.f32 0.01, %v901_v15  ;;  %798 = vst.msk [vmem:[#allocation2 + $0x1a0] sm:$0xff] %vm22_vm2, %v733_v23 }
  0xc7   :  { %v536_v63 = vpop.f32.mrf.mxu0  ;;  %v576_v0 = vpop.f32.mrf.mxu1  ;;  %v1252_v14 = vadd.f32 %v1188_v57, %v1124_v10  ;;  %v1077_v27 = vsel %vm949_vm4, %v885_v11, %v1013_v19  ;;  %v718_v39 = vadd.f32 %v613_v58, %v124_v17  ;;  %v734_v21 = vadd.f32 %v653_v59, %v140_v33  ;;  %751 = vst.msk [vmem:[#allocation2 + $0x28] sm:$0xff] %vm22_vm2, %v686_v32 }
  0xc8   :  { %1300 = vst.msk [vmem:[%s2518_s4 + $0x118] sm:$0xff] %vm22_vm2, %v1236_v13  ;;  %v1205_v30 = vadd.f32 %v1141_v20, %v1077_v27  ;;  %v1093_v31 = vsel %vm965_vm5, %v901_v15, %v1029_v16  ;;  %v687_v42 = vadd.f32 %v536_v63, %v93_v38  ;;  %v703_v22 = vadd.f32 %v576_v0, %v109_v40  ;;  %v95_v0 = vld [vmem:[#allocation2 + $0x40] sm:$0xff]  ;;  %v1190_v38 = vld [vmem:[%s2517_s3 + $0x1a8] sm:$0xff] }
  0xc9   :  { %1316 = vst.msk [vmem:[%s2518_s4 + $0x198] sm:$0xff] %vm22_vm2, %v1252_v14  ;;  %v1221_v36 = vadd.f32 %v1157_v25, %v1093_v31 }
  0xca   :  { %1269 = vst.msk [vmem:[%s2518_s4 + $0x20] sm:$0xff] %vm22_vm2, %v1205_v30  ;;  %v1174_v30 = vld [vmem:[%s2517_s3 + $0x128] sm:$0xff] }
  0xcb   :  { %1285 = vst.msk [vmem:[%s2518_s4 + $0xa0] sm:$0xff] %vm22_vm2, %v1221_v36 }
  0xcc   :  { %767 = vst.msk [vmem:[#allocation2 + $0xa8] sm:$0xff] %vm22_vm2, %v702_v37  ;;  %v849_v48 = vld [vmem:[#allocation2 + $0x120] sm:$0xff] }
  0xcd   :  { %783 = vst.msk [vmem:[#allocation2 + $0x128] sm:$0xff] %vm22_vm2, %v718_v39  ;;  %v917_v53 = vadd.f32 %v1834_v45, %v849_v48  ;;  %v865_v54 = vld [vmem:[#allocation2 + $0x1a0] sm:$0xff] }
  0xce   :  { %v616_v28 = vpop.f32.mrf.mxu2  ;;  %v656_v29 = vpop.f32.mrf.mxu3  ;;  %799 = vst.msk [vmem:[#allocation2 + $0x1a8] sm:$0xff] %vm22_vm2, %v734_v21  ;;  %v933_v58 = vadd.f32 %v1834_v45, %v865_v54  ;;  %v818_v3 = vld [vmem:[#allocation2 + $0x28] sm:$0xff]  ;;  %v1191_v54 = vld [vmem:[%s2517_s3 + $0x1b0] sm:$0xff] }
  0xcf   :  { %v538_v34 = vpop.f32.mrf.mxu0  ;;  %v578_v35 = vpop.f32.mrf.mxu1  ;;  %v719_v46 = vadd.f32 %v616_v28, %v125_v41  ;;  %v735_v49 = vadd.f32 %v656_v29, %v141_v43  ;;  %752 = vst.msk [vmem:[#allocation2 + $0x30] sm:$0xff] %vm22_vm2, %v687_v42  ;;  %vm981_vm6 = vcmp.ge.f32.partialorder %v917_v53, 0.0  ;;  %v1045_v61 = vmul.f32 0.01, %v917_v53  ;;  %v1143_v42 = vld [vmem:[%s2517_s3 + $0x30] sm:$0xff] }
  0xd0   :  { %v688_v55 = vadd.f32 %v538_v34, %v94_v44  ;;  %768 = vst.msk [vmem:[#allocation2 + $0xb0] sm:$0xff] %vm22_vm2, %v703_v22  ;;  %v704_v59 = vadd.f32 %v578_v35, %v110_v47  ;;  %vm997_vm7 = vcmp.ge.f32.partialorder %v933_v58, 0.0  ;;  %v1061_v1 = vmul.f32 0.01, %v933_v58  ;;  %v1159_v47 = vld [vmem:[%s2517_s3 + $0xb0] sm:$0xff] }
  0xd1   :  { %784 = vst.msk [vmem:[#allocation2 + $0x130] sm:$0xff] %vm22_vm2, %v719_v46  ;;  %v1109_v4 = vsel %vm981_vm6, %v917_v53, %v1045_v61  ;;  %v886_v5 = vadd.f32 %v1834_v45, %v818_v3 }
  0xd2   :  { %800 = vst.msk [vmem:[#allocation2 + $0x1b0] sm:$0xff] %vm22_vm2, %v735_v49  ;;  %v1237_v9 = vadd.f32 %v1173_v62, %v1109_v4  ;;  %v1125_v10 = vsel %vm997_vm7, %v933_v58, %v1061_v1  ;;  %v1144_v1 = vld [vmem:[%s2517_s3 + $0x38] sm:$0xff] }
  0xd3   :  { %v834_v6 = vld [vmem:[#allocation2 + $0xa8] sm:$0xff]  ;;  %753 = vst.msk [vmem:[#allocation2 + $0x38] sm:$0xff] %vm22_vm2, %v688_v55  ;;  %v1253_v14 = vadd.f32 %v1189_v2, %v1125_v10  ;;  %vm950_vm8 = vcmp.ge.f32.partialorder %v886_v5, 0.0  ;;  %v1014_v15 = vmul.f32 0.01, %v886_v5 }
  0xd4   :  { %v902_v11 = vadd.f32 %v1834_v45, %v834_v6  ;;  %v850_v12 = vld [vmem:[#allocation2 + $0x128] sm:$0xff]  ;;  %769 = vst.msk [vmem:[#allocation2 + $0xb8] sm:$0xff] %vm22_vm2, %v704_v59 }
  0xd5   :  { %v918_v19 = vadd.f32 %v1834_v45, %v850_v12  ;;  %v866_v20 = vld [vmem:[#allocation2 + $0x1a8] sm:$0xff]  ;;  %1301 = vst.msk [vmem:[%s2518_s4 + $0x120] sm:$0xff] %vm22_vm2, %v1237_v9  ;;  %v1078_v28 = vsel %vm950_vm8, %v886_v5, %v1014_v15  ;;  %v127_v9 = vld [vmem:[#allocation2 + $0x140] sm:$0xff] }
  0xd6   :  { %v618_v51 = vpop.f32.mrf.mxu2  ;;  %v658_v52 = vpop.f32.mrf.mxu3  ;;  %vm966_vm9 = vcmp.ge.f32.partialorder %v902_v11, 0.0  ;;  %v1030_v23 = vmul.f32 0.01, %v902_v11  ;;  %v934_v16 = vadd.f32 %v1834_v45, %v866_v20  ;;  %v819_v25 = vld [vmem:[#allocation2 + $0x30] sm:$0xff]  ;;  %1317 = vst.msk [vmem:[%s2518_s4 + $0x1a0] sm:$0xff] %vm22_vm2, %v1253_v14  ;;  %v1206_v35 = vadd.f32 %v1142_v18, %v1078_v28  ;;  %v1160_v18 = vld [vmem:[%s2517_s3 + $0xb8] sm:$0xff] }
  0xd7   :  { %v541_v56 = vpop.f32.mrf.mxu0  ;;  %v581_v57 = vpop.f32.mrf.mxu1  ;;  %v720_v63 = vadd.f32 %v618_v51, %v126_v50  ;;  %v736_v7 = vadd.f32 %v658_v52, %v142_v60  ;;  %vm982_vm10 = vcmp.ge.f32.partialorder %v918_v19, 0.0  ;;  %v1046_v29 = vmul.f32 0.01, %v918_v19  ;;  %v835_v32 = vld [vmem:[#allocation2 + $0xb0] sm:$0xff] }
  0xd8   :  { %v689_v13 = vadd.f32 %v541_v56, %v95_v0  ;;  %v2082_v26 = vadd.f32 %v581_v57, %v111_v8  ;;  %v887_v31 = vadd.f32 %v1834_v45, %v819_v25  ;;  %v1094_v36 = vsel %vm966_vm9, %v902_v11, %v1030_v23  ;;  %v851_v39 = vld [vmem:[#allocation2 + $0x130] sm:$0xff]  ;;  %1270 = vst.msk [vmem:[%s2518_s4 + $0x28] sm:$0xff] %vm22_vm2, %v1206_v35  ;;  %v143_v35 = vld [vmem:[#allocation2 + $0x1c0] sm:$0xff] }
  0xd9   :  { %785 = vst.msk [vmem:[#allocation2 + $0x138] sm:$0xff] %vm22_vm2, %v720_v63  ;;  %vm998_vm11 = vcmp.ge.f32.partialorder %v934_v16, 0.0  ;;  %v1062_v37 = vmul.f32 0.01, %v934_v16  ;;  %v1222_v40 = vadd.f32 %v1158_v24, %v1094_v36  ;;  %v1110_v21 = vsel %vm982_vm10, %v918_v19, %v1046_v29  ;;  %v867_v43 = vld [vmem:[#allocation2 + $0x1b0] sm:$0xff]  ;;  %v1176_v24 = vld [vmem:[%s2517_s3 + $0x138] sm:$0xff] }
  0xda   :  { %801 = vst.msk [vmem:[#allocation2 + $0x1b8] sm:$0xff] %vm22_vm2, %v736_v7  ;;  %vm951_vm12 = vcmp.ge.f32.partialorder %v887_v31, 0.0  ;;  %v1015_v41 = vmul.f32 0.01, %v887_v31  ;;  %v1238_v22 = vadd.f32 %v1174_v30, %v1110_v21  ;;  %v903_v46 = vadd.f32 %v1834_v45, %v835_v32  ;;  %v820_v49 = vld [vmem:[#allocation2 + $0x38] sm:$0xff]  ;;  %v1175_v52 = vld [vmem:[%s2517_s3 + $0x130] sm:$0xff] }
  0xdb   :  { %754 = vst.msk [vmem:[#allocation2 + $0x40] sm:$0xff] %vm22_vm2, %v689_v13  ;;  %v1126_v44 = vsel %vm998_vm11, %v934_v16, %v1062_v37  ;;  %v919_v48 = vadd.f32 %v1834_v45, %v851_v39  ;;  %v935_v53 = vadd.f32 %v1834_v45, %v867_v43  ;;  %v888_v55 = vadd.f32 %v1834_v45, %v820_v49  ;;  %v836_v56 = vld [vmem:[#allocation2 + $0xb8] sm:$0xff]  ;;  %v1145_v37 = vld [vmem:[%s2517_s3 + $0x40] sm:$0xff] }
  0xdc   :  { %1286 = vst.msk [vmem:[%s2518_s4 + $0xa8] sm:$0xff] %vm22_vm2, %v1222_v40  ;;  %v1254_v50 = vadd.f32 %v1190_v38, %v1126_v44  ;;  %v1079_v51 = vsel %vm951_vm12, %v887_v31, %v1015_v41  ;;  %vm967_vm13 = vcmp.ge.f32.partialorder %v903_v46, 0.0  ;;  %v1031_v58 = vmul.f32 0.01, %v903_v46  ;;  %v1192_v32 = vld [vmem:[%s2517_s3 + $0x1b8] sm:$0xff]  ;;  %v96_v38 = vld [vmem:[#allocation2 + $0x48] sm:$0xff] }
  0xdd   :  { %1302 = vst.msk [vmem:[%s2518_s4 + $0x128] sm:$0xff] %vm22_vm2, %v1238_v22  ;;  %v1207_v57 = vadd.f32 %v1143_v42, %v1079_v51  ;;  %vm983_vm14 = vcmp.ge.f32.partialorder %v919_v48, 0.0  ;;  %v1047_v60 = vmul.f32 0.01, %v919_v48  ;;  %vm999_vm15 = vcmp.ge.f32.partialorder %v935_v53, 0.0  ;;  %v112_v40 = vld [vmem:[#allocation2 + $0xc8] sm:$0xff] }
  0xde   :  { %v2084_v27 = vpop.f32.mrf.mxu2  ;;  %v2086_v17 = vpop.f32.mrf.mxu3  ;;  %1318 = vst.msk [vmem:[%s2518_s4 + $0x1a8] sm:$0xff] %vm22_vm2, %v1254_v50  ;;  %v1063_v61 = vmul.f32 0.01, %v935_v53  ;;  %v904_v62 = vadd.f32 %v1834_v45, %v836_v56  ;;  %v1095_v63 = vsel %vm967_vm13, %v903_v46, %v1031_v58  ;;  %vm952_vm0 = vcmp.ge.f32.partialorder %v888_v55, 0.0  ;;  %v128_v22 = vld [vmem:[#allocation2 + $0x148] sm:$0xff]  ;;  %v113_v56 = vld [vmem:[#allocation2 + $0xd0] sm:$0xff] }
  0xdf   :  { %v2097_v33 = vpop.f32.mrf.mxu0  ;;  %v2099_v34 = vpop.f32.mrf.mxu1  ;;  %1271 = vst.msk [vmem:[%s2518_s4 + $0x30] sm:$0xff] %vm22_vm2, %v1207_v57  ;;  %v1016_v0 = vmul.f32 0.01, %v888_v55  ;;  %v1223_v5 = vadd.f32 %v1159_v47, %v1095_v63  ;;  %v1111_v6 = vsel %vm983_vm14, %v919_v48, %v1047_v60  ;;  %v721_v28 = vadd.f32 %v2084_v27, %v127_v9  ;;  %v129_v58 = vld [vmem:[#allocation2 + $0x150] sm:$0xff]  ;;  %v98_v63 = vld [vmem:[#allocation2 + $0x58] sm:$0xff] }
  0xe0   :  { %v852_v59 = vld [vmem:[#allocation2 + $0x138] sm:$0xff]  ;;  %v1127_v7 = vsel %vm999_vm15, %v935_v53, %v1063_v61  ;;  %vm968_vm1 = vcmp.ge.f32.partialorder %v904_v62, 0.0  ;;  %770 = vst.msk [vmem:[#allocation2 + $0xc0] sm:$0xff] %vm22_vm2, %v2082_v26  ;;  %v1239_v12 = vadd.f32 %v1175_v52, %v1111_v6  ;;  %v1032_v15 = vmul.f32 0.01, %v904_v62  ;;  %v144_v52 = vld [vmem:[#allocation2 + $0x1c8] sm:$0xff] }
  0xe1   :  { %v920_v2 = vadd.f32 %v1834_v45, %v852_v59  ;;  %v868_v8 = vld [vmem:[#allocation2 + $0x1b8] sm:$0xff]  ;;  %v1255_v13 = vadd.f32 %v1191_v54, %v1127_v7  ;;  %v1080_v14 = vsel %vm952_vm0, %v888_v55, %v1016_v0  ;;  %1287 = vst.msk [vmem:[%s2518_s4 + $0xb0] sm:$0xff] %vm22_vm2, %v1223_v5  ;;  %v737_v43 = vadd.f32 %v2086_v17, %v143_v35  ;;  %v97_v55 = vld [vmem:[#allocation2 + $0x50] sm:$0xff] }
  0xe2   :  { %v821_v19 = vld [vmem:[#allocation2 + $0x40] sm:$0xff]  ;;  %v1208_v20 = vadd.f32 %v1144_v1, %v1080_v14  ;;  %v936_v16 = vadd.f32 %v1834_v45, %v868_v8  ;;  %1303 = vst.msk [vmem:[%s2518_s4 + $0x130] sm:$0xff] %vm22_vm2, %v1239_v12  ;;  %v1096_v25 = vsel %vm968_vm1, %v904_v62, %v1032_v15  ;;  %v690_v49 = vadd.f32 %v2097_v33, %v96_v38  ;;  %v145_v61 = vld [vmem:[#allocation2 + $0x1d0] sm:$0xff]  ;;  %v130_v8 = vld [vmem:[#allocation2 + $0x158] sm:$0xff] }
  0xe3   :  { %vm984_vm3 = vcmp.ge.f32.partialorder %v920_v2, 0.0  ;;  %v1048_v23 = vmul.f32 0.01, %v920_v2  ;;  %v889_v26 = vadd.f32 %v1834_v45, %v821_v19  ;;  %1319 = vst.msk [vmem:[%s2518_s4 + $0x1b0] sm:$0xff] %vm22_vm2, %v1255_v13  ;;  %v1224_v29 = vadd.f32 %v1160_v18, %v1096_v25  ;;  %v1161_v33 = vld [vmem:[%s2517_s3 + $0xc0] sm:$0xff]  ;;  %v146_v9 = vld [vmem:[#allocation2 + $0x1d8] sm:$0xff] }
  0xe4   :  { %vm1000_vm4 = vcmp.ge.f32.partialorder %v936_v16, 0.0  ;;  %v1064_v31 = vmul.f32 0.01, %v936_v16  ;;  %1272 = vst.msk [vmem:[%s2518_s4 + $0x38] sm:$0xff] %vm22_vm2, %v1208_v20  ;;  %v706_v51 = vadd.f32 %v2099_v34, %v112_v40 }
  0xe5   :  { %v1112_v30 = vsel %vm984_vm3, %v920_v2, %v1048_v23  ;;  %vm953_vm5 = vcmp.ge.f32.partialorder %v889_v26, 0.0  ;;  %v1017_v36 = vmul.f32 0.01, %v889_v26  ;;  %1288 = vst.msk [vmem:[%s2518_s4 + $0xb8] sm:$0xff] %vm22_vm2, %v1224_v29  ;;  %v114_v2 = vld [vmem:[#allocation2 + $0xd8] sm:$0xff] }
  0xe6   :  { %v2148_v3 = vpop.f32.mrf.mxu2  ;;  %v2150_v4 = vpop.f32.mrf.mxu3  ;;  %v1240_v27 = vadd.f32 %v1176_v24, %v1112_v30  ;;  %v1128_v39 = vsel %vm1000_vm4, %v936_v16, %v1064_v31  ;;  %786 = vst.msk [vmem:[#allocation2 + $0x140] sm:$0xff] %vm22_vm2, %v721_v28  ;;  %v1193_v30 = vld [vmem:[%s2517_s3 + $0x1c0] sm:$0xff] }
  0xe7   :  { %v2155_v10 = vpop.f32.mrf.mxu0  ;;  %v2157_v11 = vpop.f32.mrf.mxu1  ;;  %v1256_v21 = vadd.f32 %v1192_v32, %v1128_v39  ;;  %v1081_v41 = vsel %vm953_vm5, %v889_v26, %v1017_v36  ;;  %v837_v42 = vld [vmem:[#allocation2 + $0xc0] sm:$0xff]  ;;  %v722_v54 = vadd.f32 %v2148_v3, %v128_v22  ;;  %802 = vst.msk [vmem:[#allocation2 + $0x1c0] sm:$0xff] %vm22_vm2, %v737_v43  ;;  %v738_v57 = vadd.f32 %v2150_v4, %v144_v52  ;;  %v1162_v36 = vld [vmem:[%s2517_s3 + $0xc8] sm:$0xff] }
  0xe8   :  { %1304 = vst.msk [vmem:[%s2518_s4 + $0x138] sm:$0xff] %vm22_vm2, %v1240_v27  ;;  %v1209_v47 = vadd.f32 %v1145_v37, %v1081_v41  ;;  %v905_v48 = vadd.f32 %v1834_v45, %v837_v42  ;;  %v691_v60 = vadd.f32 %v2155_v10, %v97_v55  ;;  %v707_v62 = vadd.f32 %v2157_v11, %v113_v56  ;;  %v1177_v11 = vld [vmem:[%s2517_s3 + $0x140] sm:$0xff]  ;;  %v1146_v27 = vld [vmem:[%s2517_s3 + $0x48] sm:$0xff]  ;;  %v1147_v55 = vld [vmem:[%s2517_s3 + $0x50] sm:$0xff] }
  0xe9   :  { %1320 = vst.msk [vmem:[%s2518_s4 + $0x1b8] sm:$0xff] %vm22_vm2, %v1256_v21  ;;  %v99_v26 = vld [vmem:[#allocation2 + $0x60] sm:$0xff]  ;;  %v1194_v52 = vld [vmem:[%s2517_s3 + $0x1c8] sm:$0xff] }
  0xea   :  { %1273 = vst.msk [vmem:[%s2518_s4 + $0x40] sm:$0xff] %vm22_vm2, %v1209_v47  ;;  %vm969_vm6 = vcmp.ge.f32.partialorder %v905_v48, 0.0  ;;  %v1033_v53 = vmul.f32 0.01, %v905_v48  ;;  %v115_v41 = vld [vmem:[#allocation2 + $0xe0] sm:$0xff] }
  0xeb   :  { %755 = vst.msk [vmem:[#allocation2 + $0x48] sm:$0xff] %vm22_vm2, %v690_v49 }
  0xec   :  { %v1097_v34 = vsel %vm969_vm6, %v905_v48, %v1033_v53  ;;  %771 = vst.msk [vmem:[#allocation2 + $0xc8] sm:$0xff] %vm22_vm2, %v706_v51 }
  0xed   :  { %v1225_v59 = vadd.f32 %v1161_v33, %v1097_v34  ;;  %787 = vst.msk [vmem:[#allocation2 + $0x148] sm:$0xff] %vm22_vm2, %v722_v54  ;;  %v853_v0 = vld [vmem:[#allocation2 + $0x140] sm:$0xff]  ;;  %v1163_v34 = vld [vmem:[%s2517_s3 + $0xd0] sm:$0xff] }
  0xee   :  { %v626_v44 = vpop.f32.mrf.mxu2  ;;  %v666_v46 = vpop.f32.mrf.mxu3  ;;  %v921_v5 = vadd.f32 %v1834_v45, %v853_v0  ;;  %803 = vst.msk [vmem:[#allocation2 + $0x1c8] sm:$0xff] %vm22_vm2, %v738_v57  ;;  %v869_v12 = vld [vmem:[#allocation2 + $0x1c0] sm:$0xff] }
  0xef   :  { %v548_v50 = vpop.f32.mrf.mxu0  ;;  %v588_v17 = vpop.f32.mrf.mxu1  ;;  %1289 = vst.msk [vmem:[%s2518_s4 + $0xc0] sm:$0xff] %vm22_vm2, %v1225_v59  ;;  %v723_v1 = vadd.f32 %v626_v44, %v129_v58  ;;  %v739_v6 = vadd.f32 %v666_v46, %v145_v61  ;;  %v937_v15 = vadd.f32 %v1834_v45, %v869_v12  ;;  %v1178_v46 = vld [vmem:[%s2517_s3 + $0x148] sm:$0xff]  ;;  %v131_v59 = vld [vmem:[#allocation2 + $0x160] sm:$0xff] }
  0xf0   :  { %756 = vst.msk [vmem:[#allocation2 + $0x50] sm:$0xff] %vm22_vm2, %v691_v60  ;;  %v692_v7 = vadd.f32 %v548_v50, %v98_v63  ;;  %vm985_vm7 = vcmp.ge.f32.partialorder %v921_v5, 0.0  ;;  %v1049_v10 = vmul.f32 0.01, %v921_v5  ;;  %v708_v13 = vadd.f32 %v588_v17, %v114_v2  ;;  %v2266_v50 = vld [vmem:[%s2515_s2] ss:$0 sm:$0xff] }
  0xf1   :  { %772 = vst.msk [vmem:[#allocation2 + $0xd0] sm:$0xff] %vm22_vm2, %v707_v62  ;;  %vm1001_vm8 = vcmp.ge.f32.partialorder %v937_v15, 0.0  ;;  %v1065_v29 = vmul.f32 0.01, %v937_v15  ;;  %v147_v12 = vld [vmem:[#allocation2 + $0x1e0] sm:$0xff] }
  0xf2   :  { %v822_v18 = vld [vmem:[#allocation2 + $0x48] sm:$0xff]  ;;  %788 = vst.msk [vmem:[#allocation2 + $0x150] sm:$0xff] %vm22_vm2, %v723_v1  ;;  %v1113_v20 = vsel %vm985_vm7, %v921_v5, %v1049_v10 }
  0xf3   :  { %v890_v23 = vadd.f32 %v1834_v45, %v822_v18  ;;  %v838_v24 = vld [vmem:[#allocation2 + $0xc8] sm:$0xff]  ;;  %804 = vst.msk [vmem:[#allocation2 + $0x1d0] sm:$0xff] %vm22_vm2, %v739_v6  ;;  %v1241_v28 = vadd.f32 %v1177_v11, %v1113_v20  ;;  %v1129_v38 = vsel %vm1001_vm8, %v937_v15, %v1065_v29  ;;  %v1179_v18 = vld [vmem:[%s2517_s3 + $0x150] sm:$0xff] }
  0xf4   :  { %v906_v31 = vadd.f32 %v1834_v45, %v838_v24  ;;  %v854_v32 = vld [vmem:[#allocation2 + $0x148] sm:$0xff]  ;;  %757 = vst.msk [vmem:[#allocation2 + $0x58] sm:$0xff] %vm22_vm2, %v692_v7  ;;  %v1257_v22 = vadd.f32 %v1193_v30, %v1129_v38  ;;  %v1195_v24 = vld [vmem:[%s2517_s3 + $0x1d0] sm:$0xff]  ;;  %v1148_v30 = vld [vmem:[%s2517_s3 + $0x58] sm:$0xff] }
  0xf5   :  { %vm954_vm9 = vcmp.ge.f32.partialorder %v890_v23, 0.0  ;;  %v1018_v35 = vmul.f32 0.01, %v890_v23  ;;  %v922_v37 = vadd.f32 %v1834_v45, %v854_v32  ;;  %773 = vst.msk [vmem:[#allocation2 + $0xd8] sm:$0xff] %vm22_vm2, %v708_v13  ;;  %v870_v40 = vld [vmem:[#allocation2 + $0x1c8] sm:$0xff] }
  0xf6   :  { %v628_v3 = vpop.f32.mrf.mxu2  ;;  %v668_v4 = vpop.f32.mrf.mxu3  ;;  %1305 = vst.msk [vmem:[%s2518_s4 + $0x140] sm:$0xff] %vm22_vm2, %v1241_v28  ;;  %vm970_vm10 = vcmp.ge.f32.partialorder %v906_v31, 0.0  ;;  %v1034_v39 = vmul.f32 0.01, %v906_v31  ;;  %v938_v51 = vadd.f32 %v2266_v50, %v870_v40  ;;  %v1196_v40 = vld [vmem:[%s2517_s3 + $0x1d8] sm:$0xff] }
  0xf7   :  { %v551_v14 = vpop.f32.mrf.mxu0  ;;  %v591_v19 = vpop.f32.mrf.mxu1  ;;  %v724_v16 = vadd.f32 %v628_v3, %v130_v8  ;;  %v740_v25 = vadd.f32 %v668_v4, %v146_v9  ;;  %v1082_v44 = vsel %vm954_vm9, %v890_v23, %v1018_v35  ;;  %vm986_vm11 = vcmp.ge.f32.partialorder %v922_v37, 0.0  ;;  %v823_v47 = vld [vmem:[#allocation2 + $0x50] sm:$0xff]  ;;  %1321 = vst.msk [vmem:[%s2518_s4 + $0x1c0] sm:$0xff] %vm22_vm2, %v1257_v22 }
  0xf8   :  { %v693_v21 = vadd.f32 %v551_v14, %v99_v26  ;;  %v1050_v45 = vmul.f32 0.01, %v922_v37  ;;  %v1210_v48 = vadd.f32 %v1146_v27, %v1082_v44  ;;  %v1098_v49 = vsel %vm970_vm10, %v906_v31, %v1034_v39  ;;  %v839_v53 = vld [vmem:[#allocation2 + $0xd0] sm:$0xff]  ;;  %v1164_v31 = vld [vmem:[%s2517_s3 + $0xd8] sm:$0xff] }
  0xf9   :  { %789 = vst.msk [vmem:[#allocation2 + $0x158] sm:$0xff] %vm22_vm2, %v724_v16  ;;  %v891_v17 = vadd.f32 %v2266_v50, %v823_v47  ;;  %v1226_v33 = vadd.f32 %v1162_v36, %v1098_v49  ;;  %v907_v56 = vadd.f32 %v2266_v50, %v839_v53  ;;  %v855_v57 = vld [vmem:[#allocation2 + $0x150] sm:$0xff]  ;;  %v709_v58 = vadd.f32 %v591_v19, %v115_v41  ;;  %v1180_v39 = vld [vmem:[%s2517_s3 + $0x158] sm:$0xff] }
  0xfa   :  { %805 = vst.msk [vmem:[#allocation2 + $0x1d8] sm:$0xff] %vm22_vm2, %v740_v25  ;;  %v1114_v54 = vsel %vm986_vm11, %v922_v37, %v1050_v45  ;;  %vm1002_vm12 = vcmp.ge.f32.partialorder %v938_v51, 0.0  ;;  %v1066_v61 = vmul.f32 0.01, %v938_v51  ;;  %v871_v62 = vld [vmem:[#allocation2 + $0x1d0] sm:$0xff]  ;;  %v923_v1 = vadd.f32 %v2266_v50, %v855_v57 }
  0xfb   :  { %1274 = vst.msk [vmem:[%s2518_s4 + $0x48] sm:$0xff] %vm22_vm2, %v1210_v48  ;;  %v1242_v60 = vadd.f32 %v1178_v46, %v1114_v54  ;;  %vm955_vm13 = vcmp.ge.f32.partialorder %v891_v17, 0.0  ;;  %v1019_v63 = vmul.f32 0.01, %v891_v17  ;;  %vm971_vm14 = vcmp.ge.f32.partialorder %v907_v56, 0.0  ;;  %v824_v5 = vld [vmem:[#allocation2 + $0x58] sm:$0xff] }
  0xfc   :  { %1290 = vst.msk [vmem:[%s2518_s4 + $0xc8] sm:$0xff] %vm22_vm2, %v1226_v33  ;;  %v1035_v0 = vmul.f32 0.01, %v907_v56  ;;  %v1130_v3 = vsel %vm1002_vm12, %v938_v51, %v1066_v61  ;;  %v939_v4 = vadd.f32 %v2266_v50, %v871_v62  ;;  %v840_v6 = vld [vmem:[#allocation2 + $0xd8] sm:$0xff]  ;;  %vm987_vm15 = vcmp.ge.f32.partialorder %v923_v1, 0.0  ;;  %v116_v48 = vld [vmem:[#allocation2 + $0xe8] sm:$0xff] }
  0xfd   :  { %1306 = vst.msk [vmem:[%s2518_s4 + $0x148] sm:$0xff] %vm22_vm2, %v1242_v60  ;;  %v1258_v9 = vadd.f32 %v1194_v52, %v1130_v3  ;;  %v1083_v10 = vsel %vm955_vm13, %v891_v17, %v1019_v63  ;;  %v1051_v15 = vmul.f32 0.01, %v923_v1  ;;  %v892_v16 = vadd.f32 %v2266_v50, %v824_v5  ;;  %v132_v61 = vld [vmem:[#allocation2 + $0x168] sm:$0xff] }
  0xfe   :  { %v631_v42 = vpop.f32.mrf.mxu2  ;;  %v2256_v43 = vpop.f32.mrf.mxu3  ;;  %v1099_v11 = vsel %vm971_vm14, %v907_v56, %v1035_v0  ;;  %758 = vst.msk [vmem:[#allocation2 + $0x60] sm:$0xff] %vm22_vm2, %v693_v21  ;;  %v1211_v13 = vadd.f32 %v1147_v55, %v1083_v10  ;;  %vm1003_vm0 = vcmp.ge.f32.partialorder %v939_v4, 0.0  ;;  %v1067_v23 = vmul.f32 0.01, %v939_v4  ;;  %v1165_v0 = vld [vmem:[%s2517_s3 + $0xe0] sm:$0xff] }
  0xff   :  { %v2294_v2 = vpop.f32.mrf.mxu0  ;;  %v725_v7 = vadd.f32 %v631_v42, %v131_v59  ;;  %v2301_v8 = vpop.f32.mrf.mxu1  ;;  %v1227_v14 = vadd.f32 %v1163_v34, %v1099_v11  ;;  %774 = vst.msk [vmem:[#allocation2 + $0xe0] sm:$0xff] %vm22_vm2, %v709_v58  ;;  %v908_v25 = vadd.f32 %v2266_v50, %v840_v6  ;;  %v1115_v29 = vsel %vm987_vm15, %v923_v1, %v1051_v15  ;;  %v100_v42 = vld [vmem:[#allocation2 + $0x68] sm:$0xff]  ;;  %v1149_v59 = vld [vmem:[%s2517_s3 + $0x60] sm:$0xff] }
 0x100   :  { %v856_v19 = vld [vmem:[#allocation2 + $0x158] sm:$0xff]  ;;  %1322 = vst.msk [vmem:[%s2518_s4 + $0x1c8] sm:$0xff] %vm22_vm2, %v1258_v9  ;;  %v741_v35 = vadd.f32 %v2256_v43, %v147_v12  ;;  %v1243_v36 = vadd.f32 %v1179_v18, %v1115_v29  ;;  %v1131_v37 = vsel %vm1003_vm0, %v939_v4, %v1067_v23  ;;  %vm956_vm1 = vcmp.ge.f32.partialorder %v892_v16, 0.0  ;;  %v148_v1 = vld [vmem:[#allocation2 + $0x1e8] sm:$0xff]  ;;  %v101_v4 = vld [vmem:[#allocation2 + $0x70] sm:$0xff] }
 0x101   :  { %v924_v26 = vadd.f32 %v2266_v50, %v856_v19  ;;  %v872_v28 = vld [vmem:[#allocation2 + $0x1d8] sm:$0xff]  ;;  %1275 = vst.msk [vmem:[%s2518_s4 + $0x50] sm:$0xff] %vm22_vm2, %v1211_v13  ;;  %v1020_v38 = vmul.f32 0.01, %v892_v16  ;;  %v1259_v21 = vadd.f32 %v1195_v24, %v1131_v37  ;;  %vm972_vm3 = vcmp.ge.f32.partialorder %v908_v25, 0.0  ;;  %v1181_v11 = vld [vmem:[%s2517_s3 + $0x160] sm:$0xff] }
 0x102   :  { %v940_v32 = vadd.f32 %v2266_v50, %v872_v28  ;;  %1291 = vst.msk [vmem:[%s2518_s4 + $0xd0] sm:$0xff] %vm22_vm2, %v1227_v14  ;;  %v1036_v41 = vmul.f32 0.01, %v908_v25  ;;  %v694_v34 = vadd.f32 %v2294_v2, %v100_v42  ;;  %v710_v60 = vadd.f32 %v2301_v8, %v116_v48  ;;  %v117_v13 = vld [vmem:[#allocation2 + $0xf0] sm:$0xff]  ;;  %v1197_v28 = vld [vmem:[%s2517_s3 + $0x1e0] sm:$0xff] }
 0x103   :  { %vm988_vm4 = vcmp.ge.f32.partialorder %v924_v26, 0.0  ;;  %790 = vst.msk [vmem:[#allocation2 + $0x160] sm:$0xff] %vm22_vm2, %v725_v7  ;;  %v1084_v43 = vsel %vm956_vm1, %v892_v16, %v1020_v38  ;;  %v1052_v22 = vmul.f32 0.01, %v924_v26  ;;  %v133_v19 = vld [vmem:[#allocation2 + $0x170] sm:$0xff]  ;;  %v134_v38 = vld [vmem:[#allocation2 + $0x178] sm:$0xff] }
 0x104   :  { %1307 = vst.msk [vmem:[%s2518_s4 + $0x150] sm:$0xff] %vm22_vm2, %v1243_v36  ;;  %vm1004_vm5 = vcmp.ge.f32.partialorder %v940_v32, 0.0  ;;  %v1068_v44 = vmul.f32 0.01, %v940_v32  ;;  %v1212_v45 = vadd.f32 %v1148_v30, %v1084_v43  ;;  %v1100_v46 = vsel %vm972_vm3, %v908_v25, %v1036_v41  ;;  %v149_v16 = vld [vmem:[#allocation2 + $0x1f0] sm:$0xff]  ;;  %v102_v30 = vld [vmem:[#allocation2 + $0x78] sm:$0xff] }
 0x105   :  { %1323 = vst.msk [vmem:[%s2518_s4 + $0x1d0] sm:$0xff] %vm22_vm2, %v1259_v21  ;;  %v825_v47 = vld [vmem:[#allocation2 + $0x60] sm:$0xff]  ;;  %v1228_v49 = vadd.f32 %v1164_v31, %v1100_v46  ;;  %v1116_v51 = vsel %vm988_vm4, %v924_v26, %v1052_v22 }
 0x106   :  { %v2309_v20 = vpop.f32.mrf.mxu2  ;;  %v673_v27 = vpop.f32.mrf.mxu3  ;;  %v1132_v52 = vsel %vm1004_vm5, %v940_v32, %v1068_v44  ;;  %v893_v17 = vadd.f32 %v2266_v50, %v825_v47  ;;  %v841_v53 = vld [vmem:[#allocation2 + $0xe0] sm:$0xff]  ;;  %806 = vst.msk [vmem:[#allocation2 + $0x1e0] sm:$0xff] %vm22_vm2, %v741_v35  ;;  %v1244_v54 = vadd.f32 %v1180_v39, %v1116_v51  ;;  %v118_v32 = vld [vmem:[#allocation2 + $0xf8] sm:$0xff]  ;;  %v1166_v51 = vld [vmem:[%s2517_s3 + $0xe8] sm:$0xff] }
 0x107   :  { %v556_v33 = vpop.f32.mrf.mxu0  ;;  %1276 = vst.msk [vmem:[%s2518_s4 + $0x58] sm:$0xff] %vm22_vm2, %v1212_v45  ;;  %v1260_v55 = vadd.f32 %v1196_v40, %v1132_v52  ;;  %v909_v56 = vadd.f32 %v2266_v50, %v841_v53  ;;  %v596_v57 = vpop.f32.mrf.mxu1  ;;  %v726_v8 = vadd.f32 %v2309_v20, %v132_v61  ;;  %v742_v12 = vadd.f32 %v673_v27, %v148_v1  ;;  %v1150_v45 = vld [vmem:[%s2517_s3 + $0x68] sm:$0xff]  ;;  %v150_v47 = vld [vmem:[#allocation2 + $0x1f8] sm:$0xff] }
 0x108   :  { %1292 = vst.msk [vmem:[%s2518_s4 + $0xd8] sm:$0xff] %vm22_vm2, %v1228_v49  ;;  %vm957_vm6 = vcmp.ge.f32.partialorder %v893_v17, 0.0  ;;  %v1021_v58 = vmul.f32 0.01, %v893_v17  ;;  %v695_v18 = vadd.f32 %v556_v33, %v101_v4  ;;  %v711_v24 = vadd.f32 %v596_v57, %v117_v13 }
 0x109   :  { %1308 = vst.msk [vmem:[%s2518_s4 + $0x158] sm:$0xff] %vm22_vm2, %v1244_v54  ;;  %vm973_vm7 = vcmp.ge.f32.partialorder %v909_v56, 0.0  ;;  %v1037_v63 = vmul.f32 0.01, %v909_v56 }
 0x10a   :  { %1324 = vst.msk [vmem:[%s2518_s4 + $0x1d8] sm:$0xff] %vm22_vm2, %v1260_v55  ;;  %v1085_v2 = vsel %vm957_vm6, %v893_v17, %v1021_v58  ;;  %v857_v3 = vld [vmem:[#allocation2 + $0x160] sm:$0xff] }
 0x10b   :  { %v1213_v5 = vadd.f32 %v1149_v59, %v1085_v2  ;;  %v1101_v6 = vsel %vm973_vm7, %v909_v56, %v1037_v63  ;;  %v925_v7 = vadd.f32 %v2266_v50, %v857_v3  ;;  %759 = vst.msk [vmem:[#allocation2 + $0x68] sm:$0xff] %vm22_vm2, %v694_v34  ;;  %v1198_v63 = vld [vmem:[%s2517_s3 + $0x1e8] sm:$0xff]  ;;  %v1151_v3 = vld [vmem:[%s2517_s3 + $0x70] sm:$0xff] }
 0x10c   :  { %v1229_v10 = vadd.f32 %v1165_v0, %v1101_v6  ;;  %775 = vst.msk [vmem:[#allocation2 + $0xe8] sm:$0xff] %vm22_vm2, %v710_v60  ;;  %v1182_v60 = vld [vmem:[%s2517_s3 + $0x168] sm:$0xff] }
 0x10d   :  { %1277 = vst.msk [vmem:[%s2518_s4 + $0x60] sm:$0xff] %vm22_vm2, %v1213_v5  ;;  %vm989_vm8 = vcmp.ge.f32.partialorder %v925_v7, 0.0  ;;  %v1053_v14 = vmul.f32 0.01, %v925_v7  ;;  %v873_v15 = vld [vmem:[#allocation2 + $0x1e0] sm:$0xff] }
 0x10e   :  { %v636_v62 = vpop.f32.mrf.mxu2  ;;  %v676_v9 = vpop.f32.mrf.mxu3  ;;  %1293 = vst.msk [vmem:[%s2518_s4 + $0xe0] sm:$0xff] %vm22_vm2, %v1229_v10  ;;  %v941_v20 = vadd.f32 %v2266_v50, %v873_v15 }
 0x10f   :  { %v1117_v23 = vsel %vm989_vm8, %v925_v7, %v1053_v14  ;;  %791 = vst.msk [vmem:[#allocation2 + $0x168] sm:$0xff] %vm22_vm2, %v726_v8  ;;  %v727_v29 = vadd.f32 %v636_v62, %v133_v19  ;;  %v558_v31 = vpop.f32.mrf.mxu0  ;;  %v598_v35 = vpop.f32.mrf.mxu1  ;;  %v743_v37 = vadd.f32 %v676_v9, %v149_v16 }
 0x110   :  { %v1245_v25 = vadd.f32 %v1181_v11, %v1117_v23  ;;  %vm1005_vm9 = vcmp.ge.f32.partialorder %v941_v20, 0.0  ;;  %v1069_v26 = vmul.f32 0.01, %v941_v20  ;;  %807 = vst.msk [vmem:[#allocation2 + $0x1e8] sm:$0xff] %vm22_vm2, %v742_v12  ;;  %v696_v42 = vadd.f32 %v558_v31, %v102_v30  ;;  %v1167_v12 = vld [vmem:[%s2517_s3 + $0xf0] sm:$0xff] }
 0x111   :  { %760 = vst.msk [vmem:[#allocation2 + $0x70] sm:$0xff] %vm22_vm2, %v695_v18  ;;  %v712_v22 = vadd.f32 %v598_v35, %v118_v32  ;;  %v1183_v18 = vld [vmem:[%s2517_s3 + $0x170] sm:$0xff]  ;;  %v1152_v35 = vld [vmem:[%s2517_s3 + $0x78] sm:$0xff] }
 0x112   :  { %1309 = vst.msk [vmem:[%s2518_s4 + $0x160] sm:$0xff] %vm22_vm2, %v1245_v25  ;;  %v1133_v27 = vsel %vm1005_vm9, %v941_v20, %v1069_v26  ;;  %v826_v36 = vld [vmem:[#allocation2 + $0x68] sm:$0xff] }
 0x113   :  { %v1261_v40 = vadd.f32 %v1197_v28, %v1133_v27  ;;  %v894_v21 = vadd.f32 %v2266_v50, %v826_v36  ;;  %v842_v41 = vld [vmem:[#allocation2 + $0xe8] sm:$0xff]  ;;  %776 = vst.msk [vmem:[#allocation2 + $0xf0] sm:$0xff] %vm22_vm2, %v711_v24 }
 0x114   :  { %v910_v43 = vadd.f32 %v2266_v50, %v842_v41  ;;  %792 = vst.msk [vmem:[#allocation2 + $0x170] sm:$0xff] %vm22_vm2, %v727_v29  ;;  %v1199_v29 = vld [vmem:[%s2517_s3 + $0x1f0] sm:$0xff] }
 0x115   :  { %1325 = vst.msk [vmem:[%s2518_s4 + $0x1e0] sm:$0xff] %vm22_vm2, %v1261_v40  ;;  %vm958_vm10 = vcmp.ge.f32.partialorder %v894_v21, 0.0  ;;  %v1022_v44 = vmul.f32 0.01, %v894_v21 }
 0x116   :  { %v638_v39 = vpop.f32.mrf.mxu2  ;;  %v678_v48 = vpop.f32.mrf.mxu3  ;;  %vm974_vm11 = vcmp.ge.f32.partialorder %v910_v43, 0.0  ;;  %v1038_v49 = vmul.f32 0.01, %v910_v43  ;;  %v858_v52 = vld [vmem:[#allocation2 + $0x168] sm:$0xff]  ;;  %808 = vst.msk [vmem:[#allocation2 + $0x1f0] sm:$0xff] %vm22_vm2, %v743_v37 }
 0x117   :  { %v728_v46 = vadd.f32 %v638_v39, %v134_v38  ;;  %v1086_v17 = vsel %vm958_vm10, %v894_v21, %v1022_v44  ;;  %v926_v53 = vadd.f32 %v2266_v50, %v858_v52  ;;  %v874_v33 = vld [vmem:[#allocation2 + $0x1e8] sm:$0xff]  ;;  %761 = vst.msk [vmem:[#allocation2 + $0x78] sm:$0xff] %vm22_vm2, %v696_v42  ;;  %v744_v57 = vadd.f32 %v678_v48, %v150_v47  ;;  %v1168_v21 = vld [vmem:[%s2517_s3 + $0xf8] sm:$0xff] }
 0x118   :  { %v1214_v54 = vadd.f32 %v1150_v45, %v1086_v17  ;;  %v1102_v55 = vsel %vm974_vm11, %v910_v43, %v1038_v49  ;;  %v942_v56 = vadd.f32 %v2266_v50, %v874_v33  ;;  %v827_v34 = vld [vmem:[#allocation2 + $0x70] sm:$0xff]  ;;  %777 = vst.msk [vmem:[#allocation2 + $0xf8] sm:$0xff] %vm22_vm2, %v712_v22  ;;  %v1184_v22 = vld [vmem:[%s2517_s3 + $0x178] sm:$0xff] }
 0x119   :  { %v1230_v58 = vadd.f32 %v1166_v51, %v1102_v55  ;;  %vm990_vm12 = vcmp.ge.f32.partialorder %v926_v53, 0.0  ;;  %v1054_v59 = vmul.f32 0.01, %v926_v53  ;;  %v895_v61 = vadd.f32 %v2266_v50, %v827_v34  ;;  %793 = vst.msk [vmem:[#allocation2 + $0x178] sm:$0xff] %vm22_vm2, %v728_v46  ;;  %v1200_v49 = vld [vmem:[%s2517_s3 + $0x1f8] sm:$0xff] }
 0x11a   :  { %1278 = vst.msk [vmem:[%s2518_s4 + $0x68] sm:$0xff] %vm22_vm2, %v1214_v54  ;;  %vm1006_vm13 = vcmp.ge.f32.partialorder %v942_v56, 0.0  ;;  %v1070_v62 = vmul.f32 0.01, %v942_v56  ;;  %v843_v0 = vld [vmem:[#allocation2 + $0xf0] sm:$0xff] }
 0x11b   :  { %1294 = vst.msk [vmem:[%s2518_s4 + $0xe8] sm:$0xff] %vm22_vm2, %v1230_v58  ;;  %v1118_v1 = vsel %vm990_vm12, %v926_v53, %v1054_v59  ;;  %vm959_vm14 = vcmp.ge.f32.partialorder %v895_v61, 0.0  ;;  %v1023_v2 = vmul.f32 0.01, %v895_v61  ;;  %v911_v4 = vadd.f32 %v2266_v50, %v843_v0  ;;  %v859_v5 = vld [vmem:[#allocation2 + $0x170] sm:$0xff] }
 0x11c   :  { %v1246_v6 = vadd.f32 %v1182_v60, %v1118_v1  ;;  %v1134_v7 = vsel %vm1006_vm13, %v942_v56, %v1070_v62  ;;  %v927_v8 = vadd.f32 %v2266_v50, %v859_v5  ;;  %809 = vst.msk [vmem:[#allocation2 + $0x1f8] sm:$0xff] %vm22_vm2, %v744_v57 }
 0x11d   :  { %v1262_v9 = vadd.f32 %v1198_v63, %v1134_v7  ;;  %v1087_v10 = vsel %vm959_vm14, %v895_v61, %v1023_v2  ;;  %vm975_vm15 = vcmp.ge.f32.partialorder %v911_v4, 0.0  ;;  %v1039_v11 = vmul.f32 0.01, %v911_v4  ;;  %v875_v13 = vld [vmem:[#allocation2 + $0x1f0] sm:$0xff] }
 0x11e   :  { %1310 = vst.msk [vmem:[%s2518_s4 + $0x168] sm:$0xff] %vm22_vm2, %v1246_v6  ;;  %v1215_v14 = vadd.f32 %v1151_v3, %v1087_v10  ;;  %vm991_vm0 = vcmp.ge.f32.partialorder %v927_v8, 0.0  ;;  %v1055_v15 = vmul.f32 0.01, %v927_v8  ;;  %v943_v19 = vadd.f32 %v2266_v50, %v875_v13  ;;  %v828_v20 = vld [vmem:[#allocation2 + $0x78] sm:$0xff] }
 0x11f   :  { %1326 = vst.msk [vmem:[%s2518_s4 + $0x1e8] sm:$0xff] %vm22_vm2, %v1262_v9  ;;  %v1103_v23 = vsel %vm975_vm15, %v911_v4, %v1039_v11  ;;  %v896_v24 = vadd.f32 %v2266_v50, %v828_v20  ;;  %v844_v16 = vld [vmem:[#allocation2 + $0xf8] sm:$0xff] }
 0x120   :  { %1279 = vst.msk [vmem:[%s2518_s4 + $0x70] sm:$0xff] %vm22_vm2, %v1215_v14  ;;  %v1231_v25 = vadd.f32 %v1167_v12, %v1103_v23  ;;  %v1119_v26 = vsel %vm991_vm0, %v927_v8, %v1055_v15  ;;  %vm1007_vm1 = vcmp.ge.f32.partialorder %v943_v19, 0.0  ;;  %v1071_v28 = vmul.f32 0.01, %v943_v19  ;;  %v860_v30 = vld [vmem:[#allocation2 + $0x178] sm:$0xff] }
 0x121   :  { %v1247_v31 = vadd.f32 %v1183_v18, %v1119_v26  ;;  %vm960_vm3 = vcmp.ge.f32.partialorder %v896_v24, 0.0  ;;  %v1024_v32 = vmul.f32 0.01, %v896_v24  ;;  %v912_v27 = vadd.f32 %v2266_v50, %v844_v16 }
 0x122   :  { %1295 = vst.msk [vmem:[%s2518_s4 + $0xf0] sm:$0xff] %vm22_vm2, %v1231_v25  ;;  %v1135_v36 = vsel %vm1007_vm1, %v943_v19, %v1071_v28  ;;  %v928_v37 = vadd.f32 %v2266_v50, %v860_v30 }
 0x123   :  { %1311 = vst.msk [vmem:[%s2518_s4 + $0x170] sm:$0xff] %vm22_vm2, %v1247_v31  ;;  %v1263_v38 = vadd.f32 %v1199_v29, %v1135_v36  ;;  %v1088_v39 = vsel %vm960_vm3, %v896_v24, %v1024_v32  ;;  %vm976_vm4 = vcmp.ge.f32.partialorder %v912_v27, 0.0  ;;  %v1040_v40 = vmul.f32 0.01, %v912_v27  ;;  %v876_v41 = vld [vmem:[#allocation2 + $0x1f8] sm:$0xff] }
 0x124   :  { %v1216_v42 = vadd.f32 %v1152_v35, %v1088_v39  ;;  %vm992_vm5 = vcmp.ge.f32.partialorder %v928_v37, 0.0  ;;  %v1056_v43 = vmul.f32 0.01, %v928_v37  ;;  %v944_v44 = vadd.f32 %v2266_v50, %v876_v41 }
 0x125   :  { %1327 = vst.msk [vmem:[%s2518_s4 + $0x1f0] sm:$0xff] %vm22_vm2, %v1263_v38  ;;  %v1104_v45 = vsel %vm976_vm4, %v912_v27, %v1040_v40 }
 0x126   :  { %1280 = vst.msk [vmem:[%s2518_s4 + $0x78] sm:$0xff] %vm22_vm2, %v1216_v42  ;;  %v1232_v46 = vadd.f32 %v1168_v21, %v1104_v45  ;;  %v1120_v47 = vsel %vm992_vm5, %v928_v37, %v1056_v43  ;;  %vm1008_vm6 = vcmp.ge.f32.partialorder %v944_v44, 0.0  ;;  %v1072_v48 = vmul.f32 0.01, %v944_v44 }
 0x127   :  { %v1248_v50 = vadd.f32 %v1184_v22, %v1120_v47 }
 0x128   :  { %1296 = vst.msk [vmem:[%s2518_s4 + $0xf8] sm:$0xff] %vm22_vm2, %v1232_v46  ;;  %v1136_v51 = vsel %vm1008_vm6, %v944_v44, %v1072_v48 }
 0x129   :  { %1312 = vst.msk [vmem:[%s2518_s4 + $0x178] sm:$0xff] %vm22_vm2, %v1248_v50  ;;  %v1264_v52 = vadd.f32 %v1200_v49, %v1136_v51 }
 0x12b   :  { %1328 = vst.msk [vmem:[%s2518_s4 + $0x1f8] sm:$0xff] %vm22_vm2, %v1264_v52 }

</bundles_post_ra>
